<compile_context>
chip_gen: v5e
topology: v5e:2x2
jax: 0.10.0
libtpu: 0.0.40
codegen_flags: <defaults>
</compile_context>

<pallas_src>
import jax
import jax.numpy as jnp
from jax.experimental import pallas as pl
from jax.experimental.pallas import tpu as pltpu

# ------------------------------------------------------------------ constants
T_TRAIN = 1000          # diffusion timesteps
SEQ = 8                 # states sequence length
D_STATE = 512           # states feature dim
D_HIDDEN = 768          # denoiser hidden size
D_SSM = 1536            # expanded ssm dim
D_TIME = 256            # time embedding dim


# ------------------------------------------------------------------ fused kernel
def _make_kernel(bt: int, emit_embds: bool):
    """add_noise -> (folded reduce1) -> expand -> reduce2 -> per-batch MSE partials."""

    def kernel(*refs):
        (a_ref, s_ref, tgt_ref, noi_ref, cond_ref,
         bda_ref, bdb_ref, exp_w_ref, fold_b_ref, red2_w_ref, red2_b_ref) = refs[:11]
        if emit_embds:
            (te_ref, pos_ref, time_w_ref, time_b_ref,
             pred_ref, err_ref, emb_ref) = refs[11:]
        else:
            pred_ref, err_ref = refs[11:]

        # ---- DDIM add_noise: per-batch scalar broadcast over (bt, 8, 512) ------
        noise = noi_ref[...]                                           # (bt,8,512)
        noisy = tgt_ref[...] * a_ref[...] + noise * s_ref[...]         # (bt,8,512)

        # ---- reduce_states1 folded in front of expand_states --------------------
        # Valid only while the Mamba denoiser is identity on its ssm states:
        #   pred = ((W1 @ cat) @ Wexp + fold_b) @ W2 + b2
        # The per-batch W1 @ cat mixing is done with two block-diagonal
        # kron(I_bt, W1a) / kron(I_bt, W1b) matmuls so every contraction below
        # is a plain lane-dense 2-D matmul with M = bt*8.
        noisy_flat = noisy.reshape(bt * SEQ, D_STATE)                   # (bt*8,512)
        cond_flat = cond_ref[...].reshape(bt * SEQ, D_STATE)
        c8 = (jnp.dot(bda_ref[...], noisy_flat, preferred_element_type=jnp.float32)
              + jnp.dot(bdb_ref[...], cond_flat, preferred_element_type=jnp.float32))

        r1 = jnp.dot(c8.astype(jnp.bfloat16), exp_w_ref[...],
                     preferred_element_type=jnp.float32)                # (bt*8,1536)
        r1 = (r1.reshape(bt, SEQ, D_SSM)
              + fold_b_ref[...][None]).reshape(bt * SEQ, D_SSM)

        pred = jnp.dot(r1.astype(jnp.bfloat16), red2_w_ref[...],
                       preferred_element_type=jnp.float32) + red2_b_ref[...]
        pred = pred.reshape(bt, SEQ, D_STATE)                           # (bt,8,512)
        pred_ref[...] = pred

        # ---- per-batch squared error, lane-folded to a dense 128-wide row ------
        d = pred - noise
        per = jnp.sum(d * d, axis=1)                                    # (bt, 512)
        err_ref[...] = (per[:, 0:128] + per[:, 128:256]
                        + per[:, 256:384] + per[:, 384:512])            # (bt, 128)

        if emit_embds:
            # time conditioning: Linear(256 -> 1536) on the bt distinct rows,
            # broadcast over the 8 positions only for the modulate.
            tl = jnp.dot(te_ref[...].astype(jnp.bfloat16), time_w_ref[...],
                         preferred_element_type=jnp.float32) + time_b_ref[...]
            scale = tl[:, :D_HIDDEN]
            shift = tl[:, D_HIDDEN:]
            emb_ref[...] = (pos_ref[...][None] * (scale[:, None, :] + 1.0)
                            + shift[:, None, :])                        # (bt,8,768)

    return kernel


# ------------------------------------------------------------------ wrapper
def fused_predict_and_loss(params, target, condition, noise, timesteps,
                           *, bt_max=16, emit_embds=False):
    """Runs the fused kernel.  Returns (pred, per_batch_sqerr[, input_embds])."""
    B = target.shape[0]
    BT = B if B <= bt_max else bt_max            # bt_max=8 on v5e (128-row MXU)
    n_tiles = -(-B // BT)
    B_pad = n_tiles * BT

    acp_t = params["alphas_cumprod"][timesteps]                  # (B,)
    a = jnp.sqrt(acp_t).reshape(B, 1, 1)
    s = jnp.sqrt(1.0 - acp_t).reshape(B, 1, 1)

    red1_w = params["red1_w"]                                    # (8,16) torch layout
    # Constant bias of the reduce1-before-expand fold (identity denoiser only).
    fold_b = (jnp.sum(red1_w, axis=1, keepdims=True) * params["expand_b"][None, :]
              + params["red1_b"][:, None])                       # (8,1536) f32
    eye_bt = jnp.eye(BT, dtype=jnp.float32)
    bd_a = jnp.kron(eye_bt, red1_w[:, :SEQ])                     # (BT*8, BT*8)
    bd_b = jnp.kron(eye_bt, red1_w[:, SEQ:])                     # (BT*8, BT*8)

    def padb(x):
        if B_pad == B:
            return x
        return jnp.pad(x, [(0, B_pad - B)] + [(0, 0)] * (x.ndim - 1))

    batch3 = lambda i: (i, 0, 0)
    batch2 = lambda i: (i, 0)
    const2 = lambda i: (0, 0)

    inputs = [padb(a), padb(s), padb(target), padb(noise), padb(condition),
              bd_a, bd_b, params["expand_w"], fold_b, params["red2_w"],
              params["red2_b"].reshape(1, D_STATE)]
    in_specs = [
        pl.BlockSpec((BT, 1, 1), batch3),             # sqrt(acp)
        pl.BlockSpec((BT, 1, 1), batch3),             # sqrt(1-acp)
        pl.BlockSpec((BT, SEQ, D_STATE), batch3),     # target
        pl.BlockSpec((BT, SEQ, D_STATE), batch3),     # noise
        pl.BlockSpec((BT, SEQ, D_STATE), batch3),     # condition
        # grid-invariant blocks below (constant index_map; candidates for
        # pl.Buffered(1) single-buffering on v7x — left default for portability)
        pl.BlockSpec((BT * SEQ, BT * SEQ), const2),   # kron(I, red1_w[:, :8])
        pl.BlockSpec((BT * SEQ, BT * SEQ), const2),   # kron(I, red1_w[:, 8:])
        pl.BlockSpec((D_STATE, D_SSM), const2),       # expand_w (bf16)
        pl.BlockSpec((SEQ, D_SSM), const2),           # folded bias
        pl.BlockSpec((D_SSM, D_STATE), const2),       # red2_w (bf16)
        pl.BlockSpec((1, D_STATE), const2),           # red2_b
    ]
    out_specs = [
        pl.BlockSpec((BT, SEQ, D_STATE), batch3),     # pred
        pl.BlockSpec((BT, 128), batch2),              # per-batch sq-err partials
    ]
    out_shape = [
        jax.ShapeDtypeStruct((B_pad, SEQ, D_STATE), jnp.float32),
        jax.ShapeDtypeStruct((B_pad, 128), jnp.float32),
    ]

    if emit_embds:
        te = params["time_embeds"][timesteps]          # gather moved to the wrapper
        inputs += [padb(te), params["pos_embeds"], params["time_w"],
                   params["time_b"].reshape(1, D_SSM)]
        in_specs += [
            pl.BlockSpec((BT, D_TIME), batch2),        # gathered time embeddings
            pl.BlockSpec((SEQ, D_HIDDEN), const2),     # pos_embeds
            pl.BlockSpec((D_TIME, D_SSM), const2),     # time_w (bf16)
            pl.BlockSpec((1, D_SSM), const2),          # time_b
        ]
        out_specs.append(pl.BlockSpec((BT, SEQ, D_HIDDEN), batch3))
        out_shape.append(jax.ShapeDtypeStruct((B_pad, SEQ, D_HIDDEN), jnp.float32))

    outs = pl.pallas_call(
        _make_kernel(BT, emit_embds),
        grid_spec=pltpu.PrefetchScalarGridSpec(
            num_scalar_prefetch=0,
            grid=(n_tiles,),
            in_specs=in_specs,
            out_specs=tuple(out_specs),
        ),
        out_shape=tuple(out_shape),
        compiler_params=pltpu.CompilerParams(
            dimension_semantics=("parallel",),          # batch tiles across TCs (v7x)
            vmem_limit_bytes=32 * 1024 * 1024,          # ~10 MiB used at BT=16
        ),
    )(*inputs)

    pred = outs[0][:B]
    sqerr = outs[1][:B]
    if emit_embds:
        return pred, sqerr, outs[2][:B]
    return pred, sqerr


# ------------------------------------------------------------------ params / glue
def init_embeds(dim, length, power=10000.0):
    pos = jnp.arange(length, dtype=jnp.float32)[:, None]
    i = jnp.arange(dim, dtype=jnp.float32)[None, :]
    angle_rates = 1.0 / jnp.power(power, (jnp.floor(i / 2.0) * 2.0) / dim)
    angles = pos * angle_rates
    embeds = jnp.zeros_like(angles)
    embeds = embeds.at[:, 0::2].set(jnp.sin(angles[:, 0::2]))
    embeds = embeds.at[:, 1::2].set(jnp.cos(angles[:, 1::2]))
    return embeds


def _linear_params(key, in_f, out_f, w_dtype=jnp.bfloat16):
    # PyTorch nn.Linear default init; weight stored transposed [in, out].
    kw, kb = jax.random.split(key)
    bound = 1.0 / float(in_f) ** 0.5
    w_t = jax.random.uniform(kw, (in_f, out_f), jnp.float32, -bound, bound)
    b = jax.random.uniform(kb, (out_f,), jnp.float32, -bound, bound)
    return w_t.astype(w_dtype), b


def make_params(key):
    k1, k2, k3 = jax.random.split(key, 3)
    p = {}
    p["time_embeds"] = init_embeds(D_TIME, T_TRAIN)                      # (1000,256)
    p["pos_embeds"] = init_embeds(D_HIDDEN, SEQ)                         # (8,768)
    p["expand_w"], p["expand_b"] = _linear_params(k1, D_STATE, D_SSM)    # bf16 / f32
    r1w, r1b = _linear_params(k2, 2 * SEQ, SEQ, w_dtype=jnp.float32)
    p["red1_w"], p["red1_b"] = r1w.T, r1b                                # (8,16), (8,)
    p["red2_w"], p["red2_b"] = _linear_params(k3, D_SSM, D_STATE)        # bf16 / f32
    # time_linear is zero-initialized in the module (nn.init.zeros_).
    p["time_w"] = jnp.zeros((D_TIME, D_SSM), jnp.bfloat16)
    p["time_b"] = jnp.zeros((D_SSM,), jnp.float32)
    # DDIMScheduler defaults: linear betas 1e-4 .. 2e-2, 1000 train steps.
    betas = jnp.linspace(1e-4, 2e-2, T_TRAIN, dtype=jnp.float32)
    p["alphas_cumprod"] = jnp.cumprod(1.0 - betas)
    return p


@jax.jit
def diffuser_forward(params, target, condition, key):
    """Mirrors Diffuser.forward: returns (loss, timesteps, pred)."""
    B = target.shape[0]
    k_t, k_n = jax.random.split(key)
    timesteps = jax.random.randint(k_t, (B,), 0, T_TRAIN, dtype=jnp.int32)
    noise = jax.random.normal(k_n, target.shape, jnp.float32)
    pred, sqerr = fused_predict_and_loss(params, target, condition, noise, timesteps)
    loss = jnp.sum(sqerr) / float(B * SEQ * D_STATE)
    return loss, timesteps, pred


# ------------------------------------------------------------------ pure-JAX reference
def reference_forward(params, target, condition, noise, timesteps):
    """Follows the PyTorch graph (denoiser == identity), same bf16 weight casts."""
    acp_t = params["alphas_cumprod"][timesteps]
    a = jnp.sqrt(acp_t)[:, None, None]
    s = jnp.sqrt(1.0 - acp_t)[:, None, None]
    noisy = target * a + noise * s                                        # add_noise
    states = jnp.concatenate([noisy, condition], axis=1)                  # (B,16,512)
    exp = (jnp.einsum("bkc,cd->bkd", states.astype(jnp.bfloat16), params["expand_w"],
                      preferred_element_type=jnp.float32)
           + params["expand_b"][None, None, :])                           # (B,16,1536)
    ssm = jnp.swapaxes(exp, 1, 2)                                         # transpose(1,2)
    # TODO(synk): MambaModel denoiser -> identity on inputs_ssm_states.
    r1 = (jnp.einsum("bdk,ok->bdo", ssm, params["red1_w"])
          + params["red1_b"][None, None, :])                              # (B,1536,8)
    r1 = jnp.swapaxes(r1, 1, 2)                                           # (B,8,1536)
    pred = (jnp.einsum("bkd,dc->bkc", r1.astype(jnp.bfloat16), params["red2_w"],
                       preferred_element_type=jnp.float32)
            + params["red2_b"][None, None, :])                            # (B,8,512)
    loss = jnp.mean((pred - noise) ** 2)
    return loss, pred


def reference_embds(params, timesteps):
    te = params["time_embeds"][timesteps]                                 # (B,256)
    tl = (jnp.dot(te.astype(jnp.bfloat16), params["time_w"],
                  preferred_element_type=jnp.float32) + params["time_b"][None, :])
    scale, shift = tl[:, :D_HIDDEN], tl[:, D_HIDDEN:]
    pos = params["pos_embeds"]
    return pos[None] * (scale[:, None, :] + 1.0) + shift[:, None, :]


# ------------------------------------------------------------------ main
if __name__ == "__main__":
    root = jax.random.PRNGKey(0)
    k_params, k_tgt, k_cond, k_fwd, k_tw = jax.random.split(root, 5)
    params = make_params(k_params)

    B = 2
    target = jax.random.normal(k_tgt, (B, SEQ, D_STATE), jnp.float32)
    condition = jax.random.normal(k_cond, (B, SEQ, D_STATE), jnp.float32)

    loss, timesteps, pred = diffuser_forward(params, target, condition, k_fwd)
    jax.block_until_ready((loss, timesteps, pred))

    assert pred.shape == (B, SEQ, D_STATE)
    assert timesteps.shape == (B,)
    assert loss.shape == ()
    assert bool(jnp.isfinite(loss))

    # Cross-check against the pure-JAX reference with the same RNG draws.
    k_t, k_n = jax.random.split(k_fwd)
    ts = jax.random.randint(k_t, (B,), 0, T_TRAIN, dtype=jnp.int32)
    noise = jax.random.normal(k_n, target.shape, jnp.float32)
    loss_ref, pred_ref = reference_forward(params, target, condition, noise, ts)
    assert bool(jnp.allclose(pred, pred_ref, rtol=1e-2, atol=1e-2))
    assert bool(jnp.allclose(loss, loss_ref, rtol=1e-2, atol=1e-2))

    # Validate the time-conditioning / modulate branch with a non-zero time_w
    # (it is zero-initialized in the module, so the default check cannot see it).
    params_tw = dict(params)
    params_tw["time_w"] = (0.02 * jax.random.normal(
        k_tw, (D_TIME, D_SSM), jnp.float32)).astype(jnp.bfloat16)
    params_tw["time_b"] = 0.01 * jnp.ones((D_SSM,), jnp.float32)
    pred2, _sqerr2, embds = fused_predict_and_loss(
        params_tw, target, condition, noise, ts, emit_embds=True)
    jax.block_until_ready(embds)
    assert embds.shape == (B, SEQ, D_HIDDEN)
    assert bool(jnp.allclose(embds, reference_embds(params_tw, ts), rtol=1e-2, atol=1e-2))
    assert bool(jnp.allclose(pred2, pred_ref, rtol=1e-2, atol=1e-2))

    print("KERNEL_OK")
</pallas_src>

<mosaic_0001>
module attributes {stable_mosaic.version = 11 : i64} {
  func.func @kernel(%arg0: i32, %arg1: memref<2x1x1xf32, #tpu.memory_space<vmem>>, %arg2: memref<2x1x1xf32, #tpu.memory_space<vmem>>, %arg3: memref<2x8x512xf32, #tpu.memory_space<vmem>>, %arg4: memref<2x8x512xf32, #tpu.memory_space<vmem>>, %arg5: memref<2x8x512xf32, #tpu.memory_space<vmem>>, %arg6: memref<16x16xf32, #tpu.memory_space<vmem>>, %arg7: memref<16x16xf32, #tpu.memory_space<vmem>>, %arg8: memref<512x1536xbf16, #tpu.memory_space<vmem>>, %arg9: memref<8x1536xf32, #tpu.memory_space<vmem>>, %arg10: memref<1536x512xbf16, #tpu.memory_space<vmem>>, %arg11: memref<1x512xf32, #tpu.memory_space<vmem>>, %arg12: memref<2x8x512xf32, #tpu.memory_space<vmem>>, %arg13: memref<2x128xf32, #tpu.memory_space<vmem>>) attributes {dimension_semantics = [#tpu.dimension_semantics<parallel>], iteration_bounds = array<i64: 1>, scalar_prefetch = 0 : i64, scratch_operands = 0 : i64, tpu.core_type = #tpu.core_type<tc>, window_params = [{transform_indices = @transform_0, window_bounds = array<i64: 2, 1, 1>}, {transform_indices = @transform_1, window_bounds = array<i64: 2, 1, 1>}, {transform_indices = @transform_2, window_bounds = array<i64: 2, 8, 512>}, {transform_indices = @transform_3, window_bounds = array<i64: 2, 8, 512>}, {transform_indices = @transform_4, window_bounds = array<i64: 2, 8, 512>}, {pipeline_mode = #tpu.pipeline_mode<synchronous>, transform_indices = @transform_5, window_bounds = array<i64: 16, 16>}, {pipeline_mode = #tpu.pipeline_mode<synchronous>, transform_indices = @transform_6, window_bounds = array<i64: 16, 16>}, {pipeline_mode = #tpu.pipeline_mode<synchronous>, transform_indices = @transform_7, window_bounds = array<i64: 512, 1536>}, {pipeline_mode = #tpu.pipeline_mode<synchronous>, transform_indices = @transform_8, window_bounds = array<i64: 8, 1536>}, {pipeline_mode = #tpu.pipeline_mode<synchronous>, transform_indices = @transform_9, window_bounds = array<i64: 1536, 512>}, {pipeline_mode = #tpu.pipeline_mode<synchronous>, transform_indices = @transform_10, window_bounds = array<i64: 1, 512>}, {transform_indices = @transform_11, window_bounds = array<i64: 2, 8, 512>}, {transform_indices = @transform_12, window_bounds = array<i64: 2, 128>}]} {
    %c0 = arith.constant 0 : index
    %c0_0 = arith.constant 0 : index
    %c0_1 = arith.constant 0 : index
    %0 = vector.load %arg4[%c0, %c0_0, %c0_1] : memref<2x8x512xf32, #tpu.memory_space<vmem>>, vector<2x8x512xf32>
    %c0_2 = arith.constant 0 : index
    %c0_3 = arith.constant 0 : index
    %c0_4 = arith.constant 0 : index
    %1 = vector.load %arg3[%c0_2, %c0_3, %c0_4] : memref<2x8x512xf32, #tpu.memory_space<vmem>>, vector<2x8x512xf32>
    %c0_5 = arith.constant 0 : index
    %c0_6 = arith.constant 0 : index
    %c0_7 = arith.constant 0 : index
    %2 = vector.load %arg1[%c0_5, %c0_6, %c0_7] : memref<2x1x1xf32, #tpu.memory_space<vmem>>, vector<2x1x1xf32>
    %3 = vector.broadcast %2 : vector<2x1x1xf32> to vector<2x8x512xf32>
    %4 = arith.mulf %1, %3 : vector<2x8x512xf32>
    %c0_8 = arith.constant 0 : index
    %c0_9 = arith.constant 0 : index
    %c0_10 = arith.constant 0 : index
    %5 = vector.load %arg2[%c0_8, %c0_9, %c0_10] : memref<2x1x1xf32, #tpu.memory_space<vmem>>, vector<2x1x1xf32>
    %6 = vector.broadcast %5 : vector<2x1x1xf32> to vector<2x8x512xf32>
    %7 = arith.mulf %0, %6 : vector<2x8x512xf32>
    %8 = arith.addf %4, %7 : vector<2x8x512xf32>
    %9 = vector.shape_cast %8 : vector<2x8x512xf32> to vector<16x512xf32>
    %c0_11 = arith.constant 0 : index
    %c0_12 = arith.constant 0 : index
    %c0_13 = arith.constant 0 : index
    %10 = vector.load %arg5[%c0_11, %c0_12, %c0_13] : memref<2x8x512xf32, #tpu.memory_space<vmem>>, vector<2x8x512xf32>
    %11 = vector.shape_cast %10 : vector<2x8x512xf32> to vector<16x512xf32>
    %c0_14 = arith.constant 0 : index
    %c0_15 = arith.constant 0 : index
    %12 = vector.load %arg6[%c0_14, %c0_15] : memref<16x16xf32, #tpu.memory_space<vmem>>, vector<16x16xf32>
    %cst = arith.constant dense<0.000000e+00> : vector<16x512xf32>
    %13 = tpu.matmul %12, %9, %cst {dimension_numbers = #tpu.dot_dimension_numbers<[1], [0], [0], [1], [0, 0, 1, 1], [], []>} : vector<16x16xf32>, vector<16x512xf32>, vector<16x512xf32> -> vector<16x512xf32>
    %c0_16 = arith.constant 0 : index
    %c0_17 = arith.constant 0 : index
    %14 = vector.load %arg7[%c0_16, %c0_17] : memref<16x16xf32, #tpu.memory_space<vmem>>, vector<16x16xf32>
    %cst_18 = arith.constant dense<0.000000e+00> : vector<16x512xf32>
    %15 = tpu.matmul %14, %11, %cst_18 {dimension_numbers = #tpu.dot_dimension_numbers<[1], [0], [0], [1], [0, 0, 1, 1], [], []>} : vector<16x16xf32>, vector<16x512xf32>, vector<16x512xf32> -> vector<16x512xf32>
    %16 = arith.addf %13, %15 : vector<16x512xf32>
    %17 = arith.truncf %16 : vector<16x512xf32> to vector<16x512xbf16>
    %c0_19 = arith.constant 0 : index
    %c0_20 = arith.constant 0 : index
    %18 = vector.load %arg8[%c0_19, %c0_20] : memref<512x1536xbf16, #tpu.memory_space<vmem>>, vector<512x1536xbf16>
    %cst_21 = arith.constant dense<0.000000e+00> : vector<16x1536xf32>
    %19 = tpu.matmul %17, %18, %cst_21 {dimension_numbers = #tpu.dot_dimension_numbers<[1], [0], [0], [1], [0, 0, 1, 1], [], []>} : vector<16x512xbf16>, vector<512x1536xbf16>, vector<16x1536xf32> -> vector<16x1536xf32>
    %20 = vector.shape_cast %19 : vector<16x1536xf32> to vector<2x8x1536xf32>
    %c0_22 = arith.constant 0 : index
    %c0_23 = arith.constant 0 : index
    %21 = vector.load %arg9[%c0_22, %c0_23] : memref<8x1536xf32, #tpu.memory_space<vmem>>, vector<8x1536xf32>
    %22 = vector.shape_cast %21 : vector<8x1536xf32> to vector<1x8x1536xf32>
    %23 = vector.broadcast %22 : vector<1x8x1536xf32> to vector<2x8x1536xf32>
    %24 = arith.addf %20, %23 : vector<2x8x1536xf32>
    %25 = vector.shape_cast %24 : vector<2x8x1536xf32> to vector<16x1536xf32>
    %26 = arith.truncf %25 : vector<16x1536xf32> to vector<16x1536xbf16>
    %c0_24 = arith.constant 0 : index
    %c0_25 = arith.constant 0 : index
    %27 = vector.load %arg10[%c0_24, %c0_25] : memref<1536x512xbf16, #tpu.memory_space<vmem>>, vector<1536x512xbf16>
    %cst_26 = arith.constant dense<0.000000e+00> : vector<16x512xf32>
    %28 = tpu.matmul %26, %27, %cst_26 {dimension_numbers = #tpu.dot_dimension_numbers<[1], [0], [0], [1], [0, 0, 1, 1], [], []>} : vector<16x1536xbf16>, vector<1536x512xbf16>, vector<16x512xf32> -> vector<16x512xf32>
    %c0_27 = arith.constant 0 : index
    %c0_28 = arith.constant 0 : index
    %29 = vector.load %arg11[%c0_27, %c0_28] : memref<1x512xf32, #tpu.memory_space<vmem>>, vector<1x512xf32>
    %30 = vector.broadcast %29 : vector<1x512xf32> to vector<16x512xf32>
    %31 = arith.addf %28, %30 : vector<16x512xf32>
    %32 = vector.shape_cast %31 : vector<16x512xf32> to vector<2x8x512xf32>
    %c0_29 = arith.constant 0 : index
    %c0_30 = arith.constant 0 : index
    %c0_31 = arith.constant 0 : index
    %33 = vector.load %arg12[%c0_29, %c0_30, %c0_31] : memref<2x8x512xf32, #tpu.memory_space<vmem>>, vector<2x8x512xf32>
    tpu.vector_store %arg12[%c0_29, %c0_30, %c0_31], %32 {strides = array<i32>} : memref<2x8x512xf32, #tpu.memory_space<vmem>>, vector<2x8x512xf32>,
    %34 = arith.subf %32, %0 : vector<2x8x512xf32>
    %35 = arith.mulf %34, %34 : vector<2x8x512xf32>
    %cst_32 = arith.constant dense<0.000000e+00> : vector<2x512xf32>
    %36 = vector.multi_reduction <add>, %35, %cst_32 [1] : vector<2x8x512xf32> to vector<2x512xf32>
    %37 = vector.extract_strided_slice %36 {offsets = [0, 0], sizes = [2, 128], strides = [1, 1]} : vector<2x512xf32> to vector<2x128xf32>
    %38 = vector.extract_strided_slice %36 {offsets = [0, 128], sizes = [2, 128], strides = [1, 1]} : vector<2x512xf32> to vector<2x128xf32>
    %39 = arith.addf %37, %38 : vector<2x128xf32>
    %40 = vector.extract_strided_slice %36 {offsets = [0, 256], sizes = [2, 128], strides = [1, 1]} : vector<2x512xf32> to vector<2x128xf32>
    %41 = arith.addf %39, %40 : vector<2x128xf32>
    %42 = vector.extract_strided_slice %36 {offsets = [0, 384], sizes = [2, 128], strides = [1, 1]} : vector<2x512xf32> to vector<2x128xf32>
    %43 = arith.addf %41, %42 : vector<2x128xf32>
    %c0_33 = arith.constant 0 : index
    %c0_34 = arith.constant 0 : index
    %44 = vector.load %arg13[%c0_33, %c0_34] : memref<2x128xf32, #tpu.memory_space<vmem>>, vector<2x128xf32>
    tpu.vector_store %arg13[%c0_33, %c0_34], %43 {strides = array<i32>} : memref<2x128xf32, #tpu.memory_space<vmem>>, vector<2x128xf32>,
    return
  }
  func.func @transform_0(%arg0: i32) -> (i32, i32, i32) {
    %c0_i32 = arith.constant 0 : i32
    %c0_i32_0 = arith.constant 0 : i32
    %c0_i32_1 = arith.constant 0 : i32
    return %arg0, %c0_i32, %c0_i32_0 : i32, i32, i32
  }
  func.func @transform_1(%arg0: i32) -> (i32, i32, i32) {
    %c0_i32 = arith.constant 0 : i32
    %c0_i32_0 = arith.constant 0 : i32
    %c0_i32_1 = arith.constant 0 : i32
    return %arg0, %c0_i32, %c0_i32_0 : i32, i32, i32
  }
  func.func @transform_2(%arg0: i32) -> (i32, i32, i32) {
    %c0_i32 = arith.constant 0 : i32
    %c0_i32_0 = arith.constant 0 : i32
    %c0_i32_1 = arith.constant 0 : i32
    return %arg0, %c0_i32, %c0_i32_0 : i32, i32, i32
  }
  func.func @transform_3(%arg0: i32) -> (i32, i32, i32) {
    %c0_i32 = arith.constant 0 : i32
    %c0_i32_0 = arith.constant 0 : i32
    %c0_i32_1 = arith.constant 0 : i32
    return %arg0, %c0_i32, %c0_i32_0 : i32, i32, i32
  }
  func.func @transform_4(%arg0: i32) -> (i32, i32, i32) {
    %c0_i32 = arith.constant 0 : i32
    %c0_i32_0 = arith.constant 0 : i32
    %c0_i32_1 = arith.constant 0 : i32
    return %arg0, %c0_i32, %c0_i32_0 : i32, i32, i32
  }
  func.func @transform_5(%arg0: i32) -> (i32, i32) {
    %c0_i32 = arith.constant 0 : i32
    %c0_i32_0 = arith.constant 0 : i32
    %c0_i32_1 = arith.constant 0 : i32
    return %c0_i32, %c0_i32_0 : i32, i32
  }
  func.func @transform_6(%arg0: i32) -> (i32, i32) {
    %c0_i32 = arith.constant 0 : i32
    %c0_i32_0 = arith.constant 0 : i32
    %c0_i32_1 = arith.constant 0 : i32
    return %c0_i32, %c0_i32_0 : i32, i32
  }
  func.func @transform_7(%arg0: i32) -> (i32, i32) {
    %c0_i32 = arith.constant 0 : i32
    %c0_i32_0 = arith.constant 0 : i32
    %c0_i32_1 = arith.constant 0 : i32
    return %c0_i32, %c0_i32_0 : i32, i32
  }
  func.func @transform_8(%arg0: i32) -> (i32, i32) {
    %c0_i32 = arith.constant 0 : i32
    %c0_i32_0 = arith.constant 0 : i32
    %c0_i32_1 = arith.constant 0 : i32
    return %c0_i32, %c0_i32_0 : i32, i32
  }
  func.func @transform_9(%arg0: i32) -> (i32, i32) {
    %c0_i32 = arith.constant 0 : i32
    %c0_i32_0 = arith.constant 0 : i32
    %c0_i32_1 = arith.constant 0 : i32
    return %c0_i32, %c0_i32_0 : i32, i32
  }
  func.func @transform_10(%arg0: i32) -> (i32, i32) {
    %c0_i32 = arith.constant 0 : i32
    %c0_i32_0 = arith.constant 0 : i32
    %c0_i32_1 = arith.constant 0 : i32
    return %c0_i32, %c0_i32_0 : i32, i32
  }
  func.func @transform_11(%arg0: i32) -> (i32, i32, i32) {
    %c0_i32 = arith.constant 0 : i32
    %c0_i32_0 = arith.constant 0 : i32
    %c0_i32_1 = arith.constant 0 : i32
    return %arg0, %c0_i32, %c0_i32_0 : i32, i32, i32
  }
  func.func @transform_12(%arg0: i32) -> (i32, i32) {
    %c0_i32 = arith.constant 0 : i32
    %c0_i32_0 = arith.constant 0 : i32
    return %arg0, %c0_i32 : i32, i32
  }
}

</mosaic_0001>

<bundles_post_ra>
// kernel: diffuser_forward.21
= control target key start
LH: loop header
LB: loop body
LE: loop exit
PB: predicated region body
PF: predicated region fallthrough
CT: control target
= control target key end

     0   :  { %18 = vsyncpa [#allocation3], 0  ;;  %s11164_s0 = inlined_call_operand.vmem [shape: f32[2,1,1], index: 0, kind: input, shape index: {}]   ;;  %s11165_s1 = inlined_call_operand.vmem [shape: f32[2,1,1], index: 1, kind: input, shape index: {}]   ;;  %s11166_s2 = inlined_call_operand.hbm [shape: f32[2,8,512], index: 2, kind: input, shape index: {}]   ;;  %s11167_s3 = inlined_call_operand.vmem [shape: f32[2,8,512], index: 3, kind: input, shape index: {}]   ;;  %s11168_s4 = inlined_call_operand.hbm [shape: f32[2,8,512], index: 4, kind: input, shape index: {}]   ;;  %s11169_s5 = inlined_call_operand.vmem [shape: f32[16,16], index: 5, kind: input, shape index: {}]   ;;  %s11170_s6 = inlined_call_operand.vmem [shape: f32[16,16], index: 6, kind: input, shape index: {}]   ;;  %s11171_s7 = inlined_call_operand.hbm [shape: bf16[512,1536], index: 7, kind: input, shape index: {}]   ;;  %s11172_s8 = inlined_call_operand.vmem [shape: f32[8,1536], index: 8, kind: input, shape index: {}]   ;;  %s11173_s9 = inlined_call_operand.hbm [shape: bf16[1536,512], index: 9, kind: input, shape index: {}]   ;;  %s11174_s10 = inlined_call_operand.hbm [shape: f32[1,512], index: 10, kind: input, shape index: {}]   ;;  %s11175_s11 = inlined_call_operand.hbm [shape: f32[2,8,512], index: 11, kind: output, shape index: {0}]   ;;  %s11176_s12 = inlined_call_operand.vmem [shape: f32[2,128], index: 12, kind: output, shape index: {1}]  }
   0x1   :  { %19 = vsyncpa [#allocation6], 0 }
   0x2   :  { %20 = vsyncpa [#allocation9], 0 }
   0x3   :  { %21 = vsyncpa [#allocation4], 0  ;;  %s45_s23 = sshll.u32 %s11168_s4, 4  ;;  %s10553_s24 = smov [#allocation5]   ;;  %s46_s23 = int_to_ptr.hbm [resolvable:$true] %s45_s23 }
   0x4   :  { %s47_s25 = sshll.u32 %s10553_s24, 4  ;;  %s77_s28 = sshll.u32 %s11173_s9, 4  ;;  %s48_s25 = int_to_ptr.vmem [resolvable:$true] %s47_s25  ;;  %s78_s28 = int_to_ptr.hbm [resolvable:$true] %s77_s28 }
   0x5   :  { %s10554_s29 = smov 512   ;;  %s10555_s30 = smov 32  }
   0x6   :  { %53 = dma.hbm_to_vmem [thread:$0]  %s46_s23, 1024, %s48_s25, [#allocation6], %s10554_s29, %s10554_s29, %s10555_s30  }
   0x7   :  { %s10556_s13 = smov [#allocation8]   ;;  %s10557_s15 = smov 256  }
   0x8   :  { %s79_s14 = sshll.u32 %s10556_s13, 4  ;;  %s10558_s4 = smov 16   ;;  %s80_s14 = int_to_ptr.vmem [resolvable:$true] %s79_s14 }
   0x9   :  { %85 = dma.hbm_to_vmem [thread:$0]  %s78_s28, 49152, %s80_s14, [#allocation9], %s10557_s15, %s10557_s15, %s10558_s4  }
   0xa   :  { %s30_s18 = sshll.u32 %s11166_s2, 4  ;;  %s10559_s19 = smov [#allocation2]   ;;  %s31_s18 = int_to_ptr.hbm [resolvable:$true] %s30_s18 }
   0xb   :  { %s32_s9 = sshll.u32 %s10559_s19, 4  ;;  %s62_s22 = sshll.u32 %s11171_s7, 4  ;;  %s33_s9 = int_to_ptr.vmem [resolvable:$true] %s32_s9  ;;  %s63_s22 = int_to_ptr.hbm [resolvable:$true] %s62_s22 }
   0xc   :  { %38 = dma.hbm_to_vmem [thread:$0]  %s31_s18, 1024, %s33_s9, [#allocation3], %s10554_s29, %s10554_s29, %s10555_s30  }
   0xd   :  { %s10560_s23 = smov [#allocation7]   ;;  %s10561_s25 = smov 768  }
   0xe   :  { %s64_s24 = sshll.u32 %s10560_s23, 4  ;;  %s10562_s26 = smov 48   ;;  %s65_s24 = int_to_ptr.vmem [resolvable:$true] %s64_s24 }
   0xf   :  { %70 = dma.hbm_to_vmem [thread:$0]  %s63_s22, 49152, %s65_s24, [#allocation6], %s10561_s25, %s10561_s25, %s10562_s26  }
  0x10   :  { %s91_s28 = sshll.u32 %s11174_s10, 4  ;;  %s10563_s13 = smov [#allocation10]   ;;  %s92_s28 = int_to_ptr.hbm [resolvable:$true] %s91_s28 }
  0x11   :  { %s93_s14 = sshll.u32 %s10563_s13, 4  ;;  %s94_s14 = int_to_ptr.vmem [resolvable:$true] %s93_s14 }
  0x12   :  { %96 = dma.hbm_to_vmem [thread:$0]  %s92_s28, 64, %s94_s14, [#allocation9]  }
  0x13   :  { %10545 = dma.done.wait [#allocation3], 1024  }
  0x14   :  { %10546 = vsyncadd [#allocation3], 4294966272 }
  0x15   :  { %10547 = dma.done.wait [#allocation6], 50176  }
  0x16   :  { %10548 = vsyncadd [#allocation6], 4294917120 }
  0x17   :  { %10549 = dma.done.wait [#allocation9], 49216  }
  0x18   :  { %10550 = vsyncadd [#allocation9], 4294918080  ;;  %v10564_v0 = vmov 0   ;;  %v10388_v1 = vld [vmem:[%s11164_s0 + $0x1] ss:$0 sm:$0xff]  ;;  %v190_v4 = vld [vmem:[#allocation5 + $0x28] sm:$0xff] }
  0x19   :  { %10387 = vset.pattern.permute.xlu1 %v10564_v0  ;;  %10386 = vset.pattern.permute.xlu0 %v10564_v0  ;;  %v10389_v2 = vld [vmem:[%s11164_s0] ss:$0 sm:$0xff]  ;;  %v191_v5 = vld [vmem:[#allocation5 + $0x30] sm:$0xff]  ;;  %v192_v6 = vld [vmem:[#allocation5 + $0x38] sm:$0xff]  ;;  %vm197_vm0 = vcmask 130048   ;;  %s10565_s2 = smov [#allocation11]  }
  0x1a   :  { %144 = vperm.xlu0 %10386, %v10388_v1   ;;  %v189_v3 = vld [vmem:[#allocation5 + $0x20] sm:$0xff]  ;;  %140 = vperm.xlu1 %10387, %v10389_v2   ;;  %v186_v8 = vld [vmem:[#allocation5 + $0x8] sm:$0xff]  ;;  %v187_v9 = vld [vmem:[#allocation5 + $0x10] sm:$0xff]  ;;  %s6496_s27 = sshll.u32 %s10565_s2, 4  ;;  %s6498_s14 = sshll.u32 %s11175_s11, 4  ;;  %vm6488_vm1 = vcmask 1041409   ;;  %s6497_s27 = int_to_ptr.vmem [resolvable:$true] %s6496_s27  ;;  %s6499_s14 = int_to_ptr.hbm [resolvable:$true] %s6498_s14 }
  0x1b   :  { %218 = vmatpush.msra.mxu0 %v189_v3  ;;  %241 = vmatpush.msra.mxu1 %v190_v4  ;;  %v185_v7 = vld [vmem:[#allocation5] sm:$0xff]  ;;  %v188_v10 = vld [vmem:[#allocation5 + $0x18] sm:$0xff]  ;;  %v196_v14 = vld [vmem:[%s11170_s6 + $0x8] sm:$0xff] }
  0x1c   :  { %264 = vmatpush.msra.mxu2 %v191_v5  ;;  %287 = vmatpush.msra.mxu3 %v192_v6  ;;  %v195_v11 = vld [vmem:[%s11170_s6] sm:$0xff]  ;;  %v130_v18 = vld [vmem:[#allocation2 + $0x28] sm:$0xff]  ;;  %v131_v19 = vld [vmem:[#allocation2 + $0x30] sm:$0xff] }
  0x1d   :  { %219 = vmatpush.msra.mxu0 %v185_v7  ;;  %v10390_v12 = vld [vmem:[%s11165_s1 + $0x1] ss:$0 sm:$0xff]  ;;  %242 = vmatpush.msra.mxu1 %v186_v8  ;;  %v10391_v13 = vld [vmem:[%s11165_s1] ss:$0 sm:$0xff]  ;;  %v132_v20 = vld [vmem:[#allocation2 + $0x38] sm:$0xff] }
  0x1e   :  { %265 = vmatpush.msra.mxu2 %v187_v9  ;;  %288 = vmatpush.msra.mxu3 %v188_v10  ;;  %v129_v17 = vld [vmem:[#allocation2 + $0x20] sm:$0xff]  ;;  %v122_v23 = vld [vmem:[%s11167_s3 + $0x28] sm:$0xff]  ;;  %v123_v25 = vld [vmem:[%s11167_s3 + $0x30] sm:$0xff] }
  0x1f   :  { %6517 = vmatmul.msk.f32.vlgmr.msra.gmra.mxu0 %vm197_vm0, %v195_v11  ;;  %6519 = vmatmul.msk.f32.vlgmr.msra.gmra.mxu1 %vm197_vm0, %v195_v11  ;;  %v125_v21 = vld [vmem:[#allocation2] sm:$0xff]  ;;  %v126_v24 = vld [vmem:[#allocation2 + $0x8] sm:$0xff]  ;;  %v124_v26 = vld [vmem:[%s11167_s3 + $0x38] sm:$0xff] }
  0x20   :  { %6521 = vmatmul.msk.f32.vlgmr.msra.gmra.mxu2 %vm197_vm0, %v195_v11  ;;  %6523 = vmatmul.msk.f32.vlgmr.msra.gmra.mxu3 %vm197_vm0, %v195_v11  ;;  %v121_v22 = vld [vmem:[%s11167_s3 + $0x20] sm:$0xff]  ;;  %v118_v30 = vld [vmem:[%s11167_s3 + $0x8] sm:$0xff]  ;;  %v119_v31 = vld [vmem:[%s11167_s3 + $0x10] sm:$0xff] }
  0x21   :  { %v117_v27 = vld [vmem:[%s11167_s3] sm:$0xff]  ;;  %v120_v32 = vld [vmem:[%s11167_s3 + $0x18] sm:$0xff]  ;;  %v127_v43 = vld [vmem:[#allocation2 + $0x10] sm:$0xff] }
  0x22   :  { %166 = vperm.xlu0 %10386, %v10390_v12   ;;  %162 = vperm.xlu1 %10387, %v10391_v13   ;;  %v128_v44 = vld [vmem:[#allocation2 + $0x18] sm:$0xff]  ;;  %v6871_v53 = vld [vmem:[#allocation7 + $0x2a0] sm:$0xf]  ;;  %v9695_v54 = vld [vmem:[#allocation7 + $0x2cc] sm:$0xf0] }
  0x23   :  { %v7255_v57 = vld [vmem:[#allocation7 + $0x5a0] sm:$0xf]  ;;  %v9791_v58 = vld [vmem:[#allocation7 + $0x5cc] sm:$0xf0]  ;;  %v6872_v4 = vor.u32 %v9695_v54, %v6871_v53 }
  0x24   :  { %v7639_v59 = vld [vmem:[#allocation7 + $0x8a0] sm:$0xf]  ;;  %v9887_v62 = vld [vmem:[#allocation7 + $0x8cc] sm:$0xf0]  ;;  %v7256_v5 = vor.u32 %v9791_v58, %v7255_v57 }
  0x25   :  { %v8023_v63 = vld [vmem:[#allocation7 + $0xba0] sm:$0xf]  ;;  %v9983_v0 = vld [vmem:[#allocation7 + $0xbcc] sm:$0xf0]  ;;  %v7640_v10 = vor.u32 %v9887_v62, %v7639_v59 }
  0x26   :  { %v193_v3 = vld [vmem:[%s11169_s5] sm:$0xff]  ;;  %v9683_v7 = vld [vmem:[#allocation7 + $0x26c] sm:$0xf0]  ;;  %v8024_v11 = vor.u32 %v9983_v0, %v8023_v63 }
  0x27   :  { %6518 = vmatmul.msk.f32.gmra.mxu0 %vm197_vm0, %v196_v14  ;;  %6520 = vmatmul.msk.f32.gmra.mxu1 %vm197_vm0, %v196_v14  ;;  %v6823_v6 = vld [vmem:[#allocation7 + $0x240] sm:$0xf]  ;;  %v9779_v9 = vld [vmem:[#allocation7 + $0x56c] sm:$0xf0] }
  0x28   :  { %6522 = vmatmul.msk.f32.gmra.mxu2 %vm197_vm0, %v196_v14  ;;  %6524 = vmatmul.msk.f32.gmra.mxu3 %vm197_vm0, %v196_v14  ;;  %v7207_v8 = vld [vmem:[#allocation7 + $0x540] sm:$0xf]  ;;  %v9875_v13 = vld [vmem:[#allocation7 + $0x86c] sm:$0xf0] }
  0x29   :  { %v7591_v12 = vld [vmem:[#allocation7 + $0x840] sm:$0xf]  ;;  %v9731_v58 = vld [vmem:[#allocation7 + $0x3ec] sm:$0xf0] }
  0x2a   :  { %v7975_v14 = vld [vmem:[#allocation7 + $0xb40] sm:$0xf]  ;;  %v9827_v62 = vld [vmem:[#allocation7 + $0x6ec] sm:$0xf0] }
  0x2b   :  { %v7015_v57 = vld [vmem:[#allocation7 + $0x3c0] sm:$0xf]  ;;  %v9923_v0 = vld [vmem:[#allocation7 + $0x9ec] sm:$0xf0] }
  0x2c   :  { %v7783_v63 = vld [vmem:[#allocation7 + $0x9c0] sm:$0xf] }
  0x8c   :  { %v145_v15 = vpop.permute.xlu0 %144  ;;  %v141_v16 = vpop.permute.xlu1 %140 }
  0x8d   :  { %v151_v28 = vmul.f32 %v145_v15, %v129_v17  ;;  %v152_v29 = vmul.f32 %v145_v15, %v130_v18  ;;  %v153_v34 = vmul.f32 %v145_v15, %v131_v19  ;;  %v154_v35 = vmul.f32 %v145_v15, %v132_v20  ;;  %v9971_v15 = vld [vmem:[#allocation7 + $0xb6c] sm:$0xf0]  ;;  %v6775_v18 = vld [vmem:[#allocation7 + $0x1e0] sm:$0xf] }
  0x8e   :  { %v147_v36 = vmul.f32 %v141_v16, %v125_v21  ;;  %v148_v37 = vmul.f32 %v141_v16, %v126_v24  ;;  %v149_v55 = vmul.f32 %v141_v16, %v127_v43  ;;  %v150_v56 = vmul.f32 %v141_v16, %v128_v44  ;;  %v9671_v19 = vld [vmem:[#allocation7 + $0x20c] sm:$0xf0]  ;;  %v7159_v20 = vld [vmem:[#allocation7 + $0x4e0] sm:$0xf] }
  0x8f   :  { %v6824_v16 = vor.u32 %v9683_v7, %v6823_v6  ;;  %v7208_v17 = vor.u32 %v9779_v9, %v7207_v8  ;;  %v9767_v21 = vld [vmem:[#allocation7 + $0x50c] sm:$0xf0]  ;;  %v7543_v24 = vld [vmem:[#allocation7 + $0x7e0] sm:$0xf]  ;;  %v7784_v8 = vor.u32 %v9923_v0, %v7783_v63 }
  0x90   :  { %v6679_v43 = vld [vmem:[#allocation7 + $0x120] sm:$0xf]  ;;  %v9647_v44 = vld [vmem:[#allocation7 + $0x14c] sm:$0xf0] }
  0x91   :  { %v6680_v53 = vor.u32 %v9647_v44, %v6679_v43  ;;  %v9719_v6 = vld [vmem:[#allocation7 + $0x38c] sm:$0xf0]  ;;  %v7351_v9 = vld [vmem:[#allocation7 + $0x660] sm:$0xf] }
  0x94   :  { %v167_v33 = vpop.permute.xlu0 %166  ;;  %v163_v38 = vpop.permute.xlu1 %162 }
  0x95   :  { %v173_v39 = vmul.f32 %v167_v33, %v121_v22  ;;  %v174_v40 = vmul.f32 %v167_v33, %v122_v23  ;;  %v175_v41 = vmul.f32 %v167_v33, %v123_v25  ;;  %v176_v42 = vmul.f32 %v167_v33, %v124_v26  ;;  %v9863_v25 = vld [vmem:[#allocation7 + $0x80c] sm:$0xf0]  ;;  %v7927_v26 = vld [vmem:[#allocation7 + $0xae0] sm:$0xf] }
  0x96   :  { %v169_v45 = vmul.f32 %v163_v38, %v117_v27  ;;  %v170_v46 = vmul.f32 %v163_v38, %v118_v30  ;;  %v171_v47 = vmul.f32 %v163_v38, %v119_v31  ;;  %v172_v48 = vmul.f32 %v163_v38, %v120_v32  ;;  %v9959_v27 = vld [vmem:[#allocation7 + $0xb0c] sm:$0xf0]  ;;  %v6727_v31 = vld [vmem:[#allocation7 + $0x180] sm:$0xf] }
  0x97   :  { %v181_v49 = vadd.f32 %v173_v39, %v151_v28  ;;  %v182_v50 = vadd.f32 %v174_v40, %v152_v29  ;;  %v183_v51 = vadd.f32 %v175_v41, %v153_v34  ;;  %v184_v52 = vadd.f32 %v176_v42, %v154_v35  ;;  %v194_v28 = vld [vmem:[%s11169_s5 + $0x8] sm:$0xff]  ;;  %v9659_v32 = vld [vmem:[#allocation7 + $0x1ac] sm:$0xf0]  ;;  %v7111_v33 = vld [vmem:[#allocation7 + $0x480] sm:$0xf] }
  0x98   :  { %v177_v60 = vadd.f32 %v169_v45, %v147_v36  ;;  %v178_v61 = vadd.f32 %v170_v46, %v148_v37  ;;  %v179_v1 = vadd.f32 %v171_v47, %v149_v55  ;;  %v180_v2 = vadd.f32 %v172_v48, %v150_v56  ;;  %v9755_v34 = vld [vmem:[#allocation7 + $0x4ac] sm:$0xf0]  ;;  %v7495_v37 = vld [vmem:[#allocation7 + $0x780] sm:$0xf] }
  0x99   :  { %316 = vmatpush.msrb.mxu0 %v181_v49  ;;  %339 = vmatpush.msrb.mxu1 %v182_v50  ;;  %v7592_v22 = vor.u32 %v9875_v13, %v7591_v12  ;;  %v7976_v23 = vor.u32 %v9971_v15, %v7975_v14  ;;  %v6776_v29 = vor.u32 %v9671_v19, %v6775_v18  ;;  %v9851_v38 = vld [vmem:[#allocation7 + $0x7ac] sm:$0xf0]  ;;  %v7879_v39 = vld [vmem:[#allocation7 + $0xa80] sm:$0xf]  ;;  %v9689_v19 = vld [vmem:[#allocation7 + $0x2a4] sm:$0xf] }
  0x9a   :  { %362 = vmatpush.msrb.mxu2 %v183_v51  ;;  %385 = vmatpush.msrb.mxu3 %v184_v52  ;;  %v7160_v30 = vor.u32 %v9767_v21, %v7159_v20  ;;  %v7544_v35 = vor.u32 %v9863_v25, %v7543_v24  ;;  %v7928_v36 = vor.u32 %v9959_v27, %v7927_v26  ;;  %v9947_v40 = vld [vmem:[#allocation7 + $0xaac] sm:$0xf0]  ;;  %v7063_v45 = vld [vmem:[#allocation7 + $0x420] sm:$0xf]  ;;  %v6873_v20 = vld [vmem:[#allocation7 + $0x2d0] sm:$0xf0] }
  0x9b   :  { %317 = vmatpush.msrb.mxu0 %v177_v60  ;;  %340 = vmatpush.msrb.mxu1 %v178_v61  ;;  %v6728_v41 = vor.u32 %v9659_v32, %v6727_v31  ;;  %v7112_v42 = vor.u32 %v9755_v34, %v7111_v33  ;;  %v9743_v46 = vld [vmem:[#allocation7 + $0x44c] sm:$0xf0]  ;;  %v7496_v47 = vor.u32 %v9851_v38, %v7495_v37  ;;  %v7447_v49 = vld [vmem:[#allocation7 + $0x720] sm:$0xf]  ;;  %v9785_v21 = vld [vmem:[#allocation7 + $0x5a4] sm:$0xf] }
  0x9c   :  { %363 = vmatpush.msrb.mxu2 %v179_v1  ;;  %386 = vmatpush.msrb.mxu3 %v180_v2  ;;  %v7880_v48 = vor.u32 %v9947_v40, %v7879_v39  ;;  %v9839_v50 = vld [vmem:[#allocation7 + $0x74c] sm:$0xf0]  ;;  %v7831_v51 = vld [vmem:[#allocation7 + $0xa20] sm:$0xf]  ;;  %v7064_v54 = vor.u32 %v9743_v46, %v7063_v45  ;;  %v7016_v2 = vor.u32 %v9731_v58, %v7015_v57  ;;  %v7257_v24 = vld [vmem:[#allocation7 + $0x5d0] sm:$0xf0] }
  0x9d   :  { %6525 = vmatmul.msk.f32.vlgmr.msrb.gmra.mxu0 %vm197_vm0, %v193_v3  ;;  %6527 = vmatmul.msk.f32.vlgmr.msrb.gmra.mxu1 %vm197_vm0, %v193_v3  ;;  %v9935_v52 = vld [vmem:[#allocation7 + $0xa4c] sm:$0xf0]  ;;  %v6631_v55 = vld [vmem:[#allocation7 + $0xc0] sm:$0xf]  ;;  %v7448_v59 = vor.u32 %v9839_v50, %v7447_v49  ;;  %v7641_v32 = vld [vmem:[#allocation7 + $0x8d0] sm:$0xf0] }
  0x9e   :  { %6529 = vmatmul.msk.f32.vlgmr.msrb.gmra.mxu2 %vm197_vm0, %v193_v3  ;;  %6531 = vmatmul.msk.f32.vlgmr.msrb.gmra.mxu3 %vm197_vm0, %v193_v3  ;;  %v9635_v56 = vld [vmem:[#allocation7 + $0xec] sm:$0xf0]  ;;  %v7832_v60 = vor.u32 %v9935_v52, %v7831_v51  ;;  %v7399_v61 = vld [vmem:[#allocation7 + $0x6c0] sm:$0xf]  ;;  %v9977_v33 = vld [vmem:[#allocation7 + $0xba4] sm:$0xf] }
  0x9f   :  { %2702 = vmatpush.bf16.msra.mxu0 %v6872_v4  ;;  %2716 = vmatpush.bf16.msra.mxu1 %v7256_v5  ;;  %v6632_v1 = vor.u32 %v9635_v56, %v6631_v55  ;;  %v6583_v3 = vld [vmem:[#allocation7 + $0x60] sm:$0xf]  ;;  %v9623_v4 = vld [vmem:[#allocation7 + $0x8c] sm:$0xf0]  ;;  %v7400_v7 = vor.u32 %v9827_v62, %v7399_v61  ;;  %v8025_v34 = vld [vmem:[#allocation7 + $0xbd0] sm:$0xf0] }
  0xa0   :  { %2730 = vmatpush.bf16.msra.mxu2 %v7640_v10  ;;  %2744 = vmatpush.bf16.msra.mxu3 %v8024_v11  ;;  %v6967_v5 = vld [vmem:[#allocation7 + $0x360] sm:$0xf]  ;;  %v9815_v10 = vld [vmem:[#allocation7 + $0x68c] sm:$0xf0]  ;;  %v6584_v14 = vor.u32 %v9623_v4, %v6583_v3  ;;  %v9677_v37 = vld [vmem:[#allocation7 + $0x244] sm:$0xf]  ;;  %v8028_v44 = vor.u32 %v9977_v33, %v8025_v34 }
  0xa1   :  { %v7735_v11 = vld [vmem:[#allocation7 + $0x960] sm:$0xf]  ;;  %v9911_v12 = vld [vmem:[#allocation7 + $0x98c] sm:$0xf0]  ;;  %v6968_v15 = vor.u32 %v9719_v6, %v6967_v5  ;;  %v6825_v38 = vld [vmem:[#allocation7 + $0x270] sm:$0xf0] }
  0xa2   :  { %v6535_v13 = vld [vmem:[#allocation7] sm:$0xf]  ;;  %v9707_v18 = vld [vmem:[#allocation7 + $0x32c] sm:$0xf0]  ;;  %v9773_v39 = vld [vmem:[#allocation7 + $0x544] sm:$0xf]  ;;  %v6828_v45 = vor.u32 %v9677_v37, %v6825_v38 }
  0xa3   :  { %2703 = vmatpush.bf16.msra.mxu0 %v6824_v16  ;;  %2717 = vmatpush.bf16.msra.mxu1 %v7208_v17  ;;  %v9611_v16 = vld [vmem:[#allocation7 + $0x2c] sm:$0xf0]  ;;  %v6919_v17 = vld [vmem:[#allocation7 + $0x300] sm:$0xf]  ;;  %v7209_v40 = vld [vmem:[#allocation7 + $0x570] sm:$0xf0] }
  0xa4   :  { %2731 = vmatpush.bf16.msra.mxu2 %v7592_v22  ;;  %2745 = vmatpush.bf16.msra.mxu3 %v7976_v23  ;;  %v7352_v22 = vor.u32 %v9815_v10, %v7351_v9  ;;  %v7736_v23 = vor.u32 %v9911_v12, %v7735_v11  ;;  %v7303_v25 = vld [vmem:[#allocation7 + $0x600] sm:$0xf]  ;;  %v9803_v26 = vld [vmem:[#allocation7 + $0x62c] sm:$0xf0]  ;;  %v6920_v31 = vor.u32 %v9707_v18, %v6919_v17  ;;  %v9761_v49 = vld [vmem:[#allocation7 + $0x4e4] sm:$0xf] }
  0xa5   :  { %6526 = vmatmul.msk.f32.gmra.mxu0 %vm197_vm0, %v194_v28  ;;  %6528 = vmatmul.msk.f32.gmra.mxu1 %vm197_vm0, %v194_v28  ;;  %v7687_v27 = vld [vmem:[#allocation7 + $0x900] sm:$0xf]  ;;  %v7212_v46 = vor.u32 %v9773_v39, %v7209_v40  ;;  %v7161_v51 = vld [vmem:[#allocation7 + $0x510] sm:$0xf0]  ;;  %v9869_v52 = vld [vmem:[#allocation7 + $0x844] sm:$0xf] }
  0xa6   :  { %6530 = vmatmul.msk.f32.gmra.mxu2 %vm197_vm0, %v194_v28  ;;  %6532 = vmatmul.msk.f32.gmra.mxu3 %vm197_vm0, %v194_v28  ;;  %v9899_v28 = vld [vmem:[#allocation7 + $0x92c] sm:$0xf0]  ;;  %v9965_v56 = vld [vmem:[#allocation7 + $0xb44] sm:$0xf]  ;;  %v7977_v57 = vld [vmem:[#allocation7 + $0xb70] sm:$0xf0] }
  0xa7   :  { %2704 = vmatpush.bf16.msra.mxu0 %v6776_v29  ;;  %2718 = vmatpush.bf16.msra.mxu1 %v7160_v30  ;;  %v9881_v29 = vld [vmem:[#allocation7 + $0x8a4] sm:$0xf]  ;;  %v6536_v30 = vor.u32 %v9611_v16, %v6535_v13  ;;  %v7113_v62 = vld [vmem:[#allocation7 + $0x4b0] sm:$0xf0] }
  0xa8   :  { %2732 = vmatpush.bf16.msra.mxu2 %v7544_v35  ;;  %2746 = vmatpush.bf16.msra.mxu3 %v7928_v36  ;;  %v6876_v35 = vor.u32 %v9689_v19, %v6873_v20  ;;  %v7260_v36 = vor.u32 %v9785_v21, %v7257_v24  ;;  %v7644_v43 = vor.u32 %v9881_v29, %v7641_v32  ;;  %v9653_v58 = vld [vmem:[#allocation7 + $0x184] sm:$0xf]  ;;  %v7929_v5 = vld [vmem:[#allocation7 + $0xb10] sm:$0xf0] }
  0xa9   :  { %v9749_v61 = vld [vmem:[#allocation7 + $0x484] sm:$0xf]  ;;  %v7065_v11 = vld [vmem:[#allocation7 + $0x450] sm:$0xf0] }
  0xaa   :  { %v7116_v0 = vor.u32 %v9749_v61, %v7113_v62  ;;  %v9953_v3 = vld [vmem:[#allocation7 + $0xae4] sm:$0xf]  ;;  %v7881_v17 = vld [vmem:[#allocation7 + $0xab0] sm:$0xf0] }
  0xab   :  { %2705 = vmatpush.bf16.msra.mxu0 %v6728_v41  ;;  %2719 = vmatpush.bf16.msra.mxu1 %v7112_v42  ;;  %v7304_v41 = vor.u32 %v9803_v26, %v7303_v25  ;;  %v7688_v42 = vor.u32 %v9899_v28, %v7687_v27  ;;  %v7932_v6 = vor.u32 %v9953_v3, %v7929_v5  ;;  %v9737_v9 = vld [vmem:[#allocation7 + $0x424] sm:$0xf]  ;;  %v6633_v19 = vld [vmem:[#allocation7 + $0xf0] sm:$0xf0] }
  0xac   :  { %2733 = vmatpush.bf16.msra.mxu2 %v7496_v47  ;;  %2747 = vmatpush.bf16.msra.mxu3 %v7880_v48  ;;  %v9665_v47 = vld [vmem:[#allocation7 + $0x1e4] sm:$0xf]  ;;  %v6777_v48 = vld [vmem:[#allocation7 + $0x210] sm:$0xf0]  ;;  %v7068_v12 = vor.u32 %v9737_v9, %v7065_v11  ;;  %v7263_v11 = vld [vmem:[#allocation7 + $0x5a8] sm:$0xf] }
  0xad   :  { %v6780_v50 = vor.u32 %v9665_v47, %v6777_v48  ;;  %v9845_v13 = vld [vmem:[#allocation7 + $0x784] sm:$0xf]  ;;  %v7449_v26 = vld [vmem:[#allocation7 + $0x750] sm:$0xf0]  ;;  %v221_v48 = vpop.f32.mrf.mxu0 }
  0xae   :  { %v9629_v18 = vld [vmem:[#allocation7 + $0xc4] sm:$0xf]  ;;  %v7833_v29 = vld [vmem:[#allocation7 + $0xa50] sm:$0xf0] }
  0xaf   :  { %2706 = vmatpush.bf16.msra.mxu0 %v6680_v53  ;;  %2720 = vmatpush.bf16.msra.mxu1 %v7064_v54  ;;  %v7593_v53 = vld [vmem:[#allocation7 + $0x870] sm:$0xf0]  ;;  %v7164_v54 = vor.u32 %v9761_v49, %v7161_v51  ;;  %v6636_v21 = vor.u32 %v9629_v18, %v6633_v19  ;;  %v9833_v25 = vld [vmem:[#allocation7 + $0x724] sm:$0xf]  ;;  %v244_v49 = vpop.f32.mrf.mxu1 }
  0xb0   :  { %2734 = vmatpush.bf16.msra.mxu2 %v7448_v59  ;;  %2748 = vmatpush.bf16.msra.mxu3 %v7832_v60  ;;  %v7596_v55 = vor.u32 %v9869_v52, %v7593_v53  ;;  %v7980_v59 = vor.u32 %v9965_v56, %v7977_v57  ;;  %v6729_v60 = vld [vmem:[#allocation7 + $0x1b0] sm:$0xf0]  ;;  %v9929_v27 = vld [vmem:[#allocation7 + $0xa24] sm:$0xf]  ;;  %v7452_v28 = vor.u32 %v9833_v25, %v7449_v26  ;;  %v7215_v25 = vld [vmem:[#allocation7 + $0x548] sm:$0xf] }
  0xb1   :  { %v6732_v63 = vor.u32 %v9653_v58, %v6729_v60  ;;  %v6585_v32 = vld [vmem:[#allocation7 + $0x90] sm:$0xf0]  ;;  %v9713_v33 = vld [vmem:[#allocation7 + $0x364] sm:$0xf]  ;;  %v9780_v26 = vld [vmem:[#allocation7 + $0x574] sm:$0xf0] }
  0xb2   :  { %v9821_v37 = vld [vmem:[#allocation7 + $0x6c4] sm:$0xf]  ;;  %v7401_v38 = vld [vmem:[#allocation7 + $0x6f0] sm:$0xf0] }
  0xb3   :  { %2707 = vmatpush.bf16.msra.mxu0 %v6632_v1  ;;  %2721 = vmatpush.bf16.msra.mxu1 %v7016_v2  ;;  %v9857_v1 = vld [vmem:[#allocation7 + $0x7e4] sm:$0xf]  ;;  %v7545_v2 = vld [vmem:[#allocation7 + $0x810] sm:$0xf0]  ;;  %v7404_v40 = vor.u32 %v9821_v37, %v7401_v38  ;;  %v7167_v37 = vld [vmem:[#allocation7 + $0x4e8] sm:$0xf] }
  0xb4   :  { %2735 = vmatpush.bf16.msra.mxu2 %v7400_v7  ;;  %2749 = vmatpush.bf16.msra.mxu3 %v7784_v8  ;;  %v7548_v4 = vor.u32 %v9857_v1, %v7545_v2  ;;  %v9641_v7 = vld [vmem:[#allocation7 + $0x124] sm:$0xf]  ;;  %v6681_v8 = vld [vmem:[#allocation7 + $0x150] sm:$0xf0]  ;;  %v9768_v38 = vld [vmem:[#allocation7 + $0x514] sm:$0xf0] }
  0xb5   :  { %v6684_v10 = vor.u32 %v9641_v7, %v6681_v8  ;;  %v9917_v39 = vld [vmem:[#allocation7 + $0x9c4] sm:$0xf]  ;;  %v6921_v47 = vld [vmem:[#allocation7 + $0x330] sm:$0xf0]  ;;  %v224_v1 = vpop.f32.mrf.mxu0  ;;  %v6879_v7 = vld [vmem:[#allocation7 + $0x2a8] sm:$0xf] }
  0xb6   :  { %v9809_v51 = vld [vmem:[#allocation7 + $0x664] sm:$0xf]  ;;  %v7353_v52 = vld [vmem:[#allocation7 + $0x690] sm:$0xf0] }
  0xb7   :  { %2708 = vmatpush.bf16.msra.mxu0 %v6584_v14  ;;  %2722 = vmatpush.bf16.msra.mxu1 %v6968_v15  ;;  %v7497_v14 = vld [vmem:[#allocation7 + $0x7b0] sm:$0xf0]  ;;  %v9941_v15 = vld [vmem:[#allocation7 + $0xa84] sm:$0xf]  ;;  %v247_v2 = vpop.f32.mrf.mxu1 }
  0xb8   :  { %2736 = vmatpush.bf16.msra.mxu2 %v7352_v22  ;;  %2750 = vmatpush.bf16.msra.mxu3 %v7736_v23  ;;  %v7500_v16 = vor.u32 %v9845_v13, %v7497_v14  ;;  %v7884_v20 = vor.u32 %v9941_v15, %v7881_v17  ;;  %v9725_v22 = vld [vmem:[#allocation7 + $0x3c4] sm:$0xf]  ;;  %v7017_v23 = vld [vmem:[#allocation7 + $0x3f0] sm:$0xf0] }
  0xb9   :  { %v7020_v24 = vor.u32 %v9725_v22, %v7017_v23  ;;  %v9905_v53 = vld [vmem:[#allocation7 + $0x964] sm:$0xf]  ;;  %v7305_v58 = vld [vmem:[#allocation7 + $0x630] sm:$0xf0] }
  0xba   :  { %v9797_v57 = vld [vmem:[#allocation7 + $0x604] sm:$0xf]  ;;  %v7689_v61 = vld [vmem:[#allocation7 + $0x930] sm:$0xf0] }
  0xbb   :  { %2709 = vmatpush.bf16.msra.mxu0 %v6536_v30  ;;  %2723 = vmatpush.bf16.msra.mxu1 %v6920_v31  ;;  %v7836_v30 = vor.u32 %v9929_v27, %v7833_v29  ;;  %v9617_v31 = vld [vmem:[#allocation7 + $0x64] sm:$0xf]  ;;  %v7647_v27 = vld [vmem:[#allocation7 + $0x8a8] sm:$0xf] }
  0xbc   :  { %2737 = vmatpush.bf16.msra.mxu2 %v7304_v41  ;;  %2751 = vmatpush.bf16.msra.mxu3 %v7688_v42  ;;  %v6588_v34 = vor.u32 %v9617_v31, %v6585_v32  ;;  %v7785_v41 = vld [vmem:[#allocation7 + $0x9f0] sm:$0xf0]  ;;  %v9893_v60 = vld [vmem:[#allocation7 + $0x904] sm:$0xf]  ;;  %v8031_v29 = vld [vmem:[#allocation7 + $0xba8] sm:$0xf]  ;;  %v7216_v31 = vor.u32 %v9780_v26, %v7215_v25 }
  0xbd   :  { %v7788_v42 = vor.u32 %v9917_v39, %v7785_v41  ;;  %v7692_v62 = vor.u32 %v9893_v60, %v7689_v61  ;;  %v9984_v32 = vld [vmem:[#allocation7 + $0xbd4] sm:$0xf0] }
  0xbf   :  { %2758 = vmatpush.bf16.msrb.mxu0 %v6876_v35  ;;  %2772 = vmatpush.bf16.msrb.mxu1 %v7260_v36  ;;  %v6969_v35 = vld [vmem:[#allocation7 + $0x390] sm:$0xf0] }
  0xc0   :  { %2786 = vmatpush.bf16.msrb.mxu2 %v7644_v43  ;;  %2800 = vmatpush.bf16.msrb.mxu3 %v8028_v44  ;;  %v6972_v36 = vor.u32 %v9713_v33, %v6969_v35  ;;  %v9605_v43 = vld [vmem:[#allocation7 + $0x4] sm:$0xf]  ;;  %v6537_v44 = vld [vmem:[#allocation7 + $0x30] sm:$0xf0]  ;;  %v6783_v33 = vld [vmem:[#allocation7 + $0x1e8] sm:$0xf] }
  0xc3   :  { %2759 = vmatpush.bf16.msrb.mxu0 %v6828_v45  ;;  %2773 = vmatpush.bf16.msrb.mxu1 %v7212_v46  ;;  %v9701_v45 = vld [vmem:[#allocation7 + $0x304] sm:$0xf]  ;;  %v6540_v46 = vor.u32 %v9605_v43, %v6537_v44  ;;  %v8032_v44 = vor.u32 %v9984_v32, %v8031_v29  ;;  %v6975_v29 = vld [vmem:[#allocation7 + $0x368] sm:$0xf] }
  0xc4   :  { %2787 = vmatpush.bf16.msrb.mxu2 %v7596_v55  ;;  %2801 = vmatpush.bf16.msrb.mxu3 %v7980_v59  ;;  %v7356_v55 = vor.u32 %v9809_v51, %v7353_v52  ;;  %v7308_v59 = vor.u32 %v9797_v57, %v7305_v58  ;;  %v7983_v51 = vld [vmem:[#allocation7 + $0xb48] sm:$0xf]  ;;  %v9972_v52 = vld [vmem:[#allocation7 + $0xb74] sm:$0xf0] }
  0xc5   :  { %v7984_v58 = vor.u32 %v9972_v52, %v7983_v51  ;;  %v7359_v51 = vld [vmem:[#allocation7 + $0x668] sm:$0xf]  ;;  %v9816_v52 = vld [vmem:[#allocation7 + $0x694] sm:$0xf0] }
  0xc7   :  { %2760 = vmatpush.bf16.msrb.mxu0 %v6780_v50  ;;  %2774 = vmatpush.bf16.msrb.mxu1 %v7164_v54  ;;  %v6924_v50 = vor.u32 %v9701_v45, %v6921_v47  ;;  %v7737_v54 = vld [vmem:[#allocation7 + $0x990] sm:$0xf0]  ;;  %v9876_v47 = vld [vmem:[#allocation7 + $0x874] sm:$0xf0] }
  0xc8   :  { %2788 = vmatpush.bf16.msrb.mxu2 %v7548_v4  ;;  %2802 = vmatpush.bf16.msrb.mxu3 %v7932_v6  ;;  %v7740_v56 = vor.u32 %v9905_v53, %v7737_v54  ;;  %v6735_v53 = vld [vmem:[#allocation7 + $0x188] sm:$0xf]  ;;  %v9660_v54 = vld [vmem:[#allocation7 + $0x1b4] sm:$0xf0] }
  0xc9   :  { %v6736_v60 = vor.u32 %v9660_v54, %v6735_v53  ;;  %v7743_v53 = vld [vmem:[#allocation7 + $0x968] sm:$0xf]  ;;  %v9912_v54 = vld [vmem:[#allocation7 + $0x994] sm:$0xf0] }
  0xcb   :  { %2761 = vmatpush.bf16.msrb.mxu0 %v6732_v63  ;;  %2775 = vmatpush.bf16.msrb.mxu1 %v7116_v0  ;;  %v267_v63 = vpop.f32.mrf.mxu2  ;;  %v290_v0 = vpop.f32.mrf.mxu3 }
  0xcc   :  { %2789 = vmatpush.bf16.msrb.mxu2 %v7500_v16  ;;  %2803 = vmatpush.bf16.msrb.mxu3 %v7884_v20 }
  0xcf   :  { %2762 = vmatpush.bf16.msrb.mxu0 %v6684_v10  ;;  %2776 = vmatpush.bf16.msrb.mxu1 %v7068_v12  ;;  %v9696_v10 = vld [vmem:[#allocation7 + $0x2d4] sm:$0xf0] }
  0xd0   :  { %2790 = vmatpush.bf16.msrb.mxu2 %v7452_v28  ;;  %2804 = vmatpush.bf16.msrb.mxu3 %v7836_v30  ;;  %v9792_v12 = vld [vmem:[#allocation7 + $0x5d4] sm:$0xf0]  ;;  %v6880_v19 = vor.u32 %v9696_v10, %v6879_v7  ;;  %v7503_v7 = vld [vmem:[#allocation7 + $0x788] sm:$0xf] }
  0xd1   :  { %v7264_v20 = vor.u32 %v9792_v12, %v7263_v11  ;;  %v9888_v28 = vld [vmem:[#allocation7 + $0x8d4] sm:$0xf0] }
  0xd2   :  { %v7648_v43 = vor.u32 %v9888_v28, %v7647_v27  ;;  %v9948_v10 = vld [vmem:[#allocation7 + $0xab4] sm:$0xf0]  ;;  %v6591_v27 = vld [vmem:[#allocation7 + $0x68] sm:$0xf] }
  0xd3   :  { %2763 = vmatpush.bf16.msrb.mxu0 %v6636_v21  ;;  %2777 = vmatpush.bf16.msrb.mxu1 %v7020_v24  ;;  %v270_v3 = vpop.f32.mrf.mxu2  ;;  %v293_v4 = vpop.f32.mrf.mxu3  ;;  %v6831_v21 = vld [vmem:[#allocation7 + $0x248] sm:$0xf]  ;;  %v9684_v24 = vld [vmem:[#allocation7 + $0x274] sm:$0xf0] }
  0xd4   :  { %2791 = vmatpush.bf16.msrb.mxu2 %v7404_v40  ;;  %2805 = vmatpush.bf16.msrb.mxu3 %v7788_v42  ;;  %v6832_v30 = vor.u32 %v9684_v24, %v6831_v21  ;;  %v7839_v21 = vld [vmem:[#allocation7 + $0xa28] sm:$0xf]  ;;  %v9936_v24 = vld [vmem:[#allocation7 + $0xa54] sm:$0xf0] }
  0xd5   :  { %v9624_v28 = vld [vmem:[#allocation7 + $0x94] sm:$0xf0]  ;;  %v7840_v32 = vor.u32 %v9936_v24, %v7839_v21  ;;  %v9966_v21 = vld [vmem:[#allocation7 + $0xb4c] sm:$0xf]  ;;  %v7985_v24 = vld [vmem:[#allocation7 + $0xb78] sm:$0xf0] }
  0xd7   :  { %2764 = vmatpush.bf16.msrb.mxu0 %v6588_v34  ;;  %2778 = vmatpush.bf16.msrb.mxu1 %v6972_v36  ;;  %v9672_v34 = vld [vmem:[#allocation7 + $0x214] sm:$0xf0] }
  0xd8   :  { %2792 = vmatpush.bf16.msrb.mxu2 %v7356_v55  ;;  %2806 = vmatpush.bf16.msrb.mxu3 %v7740_v56  ;;  %v6784_v45 = vor.u32 %v9672_v34, %v6783_v33  ;;  %v7119_v55 = vld [vmem:[#allocation7 + $0x488] sm:$0xf]  ;;  %v9756_v56 = vld [vmem:[#allocation7 + $0x4b4] sm:$0xf0] }
  0xd9   :  { %v7120_v61 = vor.u32 %v9756_v56, %v7119_v55  ;;  %v7407_v33 = vld [vmem:[#allocation7 + $0x6c8] sm:$0xf]  ;;  %v9828_v34 = vld [vmem:[#allocation7 + $0x6f4] sm:$0xf0] }
  0xdb   :  { %2765 = vmatpush.bf16.msrb.mxu0 %v6540_v46  ;;  %2779 = vmatpush.bf16.msrb.mxu1 %v6924_v50  ;;  %v7599_v46 = vld [vmem:[#allocation7 + $0x848] sm:$0xf]  ;;  %v7168_v50 = vor.u32 %v9768_v38, %v7167_v37  ;;  %v6592_v37 = vor.u32 %v9624_v28, %v6591_v27  ;;  %v9654_v27 = vld [vmem:[#allocation7 + $0x18c] sm:$0xf]  ;;  %v6737_v28 = vld [vmem:[#allocation7 + $0x1b8] sm:$0xf0] }
  0xdc   :  { %2793 = vmatpush.bf16.msrb.mxu2 %v7308_v59  ;;  %2807 = vmatpush.bf16.msrb.mxu3 %v7692_v62  ;;  %v7600_v57 = vor.u32 %v9876_v47, %v7599_v46  ;;  %v7551_v59 = vld [vmem:[#allocation7 + $0x7e8] sm:$0xf]  ;;  %v9864_v62 = vld [vmem:[#allocation7 + $0x814] sm:$0xf0]  ;;  %v9786_v47 = vld [vmem:[#allocation7 + $0x5ac] sm:$0xf] }
 0x11a   :  { %v319_v5 = vpop.f32.mrf.mxu0  ;;  %v342_v6 = vpop.f32.mrf.mxu1 }
 0x11b   :  { %v320_v15 = vadd.f32 %v319_v5, %v221_v48  ;;  %v343_v16 = vadd.f32 %v342_v6, %v244_v49  ;;  %v7552_v5 = vor.u32 %v9864_v62, %v7551_v59  ;;  %v9678_v59 = vld [vmem:[#allocation7 + $0x24c] sm:$0xf]  ;;  %v7360_v62 = vor.u32 %v9816_v52, %v7359_v51 }
 0x121   :  { %v365_v8 = vpop.f32.mrf.mxu2  ;;  %v388_v9 = vpop.f32.mrf.mxu3 }
 0x122   :  { %v322_v13 = vpop.f32.mrf.mxu0  ;;  %v345_v14 = vpop.f32.mrf.mxu1  ;;  %v366_v39 = vadd.f32 %v365_v8, %v267_v63  ;;  %v389_v40 = vadd.f32 %v388_v9, %v290_v0  ;;  %v7935_v63 = vld [vmem:[#allocation7 + $0xae8] sm:$0xf]  ;;  %v9960_v0 = vld [vmem:[#allocation7 + $0xb14] sm:$0xf0] }
 0x123   :  { %v323_v17 = vadd.f32 %v322_v13, %v224_v1  ;;  %v346_v18 = vadd.f32 %v345_v14, %v247_v2  ;;  %v6687_v1 = vld [vmem:[#allocation7 + $0x128] sm:$0xf]  ;;  %v9648_v2 = vld [vmem:[#allocation7 + $0x154] sm:$0xf0]  ;;  %v7936_v6 = vor.u32 %v9960_v0, %v7935_v63  ;;  %v7744_v63 = vor.u32 %v9912_v54, %v7743_v53  ;;  %v7217_v0 = vld [vmem:[#allocation7 + $0x578] sm:$0xf0] }
 0x124   :  { %v9852_v8 = vld [vmem:[#allocation7 + $0x7b4] sm:$0xf0]  ;;  %v7887_v9 = vld [vmem:[#allocation7 + $0xa88] sm:$0xf]  ;;  %v6688_v11 = vor.u32 %v9648_v2, %v6687_v1  ;;  %v9630_v53 = vld [vmem:[#allocation7 + $0xcc] sm:$0xf] }
 0x125   :  { %v10716_v22 = vpack.c.bf16 %v323_v17, %v320_v15  ;;  %v10718_v23 = vpack.c.bf16 %v346_v18, %v343_v16  ;;  %v6639_v13 = vld [vmem:[#allocation7 + $0xc8] sm:$0xf]  ;;  %v9636_v14 = vld [vmem:[#allocation7 + $0xf4] sm:$0xf0]  ;;  %v7504_v17 = vor.u32 %v9852_v8, %v7503_v7  ;;  %v7888_v18 = vor.u32 %v9948_v10, %v7887_v9  ;;  %v9978_v7 = vld [vmem:[#allocation7 + $0xbac] sm:$0xf] }
 0x126   :  { %v7023_v15 = vld [vmem:[#allocation7 + $0x3c8] sm:$0xf]  ;;  %v9732_v16 = vld [vmem:[#allocation7 + $0x3f4] sm:$0xf0]  ;;  %v6640_v25 = vor.u32 %v9636_v14, %v6639_v13  ;;  %v8033_v8 = vld [vmem:[#allocation7 + $0xbd8] sm:$0xf0] }
 0x127   :  { %2710 = vmatmul.bf16.vlgmr.msra.gmra.mxu0 %v10716_v22  ;;  %2724 = vmatmul.bf16.vlgmr.msra.gmra.mxu1 %v10718_v23  ;;  %v7024_v26 = vor.u32 %v9732_v16, %v7023_v15  ;;  %v7311_v1 = vld [vmem:[#allocation7 + $0x608] sm:$0xf]  ;;  %v9804_v2 = vld [vmem:[#allocation7 + $0x634] sm:$0xf0]  ;;  %v6785_v14 = vld [vmem:[#allocation7 + $0x218] sm:$0xf0] }
 0x128   :  { %2814 = vmatpush.bf16.msra.mxu0 %v6880_v19  ;;  %2828 = vmatpush.bf16.msra.mxu1 %v7264_v20  ;;  %v7455_v19 = vld [vmem:[#allocation7 + $0x728] sm:$0xf]  ;;  %v9840_v20 = vld [vmem:[#allocation7 + $0x754] sm:$0xf0]  ;;  %v9762_v15 = vld [vmem:[#allocation7 + $0x4ec] sm:$0xf] }
 0x129   :  { %v368_v35 = vpop.f32.mrf.mxu2  ;;  %v391_v36 = vpop.f32.mrf.mxu3  ;;  %v7169_v16 = vld [vmem:[#allocation7 + $0x518] sm:$0xf0] }
 0x12a   :  { %v369_v41 = vadd.f32 %v368_v35, %v270_v3  ;;  %v392_v42 = vadd.f32 %v391_v36, %v293_v4  ;;  %v7071_v3 = vld [vmem:[#allocation7 + $0x428] sm:$0xf]  ;;  %v9744_v4 = vld [vmem:[#allocation7 + $0x454] sm:$0xf0]  ;;  %v6641_v54 = vld [vmem:[#allocation7 + $0xf8] sm:$0xf0] }
 0x12b   :  { %v7072_v12 = vor.u32 %v9744_v4, %v7071_v3  ;;  %v7791_v35 = vld [vmem:[#allocation7 + $0x9c8] sm:$0xf]  ;;  %v9924_v36 = vld [vmem:[#allocation7 + $0x9f4] sm:$0xf0] }
 0x12c   :  { %v10722_v48 = vpack.c.bf16 %v369_v41, %v366_v39  ;;  %v10724_v49 = vpack.c.bf16 %v392_v42, %v389_v40  ;;  %2815 = vmatpush.bf16.msra.mxu0 %v6832_v30  ;;  %2829 = vmatpush.bf16.msra.mxu1 %v7216_v31  ;;  %v9720_v30 = vld [vmem:[#allocation7 + $0x394] sm:$0xf0]  ;;  %v7456_v31 = vor.u32 %v9840_v20, %v7455_v19  ;;  %v6543_v39 = vld [vmem:[#allocation7 + $0x8] sm:$0xf]  ;;  %v9870_v19 = vld [vmem:[#allocation7 + $0x84c] sm:$0xf] }
 0x12d   :  { %v6976_v38 = vor.u32 %v9720_v30, %v6975_v29  ;;  %v9612_v40 = vld [vmem:[#allocation7 + $0x34] sm:$0xf0]  ;;  %v6927_v41 = vld [vmem:[#allocation7 + $0x308] sm:$0xf]  ;;  %v7792_v46 = vor.u32 %v9924_v36, %v7791_v35  ;;  %v7601_v20 = vld [vmem:[#allocation7 + $0x878] sm:$0xf0] }
 0x12e   :  { %2738 = vmatmul.bf16.vlgmr.msra.gmra.mxu2 %v10722_v48  ;;  %2752 = vmatmul.bf16.vlgmr.msra.gmra.mxu3 %v10724_v49  ;;  %v9708_v42 = vld [vmem:[#allocation7 + $0x334] sm:$0xf0]  ;;  %v6544_v55 = vor.u32 %v9612_v40, %v6543_v39  ;;  %v7695_v3 = vld [vmem:[#allocation7 + $0x908] sm:$0xf]  ;;  %v9750_v29 = vld [vmem:[#allocation7 + $0x48c] sm:$0xf] }
 0x12f   :  { %2842 = vmatpush.bf16.msra.mxu2 %v7648_v43  ;;  %2856 = vmatpush.bf16.msra.mxu3 %v8032_v44  ;;  %v9690_v43 = vld [vmem:[#allocation7 + $0x2ac] sm:$0xf]  ;;  %v6881_v44 = vld [vmem:[#allocation7 + $0x2d8] sm:$0xf0]  ;;  %v6928_v56 = vor.u32 %v9708_v42, %v6927_v41  ;;  %v9900_v4 = vld [vmem:[#allocation7 + $0x934] sm:$0xf0] }
 0x130   :  { %2816 = vmatpush.bf16.msra.mxu0 %v6784_v45  ;;  %2830 = vmatpush.bf16.msra.mxu1 %v7168_v50  ;;  %v7408_v45 = vor.u32 %v9828_v34, %v7407_v33  ;;  %v7265_v50 = vld [vmem:[#allocation7 + $0x5d8] sm:$0xf0]  ;;  %v7696_v13 = vor.u32 %v9900_v4, %v7695_v3  ;;  %v9858_v33 = vld [vmem:[#allocation7 + $0x7ec] sm:$0xf] }
 0x131   :  { %v7121_v30 = vld [vmem:[#allocation7 + $0x4b8] sm:$0xf0]  ;;  %v9954_v35 = vld [vmem:[#allocation7 + $0xaec] sm:$0xf] }
 0x132   :  { %v7553_v34 = vld [vmem:[#allocation7 + $0x818] sm:$0xf0]  ;;  %v9642_v39 = vld [vmem:[#allocation7 + $0x12c] sm:$0xf] }
 0x133   :  { %2843 = vmatpush.bf16.msra.mxu2 %v7600_v57  ;;  %2857 = vmatpush.bf16.msra.mxu3 %v7984_v58  ;;  %v6884_v57 = vor.u32 %v9690_v43, %v6881_v44  ;;  %v7268_v58 = vor.u32 %v9786_v47, %v7265_v50  ;;  %v7937_v36 = vld [vmem:[#allocation7 + $0xb18] sm:$0xf0]  ;;  %v9738_v41 = vld [vmem:[#allocation7 + $0x42c] sm:$0xf]  ;;  %v7556_v43 = vor.u32 %v9858_v33, %v7553_v34  ;;  %v6839_v33 = vld [vmem:[#allocation7 + $0x250] sm:$0xf] }
 0x134   :  { %2817 = vmatpush.bf16.msra.mxu0 %v6736_v60  ;;  %2831 = vmatpush.bf16.msra.mxu1 %v7120_v61  ;;  %v6833_v60 = vld [vmem:[#allocation7 + $0x278] sm:$0xf0]  ;;  %v9774_v61 = vld [vmem:[#allocation7 + $0x54c] sm:$0xf]  ;;  %v7940_v44 = vor.u32 %v9954_v35, %v7937_v36  ;;  %v9685_v34 = vld [vmem:[#allocation7 + $0x27c] sm:$0xf0] }
 0x135   :  { %v6836_v9 = vor.u32 %v9678_v59, %v6833_v60  ;;  %v7220_v10 = vor.u32 %v9774_v61, %v7217_v0  ;;  %v6689_v40 = vld [vmem:[#allocation7 + $0x158] sm:$0xf0]  ;;  %v9942_v47 = vld [vmem:[#allocation7 + $0xa8c] sm:$0xf]  ;;  %v7223_v35 = vld [vmem:[#allocation7 + $0x550] sm:$0xf] }
 0x136   :  { %v7073_v42 = vld [vmem:[#allocation7 + $0x458] sm:$0xf0]  ;;  %v6692_v51 = vor.u32 %v9642_v39, %v6689_v40  ;;  %v9834_v59 = vld [vmem:[#allocation7 + $0x72c] sm:$0xf] }
 0x137   :  { %2844 = vmatpush.bf16.msra.mxu2 %v7552_v5  ;;  %2858 = vmatpush.bf16.msra.mxu3 %v7936_v6  ;;  %v9882_v5 = vld [vmem:[#allocation7 + $0x8ac] sm:$0xf]  ;;  %v7649_v6 = vld [vmem:[#allocation7 + $0x8d8] sm:$0xf0]  ;;  %v7076_v52 = vor.u32 %v9738_v41, %v7073_v42 }
 0x138   :  { %2766 = vmatmul.bf16.vlgmr.msrb.gmra.mxu0 %v10716_v22  ;;  %2780 = vmatmul.bf16.vlgmr.msrb.gmra.mxu1 %v10718_v23  ;;  %v7889_v50 = vld [vmem:[#allocation7 + $0xab8] sm:$0xf0]  ;;  %v9930_v61 = vld [vmem:[#allocation7 + $0xa2c] sm:$0xf] }
 0x139   :  { %2818 = vmatpush.bf16.msra.mxu0 %v6688_v11  ;;  %2832 = vmatpush.bf16.msra.mxu1 %v7072_v12  ;;  %v9666_v11 = vld [vmem:[#allocation7 + $0x1ec] sm:$0xf]  ;;  %v7312_v12 = vor.u32 %v9804_v2, %v7311_v1  ;;  %v7457_v60 = vld [vmem:[#allocation7 + $0x758] sm:$0xf0] }
 0x13a   :  { %v9618_v1 = vld [vmem:[#allocation7 + $0x6c] sm:$0xf]  ;;  %v6593_v2 = vld [vmem:[#allocation7 + $0x98] sm:$0xf0] }
 0x13b   :  { %2845 = vmatpush.bf16.msra.mxu2 %v7504_v17  ;;  %2859 = vmatpush.bf16.msra.mxu3 %v7888_v18  ;;  %v7652_v17 = vor.u32 %v9882_v5, %v7649_v6  ;;  %v8036_v18 = vor.u32 %v9978_v7, %v8033_v8  ;;  %v9714_v3 = vld [vmem:[#allocation7 + $0x36c] sm:$0xf]  ;;  %v6977_v4 = vld [vmem:[#allocation7 + $0x398] sm:$0xf0]  ;;  %v7460_v5 = vor.u32 %v9834_v59, %v7457_v60  ;;  %v7607_v59 = vld [vmem:[#allocation7 + $0x850] sm:$0xf] }
 0x13c   :  { %v9822_v7 = vld [vmem:[#allocation7 + $0x6cc] sm:$0xf]  ;;  %v7409_v8 = vld [vmem:[#allocation7 + $0x6f8] sm:$0xf0]  ;;  %v9877_v60 = vld [vmem:[#allocation7 + $0x87c] sm:$0xf0] }
 0x13d   :  { %2819 = vmatpush.bf16.msra.mxu0 %v6640_v25  ;;  %2833 = vmatpush.bf16.msra.mxu1 %v7024_v26  ;;  %v6788_v25 = vor.u32 %v9666_v11, %v6785_v14  ;;  %v7172_v26 = vor.u32 %v9762_v15, %v7169_v16  ;;  %v6596_v11 = vor.u32 %v9618_v1, %v6593_v2  ;;  %v6545_v14 = vld [vmem:[#allocation7 + $0x38] sm:$0xf0]  ;;  %v9702_v15 = vld [vmem:[#allocation7 + $0x30c] sm:$0xf]  ;;  %v6743_v1 = vld [vmem:[#allocation7 + $0x190] sm:$0xf] }
 0x13e   :  { %2794 = vmatmul.bf16.vlgmr.msrb.gmra.mxu2 %v10722_v48  ;;  %2808 = vmatmul.bf16.vlgmr.msrb.gmra.mxu3 %v10724_v49  ;;  %v6929_v16 = vld [vmem:[#allocation7 + $0x338] sm:$0xf0]  ;;  %v9798_v39 = vld [vmem:[#allocation7 + $0x60c] sm:$0xf]  ;;  %v9661_v2 = vld [vmem:[#allocation7 + $0x1bc] sm:$0xf0] }
 0x13f   :  { %2846 = vmatpush.bf16.msra.mxu2 %v7456_v31  ;;  %2860 = vmatpush.bf16.msra.mxu3 %v7840_v32  ;;  %v7604_v31 = vor.u32 %v9870_v19, %v7601_v20  ;;  %v7988_v32 = vor.u32 %v9966_v21, %v7985_v24  ;;  %v7412_v19 = vor.u32 %v9822_v7, %v7409_v8  ;;  %v7271_v21 = vld [vmem:[#allocation7 + $0x5b0] sm:$0xf]  ;;  %v9793_v24 = vld [vmem:[#allocation7 + $0x5dc] sm:$0xf0]  ;;  %v7313_v40 = vld [vmem:[#allocation7 + $0x638] sm:$0xf0] }
 0x140   :  { %v9894_v41 = vld [vmem:[#allocation7 + $0x90c] sm:$0xf]  ;;  %v7697_v42 = vld [vmem:[#allocation7 + $0x938] sm:$0xf0]  ;;  %v7559_v7 = vld [vmem:[#allocation7 + $0x7f0] sm:$0xf] }
 0x141   :  { %2820 = vmatpush.bf16.msra.mxu0 %v6592_v37  ;;  %2834 = vmatpush.bf16.msra.mxu1 %v6976_v38  ;;  %v6740_v37 = vor.u32 %v9654_v27, %v6737_v28  ;;  %v7124_v38 = vor.u32 %v9750_v29, %v7121_v30  ;;  %v9906_v27 = vld [vmem:[#allocation7 + $0x96c] sm:$0xf]  ;;  %v7745_v28 = vld [vmem:[#allocation7 + $0x998] sm:$0xf0]  ;;  %v6932_v30 = vor.u32 %v9702_v15, %v6929_v16  ;;  %v9865_v8 = vld [vmem:[#allocation7 + $0x81c] sm:$0xf0] }
 0x142   :  { %v7560_v15 = vor.u32 %v9865_v8, %v7559_v7  ;;  %v9679_v7 = vld [vmem:[#allocation7 + $0x254] sm:$0xf]  ;;  %v6841_v8 = vld [vmem:[#allocation7 + $0x280] sm:$0xf0] }
 0x143   :  { %2847 = vmatpush.bf16.msra.mxu2 %v7408_v45  ;;  %2861 = vmatpush.bf16.msra.mxu3 %v7792_v46  ;;  %v9846_v45 = vld [vmem:[#allocation7 + $0x78c] sm:$0xf]  ;;  %v7505_v46 = vld [vmem:[#allocation7 + $0x7b8] sm:$0xf0] }
 0x145   :  { %2821 = vmatpush.bf16.msra.mxu0 %v6544_v55  ;;  %2835 = vmatpush.bf16.msra.mxu1 %v6928_v56  ;;  %v9726_v55 = vld [vmem:[#allocation7 + $0x3cc] sm:$0xf]  ;;  %v7025_v56 = vld [vmem:[#allocation7 + $0x3f8] sm:$0xf0] }
 0x146   :  { %v7028_v0 = vor.u32 %v9726_v55, %v7025_v56 }
 0x147   :  { %2848 = vmatpush.bf16.msra.mxu2 %v7360_v62  ;;  %2862 = vmatpush.bf16.msra.mxu3 %v7744_v63  ;;  %v7841_v62 = vld [vmem:[#allocation7 + $0xa58] sm:$0xf0]  ;;  %v6644_v63 = vor.u32 %v9630_v53, %v6641_v54  ;;  %v6791_v53 = vld [vmem:[#allocation7 + $0x1f0] sm:$0xf]  ;;  %v9673_v54 = vld [vmem:[#allocation7 + $0x21c] sm:$0xf0] }
 0x148   :  { %2822 = vmatmul.bf16.vlgmr.msra.gmra.mxu0 %v10716_v22  ;;  %2836 = vmatmul.bf16.vlgmr.msra.gmra.mxu1 %v10718_v23  ;;  %v7844_v6 = vor.u32 %v9930_v61, %v7841_v62  ;;  %v7991_v61 = vld [vmem:[#allocation7 + $0xb50] sm:$0xf]  ;;  %v9973_v62 = vld [vmem:[#allocation7 + $0xb7c] sm:$0xf0] }
 0x149   :  { %2870 = vmatpush.bf16.msrb.mxu0 %v6884_v57  ;;  %2884 = vmatpush.bf16.msrb.mxu1 %v7268_v58  ;;  %v7508_v57 = vor.u32 %v9846_v45, %v7505_v46  ;;  %v7892_v58 = vor.u32 %v9942_v47, %v7889_v50  ;;  %v8039_v45 = vld [vmem:[#allocation7 + $0xbb0] sm:$0xf]  ;;  %v9985_v46 = vld [vmem:[#allocation7 + $0xbdc] sm:$0xf0]  ;;  %v6840_v47 = vor.u32 %v9685_v34, %v6839_v33 }
 0x14a   :  { %v8040_v56 = vor.u32 %v9985_v46, %v8039_v45  ;;  %v7463_v33 = vld [vmem:[#allocation7 + $0x730] sm:$0xf]  ;;  %v9841_v34 = vld [vmem:[#allocation7 + $0x75c] sm:$0xf0] }
 0x14b   :  { %2849 = vmatpush.bf16.msra.mxu2 %v7312_v12  ;;  %2863 = vmatpush.bf16.msra.mxu3 %v7696_v13  ;;  %v6980_v12 = vor.u32 %v9714_v3, %v6977_v4  ;;  %v9606_v13 = vld [vmem:[#allocation7 + $0xc] sm:$0xf]  ;;  %v7608_v3 = vor.u32 %v9877_v60, %v7607_v59  ;;  %v7992_v4 = vor.u32 %v9973_v62, %v7991_v61  ;;  %v7415_v45 = vld [vmem:[#allocation7 + $0x6d0] sm:$0xf]  ;;  %v9829_v46 = vld [vmem:[#allocation7 + $0x6fc] sm:$0xf0] }
 0x14c   :  { %v6548_v29 = vor.u32 %v9606_v13, %v6545_v14  ;;  %v6695_v13 = vld [vmem:[#allocation7 + $0x130] sm:$0xf]  ;;  %v9649_v14 = vld [vmem:[#allocation7 + $0x15c] sm:$0xf0]  ;;  %v9691_v59 = vld [vmem:[#allocation7 + $0x2b4] sm:$0xf] }
 0x14d   :  { %2871 = vmatpush.bf16.msrb.mxu0 %v6836_v9  ;;  %2885 = vmatpush.bf16.msrb.mxu1 %v7220_v10  ;;  %v9918_v9 = vld [vmem:[#allocation7 + $0x9cc] sm:$0xf]  ;;  %v7793_v10 = vld [vmem:[#allocation7 + $0x9f8] sm:$0xf0]  ;;  %v6889_v60 = vld [vmem:[#allocation7 + $0x2e0] sm:$0xf0] }
 0x14e   :  { %2850 = vmatmul.bf16.vlgmr.msra.gmra.mxu2 %v10722_v48  ;;  %2864 = vmatmul.bf16.vlgmr.msra.gmra.mxu3 %v10724_v49  ;;  %v7796_v20 = vor.u32 %v9918_v9, %v7793_v10  ;;  %v7943_v9 = vld [vmem:[#allocation7 + $0xaf0] sm:$0xf]  ;;  %v9961_v10 = vld [vmem:[#allocation7 + $0xb1c] sm:$0xf0]  ;;  %v9787_v61 = vld [vmem:[#allocation7 + $0x5b4] sm:$0xf] }
 0x14f   :  { %2898 = vmatpush.bf16.msrb.mxu2 %v7652_v17  ;;  %2912 = vmatpush.bf16.msrb.mxu3 %v8036_v18  ;;  %v6887_v17 = vld [vmem:[#allocation7 + $0x2b0] sm:$0xf]  ;;  %v9697_v18 = vld [vmem:[#allocation7 + $0x2dc] sm:$0xf0]  ;;  %v7944_v16 = vor.u32 %v9961_v10, %v7943_v9  ;;  %v7273_v62 = vld [vmem:[#allocation7 + $0x5e0] sm:$0xf0] }
 0x150   :  { %v9775_v9 = vld [vmem:[#allocation7 + $0x554] sm:$0xf] }
 0x151   :  { %2872 = vmatpush.bf16.msrb.mxu0 %v6788_v25  ;;  %2886 = vmatpush.bf16.msrb.mxu1 %v7172_v26  ;;  %v9810_v25 = vld [vmem:[#allocation7 + $0x66c] sm:$0xf]  ;;  %v7361_v26 = vld [vmem:[#allocation7 + $0x698] sm:$0xf0] }
 0x152   :  { %v7364_v36 = vor.u32 %v9810_v25, %v7361_v26  ;;  %v6696_v25 = vor.u32 %v9649_v14, %v6695_v13  ;;  %v7319_v13 = vld [vmem:[#allocation7 + $0x610] sm:$0xf]  ;;  %v9805_v14 = vld [vmem:[#allocation7 + $0x63c] sm:$0xf0] }
 0x153   :  { %2899 = vmatpush.bf16.msrb.mxu2 %v7604_v31  ;;  %2913 = vmatpush.bf16.msrb.mxu3 %v7988_v32  ;;  %v6888_v31 = vor.u32 %v9697_v18, %v6887_v17  ;;  %v7272_v32 = vor.u32 %v9793_v24, %v7271_v21  ;;  %v7079_v17 = vld [vmem:[#allocation7 + $0x430] sm:$0xf]  ;;  %v9745_v18 = vld [vmem:[#allocation7 + $0x45c] sm:$0xf0] }
 0x154   :  { %v7895_v21 = vld [vmem:[#allocation7 + $0xa90] sm:$0xf]  ;;  %v9949_v24 = vld [vmem:[#allocation7 + $0xabc] sm:$0xf0]  ;;  %v7080_v26 = vor.u32 %v9745_v18, %v7079_v17  ;;  %v9883_v17 = vld [vmem:[#allocation7 + $0x8b4] sm:$0xf] }
 0x155   :  { %2873 = vmatpush.bf16.msrb.mxu0 %v6740_v37  ;;  %2887 = vmatpush.bf16.msrb.mxu1 %v7124_v38  ;;  %v7748_v37 = vor.u32 %v9906_v27, %v7745_v28  ;;  %v9781_v38 = vld [vmem:[#allocation7 + $0x57c] sm:$0xf0]  ;;  %v6647_v27 = vld [vmem:[#allocation7 + $0xd0] sm:$0xf]  ;;  %v7657_v18 = vld [vmem:[#allocation7 + $0x8e0] sm:$0xf0] }
 0x156   :  { %v7224_v50 = vor.u32 %v9781_v38, %v7223_v35  ;;  %v9637_v28 = vld [vmem:[#allocation7 + $0xfc] sm:$0xf0]  ;;  %v7847_v35 = vld [vmem:[#allocation7 + $0xa30] sm:$0xf] }
 0x157   :  { %2900 = vmatpush.bf16.msrb.mxu2 %v7556_v43  ;;  %2914 = vmatpush.bf16.msrb.mxu3 %v7940_v44  ;;  %v7655_v43 = vld [vmem:[#allocation7 + $0x8b0] sm:$0xf]  ;;  %v9889_v44 = vld [vmem:[#allocation7 + $0x8dc] sm:$0xf0] }
 0x158   :  { %v7656_v55 = vor.u32 %v9889_v44, %v7655_v43  ;;  %v6983_v43 = vld [vmem:[#allocation7 + $0x370] sm:$0xf]  ;;  %v9721_v44 = vld [vmem:[#allocation7 + $0x39c] sm:$0xf0] }
 0x159   :  { %2874 = vmatpush.bf16.msrb.mxu0 %v6692_v51  ;;  %2888 = vmatpush.bf16.msrb.mxu1 %v7076_v52  ;;  %v7316_v51 = vor.u32 %v9798_v39, %v7313_v40  ;;  %v7700_v52 = vor.u32 %v9894_v41, %v7697_v42  ;;  %v6599_v39 = vld [vmem:[#allocation7 + $0x70] sm:$0xf]  ;;  %v9625_v40 = vld [vmem:[#allocation7 + $0x9c] sm:$0xf0]  ;;  %v7464_v41 = vor.u32 %v9841_v34, %v7463_v33  ;;  %v9871_v33 = vld [vmem:[#allocation7 + $0x854] sm:$0xf] }
 0x15a   :  { %v7609_v34 = vld [vmem:[#allocation7 + $0x880] sm:$0xf0] }
 0x15b   :  { %2901 = vmatpush.bf16.msrb.mxu2 %v7508_v57  ;;  %2915 = vmatpush.bf16.msrb.mxu3 %v7892_v58  ;;  %v7175_v57 = vld [vmem:[#allocation7 + $0x4f0] sm:$0xf]  ;;  %v9769_v58 = vld [vmem:[#allocation7 + $0x51c] sm:$0xf0] }
 0x15d   :  { %2875 = vmatpush.bf16.msrb.mxu0 %v6644_v63  ;;  %2889 = vmatpush.bf16.msrb.mxu1 %v7028_v0  ;;  %v6792_v63 = vor.u32 %v9673_v54, %v6791_v53  ;;  %v7176_v0 = vor.u32 %v9769_v58, %v7175_v57  ;;  %v6551_v53 = vld [vmem:[#allocation7 + $0x10] sm:$0xf]  ;;  %v9613_v54 = vld [vmem:[#allocation7 + $0x3c] sm:$0xf0] }
 0x15e   :  { %v9709_v58 = vld [vmem:[#allocation7 + $0x33c] sm:$0xf0] }
 0x15f   :  { %2902 = vmatpush.bf16.msrb.mxu2 %v7460_v5  ;;  %2916 = vmatpush.bf16.msrb.mxu3 %v7844_v6  ;;  %v7127_v5 = vld [vmem:[#allocation7 + $0x490] sm:$0xf]  ;;  %v9757_v6 = vld [vmem:[#allocation7 + $0x4bc] sm:$0xf0] }
 0x161   :  { %2876 = vmatpush.bf16.msrb.mxu0 %v6596_v11  ;;  %2890 = vmatpush.bf16.msrb.mxu1 %v6980_v12  ;;  %v6744_v11 = vor.u32 %v9661_v2, %v6743_v1  ;;  %v7128_v12 = vor.u32 %v9757_v6, %v7127_v5  ;;  %v7751_v1 = vld [vmem:[#allocation7 + $0x970] sm:$0xf]  ;;  %v9913_v2 = vld [vmem:[#allocation7 + $0x99c] sm:$0xf0]  ;;  %v6892_v5 = vor.u32 %v9691_v59, %v6889_v60  ;;  %v9847_v59 = vld [vmem:[#allocation7 + $0x794] sm:$0xf] }
 0x162   :  { %v7276_v6 = vor.u32 %v9787_v61, %v7273_v62  ;;  %v7513_v60 = vld [vmem:[#allocation7 + $0x7c0] sm:$0xf0]  ;;  %v9943_v61 = vld [vmem:[#allocation7 + $0xa94] sm:$0xf] }
 0x163   :  { %2903 = vmatpush.bf16.msrb.mxu2 %v7412_v19  ;;  %2917 = vmatpush.bf16.msrb.mxu3 %v7796_v20  ;;  %v7511_v19 = vld [vmem:[#allocation7 + $0x790] sm:$0xf]  ;;  %v9853_v20 = vld [vmem:[#allocation7 + $0x7bc] sm:$0xf0]  ;;  %v7897_v62 = vld [vmem:[#allocation7 + $0xac0] sm:$0xf0] }
 0x165   :  { %2877 = vmatpush.bf16.msrb.mxu0 %v6548_v29  ;;  %2891 = vmatpush.bf16.msrb.mxu1 %v6932_v30  ;;  %v7512_v29 = vor.u32 %v9853_v20, %v7511_v19  ;;  %v7896_v30 = vor.u32 %v9949_v24, %v7895_v21  ;;  %v9979_v19 = vld [vmem:[#allocation7 + $0xbb4] sm:$0xf]  ;;  %v8041_v20 = vld [vmem:[#allocation7 + $0xbe0] sm:$0xf0]  ;;  %v6844_v21 = vor.u32 %v9679_v7, %v6841_v8 }
 0x166   :  { %v9835_v7 = vld [vmem:[#allocation7 + $0x734] sm:$0xf]  ;;  %v7465_v8 = vld [vmem:[#allocation7 + $0x760] sm:$0xf0] }
 0x167   :  { %2904 = vmatpush.bf16.msrb.mxu2 %v7364_v36  ;;  %2918 = vmatpush.bf16.msrb.mxu3 %v7748_v37  ;;  %v9937_v36 = vld [vmem:[#allocation7 + $0xa5c] sm:$0xf0]  ;;  %v6648_v37 = vor.u32 %v9637_v28, %v6647_v27  ;;  %v9667_v27 = vld [vmem:[#allocation7 + $0x1f4] sm:$0xf]  ;;  %v6793_v28 = vld [vmem:[#allocation7 + $0x220] sm:$0xf0] }
 0x168   :  { %2878 = vmatmul.bf16.vlgmr.msrb.gmra.mxu0 %v10716_v22  ;;  %2892 = vmatmul.bf16.vlgmr.msrb.gmra.mxu1 %v10718_v23  ;;  %v7848_v42 = vor.u32 %v9937_v36, %v7847_v35  ;;  %v9967_v35 = vld [vmem:[#allocation7 + $0xb54] sm:$0xf]  ;;  %v7993_v36 = vld [vmem:[#allocation7 + $0xb80] sm:$0xf0] }
 0x169   :  { %2926 = vmatpush.bf16.msra.mxu0 %v6888_v31  ;;  %2940 = vmatpush.bf16.msra.mxu1 %v7272_v32  ;;  %v7031_v31 = vld [vmem:[#allocation7 + $0x3d0] sm:$0xf]  ;;  %v9733_v32 = vld [vmem:[#allocation7 + $0x3fc] sm:$0xf0] }
 0x16a   :  { %v7032_v38 = vor.u32 %v9733_v32, %v7031_v31  ;;  %v9763_v31 = vld [vmem:[#allocation7 + $0x4f4] sm:$0xf]  ;;  %v7177_v32 = vld [vmem:[#allocation7 + $0x520] sm:$0xf0] }
 0x16b   :  { %2905 = vmatpush.bf16.msrb.mxu2 %v7316_v51  ;;  %2919 = vmatpush.bf16.msrb.mxu3 %v7700_v52  ;;  %v6600_v51 = vor.u32 %v9625_v40, %v6599_v39  ;;  %v6984_v52 = vor.u32 %v9721_v44, %v6983_v43  ;;  %v9655_v39 = vld [vmem:[#allocation7 + $0x194] sm:$0xf]  ;;  %v6745_v40 = vld [vmem:[#allocation7 + $0x1c0] sm:$0xf0] }
 0x16c   :  { %v9751_v43 = vld [vmem:[#allocation7 + $0x494] sm:$0xf]  ;;  %v7129_v44 = vld [vmem:[#allocation7 + $0x4c0] sm:$0xf0] }
 0x16d   :  { %2927 = vmatpush.bf16.msra.mxu0 %v6840_v47  ;;  %2941 = vmatpush.bf16.msra.mxu1 %v7224_v50  ;;  %v7799_v47 = vld [vmem:[#allocation7 + $0x9d0] sm:$0xf]  ;;  %v9925_v50 = vld [vmem:[#allocation7 + $0x9fc] sm:$0xf0] }
 0x16e   :  { %2906 = vmatmul.bf16.vlgmr.msrb.gmra.mxu2 %v10722_v48  ;;  %2920 = vmatmul.bf16.vlgmr.msrb.gmra.mxu3 %v10724_v49  ;;  %v7800_v57 = vor.u32 %v9925_v50, %v7799_v47  ;;  %v9955_v47 = vld [vmem:[#allocation7 + $0xaf4] sm:$0xf]  ;;  %v7945_v50 = vld [vmem:[#allocation7 + $0xb20] sm:$0xf0] }
 0x16f   :  { %2954 = vmatpush.bf16.msra.mxu2 %v7656_v55  ;;  %2968 = vmatpush.bf16.msra.mxu3 %v8040_v56  ;;  %v6935_v55 = vld [vmem:[#allocation7 + $0x310] sm:$0xf]  ;;  %v7416_v56 = vor.u32 %v9829_v46, %v7415_v45  ;;  %v9859_v45 = vld [vmem:[#allocation7 + $0x7f4] sm:$0xf]  ;;  %v7561_v46 = vld [vmem:[#allocation7 + $0x820] sm:$0xf0] }
 0x171   :  { %2928 = vmatpush.bf16.msra.mxu0 %v6792_v63  ;;  %2942 = vmatpush.bf16.msra.mxu1 %v7176_v0  ;;  %v7367_v63 = vld [vmem:[#allocation7 + $0x670] sm:$0xf]  ;;  %v9817_v0 = vld [vmem:[#allocation7 + $0x69c] sm:$0xf0] }
 0x172   :  { %v7368_v10 = vor.u32 %v9817_v0, %v7367_v63 }
 0x173   :  { %2955 = vmatpush.bf16.msra.mxu2 %v7608_v3  ;;  %2969 = vmatpush.bf16.msra.mxu3 %v7992_v4  ;;  %v6552_v3 = vor.u32 %v9613_v54, %v6551_v53  ;;  %v6936_v4 = vor.u32 %v9709_v58, %v6935_v55  ;;  %v9643_v53 = vld [vmem:[#allocation7 + $0x134] sm:$0xf]  ;;  %v6697_v54 = vld [vmem:[#allocation7 + $0x160] sm:$0xf0]  ;;  %v7564_v55 = vor.u32 %v9859_v45, %v7561_v46  ;;  %v6847_v45 = vld [vmem:[#allocation7 + $0x258] sm:$0xf] }
 0x174   :  { %v7081_v58 = vld [vmem:[#allocation7 + $0x460] sm:$0xf0]  ;;  %v6700_v63 = vor.u32 %v9643_v53, %v6697_v54  ;;  %v9686_v46 = vld [vmem:[#allocation7 + $0x284] sm:$0xf0]  ;;  %v9799_v53 = vld [vmem:[#allocation7 + $0x614] sm:$0xf] }
 0x175   :  { %2929 = vmatpush.bf16.msra.mxu0 %v6744_v11  ;;  %2943 = vmatpush.bf16.msra.mxu1 %v7128_v12  ;;  %v7752_v11 = vor.u32 %v9913_v2, %v7751_v1  ;;  %v7225_v12 = vld [vmem:[#allocation7 + $0x580] sm:$0xf0]  ;;  %v9631_v1 = vld [vmem:[#allocation7 + $0xd4] sm:$0xf] }
 0x176   :  { %v7228_v24 = vor.u32 %v9775_v9, %v7225_v12  ;;  %v6649_v2 = vld [vmem:[#allocation7 + $0x100] sm:$0xf0]  ;;  %v9931_v9 = vld [vmem:[#allocation7 + $0xa34] sm:$0xf] }
 0x177   :  { %2956 = vmatpush.bf16.msra.mxu2 %v7560_v15  ;;  %2970 = vmatpush.bf16.msra.mxu3 %v7944_v16  ;;  %v7703_v15 = vld [vmem:[#allocation7 + $0x910] sm:$0xf]  ;;  %v9901_v16 = vld [vmem:[#allocation7 + $0x93c] sm:$0xf0]  ;;  %v7321_v54 = vld [vmem:[#allocation7 + $0x640] sm:$0xf0] }
 0x179   :  { %2930 = vmatpush.bf16.msra.mxu0 %v6696_v25  ;;  %2944 = vmatpush.bf16.msra.mxu1 %v7080_v26  ;;  %v7320_v25 = vor.u32 %v9805_v14, %v7319_v13  ;;  %v7704_v26 = vor.u32 %v9901_v16, %v7703_v15  ;;  %v9619_v13 = vld [vmem:[#allocation7 + $0x74] sm:$0xf]  ;;  %v6601_v14 = vld [vmem:[#allocation7 + $0xa0] sm:$0xf0]  ;;  %v7468_v15 = vor.u32 %v9835_v7, %v7465_v8  ;;  %v7615_v7 = vld [vmem:[#allocation7 + $0x858] sm:$0xf] }
 0x17a   :  { %v9878_v8 = vld [vmem:[#allocation7 + $0x884] sm:$0xf0] }
 0x17b   :  { %2957 = vmatpush.bf16.msra.mxu2 %v7512_v29  ;;  %2971 = vmatpush.bf16.msra.mxu3 %v7896_v30  ;;  %v7660_v29 = vor.u32 %v9883_v17, %v7657_v18  ;;  %v8044_v30 = vor.u32 %v9979_v19, %v8041_v20  ;;  %v9715_v17 = vld [vmem:[#allocation7 + $0x374] sm:$0xf]  ;;  %v6985_v18 = vld [vmem:[#allocation7 + $0x3a0] sm:$0xf0] }
 0x17c   :  { %v9823_v19 = vld [vmem:[#allocation7 + $0x6d4] sm:$0xf]  ;;  %v7417_v20 = vld [vmem:[#allocation7 + $0x700] sm:$0xf0] }
 0x17d   :  { %2931 = vmatpush.bf16.msra.mxu0 %v6648_v37  ;;  %2945 = vmatpush.bf16.msra.mxu1 %v7032_v38  ;;  %v6796_v37 = vor.u32 %v9667_v27, %v6793_v28  ;;  %v7180_v38 = vor.u32 %v9763_v31, %v7177_v32  ;;  %v9607_v27 = vld [vmem:[#allocation7 + $0x14] sm:$0xf]  ;;  %v6553_v28 = vld [vmem:[#allocation7 + $0x40] sm:$0xf0] }
 0x17e   :  { %v6937_v32 = vld [vmem:[#allocation7 + $0x340] sm:$0xf0] }
 0x17f   :  { %2958 = vmatpush.bf16.msra.mxu2 %v7464_v41  ;;  %2972 = vmatpush.bf16.msra.mxu3 %v7848_v42  ;;  %v7612_v41 = vor.u32 %v9871_v33, %v7609_v34  ;;  %v7996_v42 = vor.u32 %v9967_v35, %v7993_v36  ;;  %v6895_v33 = vld [vmem:[#allocation7 + $0x2b8] sm:$0xf]  ;;  %v9698_v34 = vld [vmem:[#allocation7 + $0x2e4] sm:$0xf0] }
 0x180   :  { %v7279_v35 = vld [vmem:[#allocation7 + $0x5b8] sm:$0xf]  ;;  %v9794_v36 = vld [vmem:[#allocation7 + $0x5e4] sm:$0xf0] }
 0x181   :  { %2932 = vmatpush.bf16.msra.mxu0 %v6600_v51  ;;  %2946 = vmatpush.bf16.msra.mxu1 %v6984_v52  ;;  %v6748_v51 = vor.u32 %v9655_v39, %v6745_v40  ;;  %v7132_v52 = vor.u32 %v9751_v43, %v7129_v44  ;;  %v9907_v39 = vld [vmem:[#allocation7 + $0x974] sm:$0xf]  ;;  %v7753_v40 = vld [vmem:[#allocation7 + $0x9a0] sm:$0xf0]  ;;  %v6896_v43 = vor.u32 %v9698_v34, %v6895_v33  ;;  %v7087_v34 = vld [vmem:[#allocation7 + $0x438] sm:$0xf] }
 0x182   :  { %v7280_v44 = vor.u32 %v9794_v36, %v7279_v35  ;;  %v9746_v35 = vld [vmem:[#allocation7 + $0x464] sm:$0xf0]  ;;  %v7519_v36 = vld [vmem:[#allocation7 + $0x798] sm:$0xf] }
 0x183   :  { %2959 = vmatpush.bf16.msra.mxu2 %v7416_v56  ;;  %2973 = vmatpush.bf16.msra.mxu3 %v7800_v57  ;;  %v7948_v56 = vor.u32 %v9955_v47, %v7945_v50  ;;  %v9739_v57 = vld [vmem:[#allocation7 + $0x434] sm:$0xf]  ;;  %v7231_v47 = vld [vmem:[#allocation7 + $0x558] sm:$0xf] }
 0x184   :  { %v7084_v0 = vor.u32 %v9739_v57, %v7081_v58  ;;  %v7663_v57 = vld [vmem:[#allocation7 + $0x8b8] sm:$0xf]  ;;  %v9890_v58 = vld [vmem:[#allocation7 + $0x8e4] sm:$0xf0] }
 0x185   :  { %2933 = vmatpush.bf16.msra.mxu0 %v6552_v3  ;;  %2947 = vmatpush.bf16.msra.mxu1 %v6936_v4  ;;  %v7516_v3 = vor.u32 %v9847_v59, %v7513_v60  ;;  %v7900_v4 = vor.u32 %v9943_v61, %v7897_v62  ;;  %v8047_v59 = vld [vmem:[#allocation7 + $0xbb8] sm:$0xf]  ;;  %v9986_v60 = vld [vmem:[#allocation7 + $0xbe4] sm:$0xf0]  ;;  %v6848_v61 = vor.u32 %v9686_v46, %v6847_v45 }
 0x186   :  { %v9638_v45 = vld [vmem:[#allocation7 + $0x104] sm:$0xf0] }
 0x187   :  { %2960 = vmatpush.bf16.msra.mxu2 %v7368_v10  ;;  %2974 = vmatpush.bf16.msra.mxu3 %v7752_v11  ;;  %v7849_v10 = vld [vmem:[#allocation7 + $0xa60] sm:$0xf0]  ;;  %v6652_v11 = vor.u32 %v9631_v1, %v6649_v2  ;;  %v6799_v1 = vld [vmem:[#allocation7 + $0x1f8] sm:$0xf]  ;;  %v9674_v2 = vld [vmem:[#allocation7 + $0x224] sm:$0xf0] }
 0x188   :  { %2934 = vmatmul.bf16.vlgmr.msra.gmra.mxu0 %v10716_v22  ;;  %2948 = vmatmul.bf16.vlgmr.msra.gmra.mxu1 %v10718_v23  ;;  %v7852_v16 = vor.u32 %v9931_v9, %v7849_v10  ;;  %v7999_v9 = vld [vmem:[#allocation7 + $0xb58] sm:$0xf]  ;;  %v9974_v10 = vld [vmem:[#allocation7 + $0xb84] sm:$0xf0] }
 0x189   :  { %2982 = vmatpush.bf16.msrb.mxu0 %v6892_v5  ;;  %2996 = vmatpush.bf16.msrb.mxu1 %v7276_v6  ;;  %v9727_v5 = vld [vmem:[#allocation7 + $0x3d4] sm:$0xf]  ;;  %v7033_v6 = vld [vmem:[#allocation7 + $0x400] sm:$0xf0] }
 0x18a   :  { %v7036_v12 = vor.u32 %v9727_v5, %v7033_v6  ;;  %v7183_v5 = vld [vmem:[#allocation7 + $0x4f8] sm:$0xf]  ;;  %v9770_v6 = vld [vmem:[#allocation7 + $0x524] sm:$0xf0] }
 0x18b   :  { %2961 = vmatpush.bf16.msra.mxu2 %v7320_v25  ;;  %2975 = vmatpush.bf16.msra.mxu3 %v7704_v26  ;;  %v6604_v25 = vor.u32 %v9619_v13, %v6601_v14  ;;  %v6988_v26 = vor.u32 %v9715_v17, %v6985_v18  ;;  %v7616_v18 = vor.u32 %v9878_v8, %v7615_v7 }
 0x18d   :  { %2983 = vmatpush.bf16.msrb.mxu0 %v6844_v21  ;;  %2997 = vmatpush.bf16.msrb.mxu1 %v7228_v24  ;;  %v9919_v21 = vld [vmem:[#allocation7 + $0x9d4] sm:$0xf]  ;;  %v7801_v24 = vld [vmem:[#allocation7 + $0xa00] sm:$0xf0] }
 0x18e   :  { %2962 = vmatmul.bf16.vlgmr.msra.gmra.mxu2 %v10722_v48  ;;  %2976 = vmatmul.bf16.vlgmr.msra.gmra.mxu3 %v10724_v49  ;;  %v7804_v31 = vor.u32 %v9919_v21, %v7801_v24  ;;  %v9758_v21 = vld [vmem:[#allocation7 + $0x4c4] sm:$0xf0]  ;;  %v7567_v24 = vld [vmem:[#allocation7 + $0x7f8] sm:$0xf] }
 0x18f   :  { %3010 = vmatpush.bf16.msrb.mxu2 %v7660_v29  ;;  %3024 = vmatpush.bf16.msrb.mxu3 %v8044_v30  ;;  %v9703_v29 = vld [vmem:[#allocation7 + $0x314] sm:$0xf]  ;;  %v7420_v30 = vor.u32 %v9823_v19, %v7417_v20  ;;  %v8000_v19 = vor.u32 %v9974_v10, %v7999_v9  ;;  %v7135_v20 = vld [vmem:[#allocation7 + $0x498] sm:$0xf] }
 0x190   :  { %v6559_v10 = vld [vmem:[#allocation7 + $0x18] sm:$0xf] }
 0x191   :  { %2984 = vmatpush.bf16.msrb.mxu0 %v6796_v37  ;;  %2998 = vmatpush.bf16.msrb.mxu1 %v7180_v38  ;;  %v9811_v37 = vld [vmem:[#allocation7 + $0x674] sm:$0xf]  ;;  %v7369_v38 = vld [vmem:[#allocation7 + $0x6a0] sm:$0xf0] }
 0x192   :  { %v7372_v50 = vor.u32 %v9811_v37, %v7369_v38  ;;  %v9854_v37 = vld [vmem:[#allocation7 + $0x7c4] sm:$0xf0]  ;;  %v7903_v38 = vld [vmem:[#allocation7 + $0xa98] sm:$0xf] }
 0x193   :  { %3011 = vmatpush.bf16.msrb.mxu2 %v7612_v41  ;;  %3025 = vmatpush.bf16.msrb.mxu3 %v7996_v42  ;;  %v6556_v41 = vor.u32 %v9607_v27, %v6553_v28  ;;  %v6940_v42 = vor.u32 %v9703_v29, %v6937_v32  ;;  %v9962_v27 = vld [vmem:[#allocation7 + $0xb24] sm:$0xf0]  ;;  %v7136_v29 = vor.u32 %v9758_v21, %v7135_v20  ;;  %v9788_v21 = vld [vmem:[#allocation7 + $0x5bc] sm:$0xf] }
 0x194   :  { %v7520_v46 = vor.u32 %v9854_v37, %v7519_v36  ;;  %v6849_v36 = vld [vmem:[#allocation7 + $0x288] sm:$0xf0]  ;;  %v9776_v37 = vld [vmem:[#allocation7 + $0x55c] sm:$0xf] }
 0x195   :  { %2985 = vmatpush.bf16.msrb.mxu0 %v6748_v51  ;;  %2999 = vmatpush.bf16.msrb.mxu1 %v7132_v52  ;;  %v7756_v51 = vor.u32 %v9907_v39, %v7753_v40  ;;  %v9782_v52 = vld [vmem:[#allocation7 + $0x584] sm:$0xf0] }
 0x196   :  { %v7232_v62 = vor.u32 %v9782_v52, %v7231_v47  ;;  %v9950_v39 = vld [vmem:[#allocation7 + $0xac4] sm:$0xf0]  ;;  %v7471_v52 = vld [vmem:[#allocation7 + $0x738] sm:$0xf] }
 0x197   :  { %3012 = vmatpush.bf16.msrb.mxu2 %v7564_v55  ;;  %3026 = vmatpush.bf16.msrb.mxu3 %v7948_v56  ;;  %v9895_v55 = vld [vmem:[#allocation7 + $0x914] sm:$0xf]  ;;  %v7705_v56 = vld [vmem:[#allocation7 + $0x940] sm:$0xf0]  ;;  %v7904_v47 = vor.u32 %v9950_v39, %v7903_v38 }
 0x199   :  { %2986 = vmatpush.bf16.msrb.mxu0 %v6700_v63  ;;  %3000 = vmatpush.bf16.msrb.mxu1 %v7084_v0  ;;  %v7324_v63 = vor.u32 %v9799_v53, %v7321_v54  ;;  %v7708_v0 = vor.u32 %v9895_v55, %v7705_v56  ;;  %v9842_v53 = vld [vmem:[#allocation7 + $0x764] sm:$0xf0]  ;;  %v7855_v54 = vld [vmem:[#allocation7 + $0xa38] sm:$0xf] }
 0x19a   :  { %v9938_v55 = vld [vmem:[#allocation7 + $0xa64] sm:$0xf0] }
 0x19b   :  { %3013 = vmatpush.bf16.msrb.mxu2 %v7516_v3  ;;  %3027 = vmatpush.bf16.msrb.mxu3 %v7900_v4  ;;  %v7664_v3 = vor.u32 %v9890_v58, %v7663_v57  ;;  %v8048_v4 = vor.u32 %v9986_v60, %v8047_v59  ;;  %v6607_v58 = vld [vmem:[#allocation7 + $0x78] sm:$0xf]  ;;  %v9626_v59 = vld [vmem:[#allocation7 + $0xa4] sm:$0xf0] }
 0x19c   :  { %v6608_v8 = vor.u32 %v9626_v59, %v6607_v58  ;;  %v6801_v58 = vld [vmem:[#allocation7 + $0x228] sm:$0xf0] }
 0x19d   :  { %2987 = vmatpush.bf16.msrb.mxu0 %v6652_v11  ;;  %3001 = vmatpush.bf16.msrb.mxu1 %v7036_v12  ;;  %v6800_v11 = vor.u32 %v9674_v2, %v6799_v1  ;;  %v7184_v12 = vor.u32 %v9770_v6, %v7183_v5  ;;  %v9722_v1 = vld [vmem:[#allocation7 + $0x3a4] sm:$0xf0]  ;;  %v7423_v2 = vld [vmem:[#allocation7 + $0x6d8] sm:$0xf] }
 0x19e   :  { %v7807_v5 = vld [vmem:[#allocation7 + $0x9d8] sm:$0xf]  ;;  %v9926_v6 = vld [vmem:[#allocation7 + $0xa04] sm:$0xf0] }
 0x19f   :  { %3014 = vmatpush.bf16.msrb.mxu2 %v7468_v15  ;;  %3028 = vmatpush.bf16.msrb.mxu3 %v7852_v16  ;;  %v6751_v15 = vld [vmem:[#allocation7 + $0x198] sm:$0xf]  ;;  %v9662_v16 = vld [vmem:[#allocation7 + $0x1c4] sm:$0xf0] }
 0x1a0   :  { %v6752_v28 = vor.u32 %v9662_v16, %v6751_v15  ;;  %v7808_v16 = vor.u32 %v9926_v6, %v7807_v5 }
 0x1a1   :  { %2988 = vmatpush.bf16.msrb.mxu0 %v6604_v25  ;;  %3002 = vmatpush.bf16.msrb.mxu1 %v6988_v26  ;;  %v9866_v25 = vld [vmem:[#allocation7 + $0x824] sm:$0xf0]  ;;  %v7951_v26 = vld [vmem:[#allocation7 + $0xaf8] sm:$0xf] }
 0x1a2   :  { %v7568_v32 = vor.u32 %v9866_v25, %v7567_v24  ;;  %v7952_v33 = vor.u32 %v9962_v27, %v7951_v26  ;;  %v7281_v24 = vld [vmem:[#allocation7 + $0x5e8] sm:$0xf0]  ;;  %v7375_v25 = vld [vmem:[#allocation7 + $0x678] sm:$0xf]  ;;  %v9818_v26 = vld [vmem:[#allocation7 + $0x6a4] sm:$0xf0] }
 0x1a3   :  { %3015 = vmatpush.bf16.msrb.mxu2 %v7420_v30  ;;  %3029 = vmatpush.bf16.msrb.mxu3 %v7804_v31  ;;  %v6703_v30 = vld [vmem:[#allocation7 + $0x138] sm:$0xf]  ;;  %v9650_v31 = vld [vmem:[#allocation7 + $0x164] sm:$0xf0]  ;;  %v7376_v38 = vor.u32 %v9818_v26, %v7375_v25  ;;  %v6705_v25 = vld [vmem:[#allocation7 + $0x168] sm:$0xf0] }
 0x1a4   :  { %v2711_v13 = vpop.f32.mrf.mxu0  ;;  %v2725_v14 = vpop.f32.mrf.mxu1  ;;  %v6704_v40 = vor.u32 %v9650_v31, %v6703_v30  ;;  %v7759_v27 = vld [vmem:[#allocation7 + $0x978] sm:$0xf] }
 0x1a5   :  { %2989 = vmatpush.bf16.msrb.mxu0 %v6556_v41  ;;  %3003 = vmatpush.bf16.msrb.mxu1 %v6940_v42  ;;  %v2726_v17 = vadd.f32 %v2725_v14, %v2711_v13  ;;  %v7088_v41 = vor.u32 %v9746_v35, %v7087_v34  ;;  %v7284_v34 = vor.u32 %v9788_v21, %v7281_v24  ;;  %v9680_v35 = vld [vmem:[#allocation7 + $0x25c] sm:$0xf] }
 0x1a6   :  { %v9644_v24 = vld [vmem:[#allocation7 + $0x13c] sm:$0xf] }
 0x1a7   :  { %3016 = vmatpush.bf16.msrb.mxu2 %v7372_v50  ;;  %3030 = vmatpush.bf16.msrb.mxu3 %v7756_v51  ;;  %v7039_v50 = vld [vmem:[#allocation7 + $0x3d8] sm:$0xf]  ;;  %v9734_v51 = vld [vmem:[#allocation7 + $0x404] sm:$0xf0] }
 0x1a8   :  { %2990 = vmatmul.bf16.vlgmr.msrb.gmra.mxu0 %v10716_v22  ;;  %3004 = vmatmul.bf16.vlgmr.msrb.gmra.mxu1 %v10718_v23  ;;  %v7040_v57 = vor.u32 %v9734_v51, %v7039_v50  ;;  %v7665_v50 = vld [vmem:[#allocation7 + $0x8e8] sm:$0xf0]  ;;  %v9980_v51 = vld [vmem:[#allocation7 + $0xbbc] sm:$0xf] }
 0x1a9   :  { %3038 = vmatpush.bf16.msra.mxu0 %v6896_v43  ;;  %3052 = vmatpush.bf16.msra.mxu1 %v7280_v44  ;;  %v6655_v44 = vld [vmem:[#allocation7 + $0xd8] sm:$0xf] }
 0x1aa   :  { %v6656_v56 = vor.u32 %v9638_v45, %v6655_v44  ;;  %v9806_v44 = vld [vmem:[#allocation7 + $0x644] sm:$0xf0]  ;;  %v7711_v45 = vld [vmem:[#allocation7 + $0x918] sm:$0xf] }
 0x1ab   :  { %3017 = vmatpush.bf16.msrb.mxu2 %v7324_v63  ;;  %3031 = vmatpush.bf16.msrb.mxu3 %v7708_v0  ;;  %v7856_v63 = vor.u32 %v9938_v55, %v7855_v54  ;;  %v6991_v0 = vld [vmem:[#allocation7 + $0x378] sm:$0xf] }
 0x1ac   :  { %v10748_v42 = vpop.f32.mrf.mxu0  ;;  %v10750_v43 = vpop.f32.mrf.mxu1  ;;  %v6992_v9 = vor.u32 %v9722_v1, %v6991_v0  ;;  %v7617_v0 = vld [vmem:[#allocation7 + $0x888] sm:$0xf0]  ;;  %v9968_v1 = vld [vmem:[#allocation7 + $0xb5c] sm:$0xf] }
 0x1ad   :  { %3039 = vmatpush.bf16.msra.mxu0 %v6848_v61  ;;  %3053 = vmatpush.bf16.msra.mxu1 %v7232_v62  ;;  %v7472_v62 = vor.u32 %v9842_v53, %v7471_v52  ;;  %v8049_v52 = vld [vmem:[#allocation7 + $0xbe8] sm:$0xf0]  ;;  %v6852_v53 = vor.u32 %v9680_v35, %v6849_v36  ;;  %v6708_v36 = vor.u32 %v9644_v24, %v6705_v25  ;;  %v6855_v24 = vld [vmem:[#allocation7 + $0x260] sm:$0xf]  ;;  %v9687_v25 = vld [vmem:[#allocation7 + $0x28c] sm:$0xf0] }
 0x1ae   :  { %3018 = vmatmul.bf16.vlgmr.msrb.gmra.mxu2 %v10722_v48  ;;  %3032 = vmatmul.bf16.vlgmr.msrb.gmra.mxu3 %v10724_v49  ;;  %v7905_v35 = vld [vmem:[#allocation7 + $0xac8] sm:$0xf0] }
 0x1af   :  { %3066 = vmatpush.bf16.msra.mxu2 %v7664_v3  ;;  %3080 = vmatpush.bf16.msra.mxu3 %v8048_v4  ;;  %v9830_v4 = vld [vmem:[#allocation7 + $0x704] sm:$0xf0] }
 0x1b0   :  { %v7424_v15 = vor.u32 %v9830_v4, %v7423_v2  ;;  %v8001_v2 = vld [vmem:[#allocation7 + $0xb88] sm:$0xf0] }
 0x1b1   :  { %3040 = vmatpush.bf16.msra.mxu0 %v6800_v11  ;;  %3054 = vmatpush.bf16.msra.mxu1 %v7184_v12  ;;  %v2739_v60 = vpop.f32.mrf.mxu2  ;;  %v2753_v61 = vpop.f32.mrf.mxu3  ;;  %v9614_v11 = vld [vmem:[#allocation7 + $0x44] sm:$0xf0]  ;;  %v6943_v12 = vld [vmem:[#allocation7 + $0x318] sm:$0xf] }
 0x1b2   :  { %v2740_v3 = vadd.f32 %v2739_v60, %v2726_v17  ;;  %v9692_v17 = vld [vmem:[#allocation7 + $0x2bc] sm:$0xf]  ;;  %v8052_v60 = vor.u32 %v9980_v51, %v8049_v52  ;;  %v7857_v51 = vld [vmem:[#allocation7 + $0xa68] sm:$0xf0] }
 0x1b3   :  { %3067 = vmatpush.bf16.msra.mxu2 %v7616_v18  ;;  %3081 = vmatpush.bf16.msra.mxu3 %v8000_v19  ;;  %v9710_v18 = vld [vmem:[#allocation7 + $0x344] sm:$0xf0]  ;;  %v6897_v19 = vld [vmem:[#allocation7 + $0x2e8] sm:$0xf0] }
 0x1b4   :  { %v10752_v7 = vadd.f32 %v2753_v61, %v2740_v3  ;;  %v6944_v30 = vor.u32 %v9710_v18, %v6943_v12  ;;  %v9764_v61 = vld [vmem:[#allocation7 + $0x4fc] sm:$0xf]  ;;  %v8004_v12 = vor.u32 %v9968_v1, %v8001_v2  ;;  %v7569_v18 = vld [vmem:[#allocation7 + $0x828] sm:$0xf0] }
 0x1b5   :  { %3041 = vmatpush.bf16.msra.mxu0 %v6752_v28  ;;  %3055 = vmatpush.bf16.msra.mxu1 %v7136_v29  ;;  %v2767_v13 = vpop.f32.mrf.mxu0  ;;  %v2781_v14 = vpop.f32.mrf.mxu1  ;;  %v9914_v28 = vld [vmem:[#allocation7 + $0x9a4] sm:$0xf0]  ;;  %v6560_v29 = vor.u32 %v9614_v11, %v6559_v10  ;;  %v9608_v2 = vld [vmem:[#allocation7 + $0x1c] sm:$0xf] }
 0x1b6   :  { %v2782_v20 = vadd.f32 %v2781_v14, %v2767_v13  ;;  %v7760_v39 = vor.u32 %v9914_v28, %v7759_v27  ;;  %v9752_v13 = vld [vmem:[#allocation7 + $0x49c] sm:$0xf]  ;;  %v7137_v14 = vld [vmem:[#allocation7 + $0x4c8] sm:$0xf0] }
 0x1b7   :  { %3068 = vmatpush.bf16.msra.mxu2 %v7568_v32  ;;  %3082 = vmatpush.bf16.msra.mxu3 %v7952_v33  ;;  %v6900_v33 = vor.u32 %v9692_v17, %v6897_v19  ;;  %v9956_v17 = vld [vmem:[#allocation7 + $0xafc] sm:$0xf]  ;;  %v7953_v19 = vld [vmem:[#allocation7 + $0xb28] sm:$0xf0]  ;;  %v7140_v21 = vor.u32 %v9752_v13, %v7137_v14 }
 0x1b8   :  { %v7956_v27 = vor.u32 %v9956_v17, %v7953_v19  ;;  %v9740_v28 = vld [vmem:[#allocation7 + $0x43c] sm:$0xf]  ;;  %v7377_v14 = vld [vmem:[#allocation7 + $0x6a8] sm:$0xf0] }
 0x1b9   :  { %3042 = vmatpush.bf16.msra.mxu0 %v6704_v40  ;;  %3056 = vmatpush.bf16.msra.mxu1 %v7088_v41  ;;  %v10754_v31 = vpop.f32.mrf.mxu2  ;;  %v10756_v32 = vpop.f32.mrf.mxu3  ;;  %v7233_v40 = vld [vmem:[#allocation7 + $0x588] sm:$0xf0]  ;;  %v7327_v41 = vld [vmem:[#allocation7 + $0x618] sm:$0xf]  ;;  %v9812_v13 = vld [vmem:[#allocation7 + $0x67c] sm:$0xf] }
 0x1ba   :  { %v7236_v54 = vor.u32 %v9776_v37, %v7233_v40  ;;  %v7328_v55 = vor.u32 %v9806_v44, %v7327_v41  ;;  %v9728_v44 = vld [vmem:[#allocation7 + $0x3dc] sm:$0xf] }
 0x1bb   :  { %3069 = vmatpush.bf16.msra.mxu2 %v7520_v46  ;;  %3083 = vmatpush.bf16.msra.mxu3 %v7904_v47  ;;  %v9902_v46 = vld [vmem:[#allocation7 + $0x944] sm:$0xf0]  ;;  %v9884_v47 = vld [vmem:[#allocation7 + $0x8bc] sm:$0xf] }
 0x1bc   :  { %v7668_v59 = vor.u32 %v9884_v47, %v7665_v50  ;;  %v7473_v47 = vld [vmem:[#allocation7 + $0x768] sm:$0xf0]  ;;  %v9932_v50 = vld [vmem:[#allocation7 + $0xa3c] sm:$0xf] }
 0x1bd   :  { %3043 = vmatpush.bf16.msra.mxu0 %v6656_v56  ;;  %3057 = vmatpush.bf16.msra.mxu1 %v7040_v57  ;;  %v7712_v56 = vor.u32 %v9902_v46, %v7711_v45  ;;  %v9668_v57 = vld [vmem:[#allocation7 + $0x1fc] sm:$0xf]  ;;  %v7041_v45 = vld [vmem:[#allocation7 + $0x408] sm:$0xf0] }
 0x1be   :  { %v6804_v5 = vor.u32 %v9668_v57, %v6801_v58  ;;  %v9836_v46 = vld [vmem:[#allocation7 + $0x73c] sm:$0xf]  ;;  %v7860_v57 = vor.u32 %v9932_v50, %v7857_v51 }
 0x1bf   :  { %3070 = vmatpush.bf16.msra.mxu2 %v7472_v62  ;;  %3084 = vmatpush.bf16.msra.mxu3 %v7856_v63  ;;  %v7185_v62 = vld [vmem:[#allocation7 + $0x528] sm:$0xf0]  ;;  %v9872_v63 = vld [vmem:[#allocation7 + $0x85c] sm:$0xf] }
 0x1c0   :  { %v7188_v6 = vor.u32 %v9764_v61, %v7185_v62  ;;  %v7620_v11 = vor.u32 %v9872_v63, %v7617_v0  ;;  %v9716_v58 = vld [vmem:[#allocation7 + $0x37c] sm:$0xf]  ;;  %v7425_v61 = vld [vmem:[#allocation7 + $0x708] sm:$0xf0] }
 0x1c1   :  { %3044 = vmatpush.bf16.msra.mxu0 %v6608_v8  ;;  %3058 = vmatpush.bf16.msra.mxu1 %v6992_v9  ;;  %v2795_v3 = vpop.f32.mrf.mxu2  ;;  %v9656_v8 = vld [vmem:[#allocation7 + $0x19c] sm:$0xf]  ;;  %v6753_v9 = vld [vmem:[#allocation7 + $0x1c8] sm:$0xf0]  ;;  %v2809_v10 = vpop.f32.mrf.mxu3 }
 0x1c2   :  { %v2796_v4 = vadd.f32 %v2795_v3, %v2782_v20  ;;  %v6756_v20 = vor.u32 %v9656_v8, %v6753_v9  ;;  %v9920_v62 = vld [vmem:[#allocation7 + $0x9dc] sm:$0xf]  ;;  %v7809_v63 = vld [vmem:[#allocation7 + $0xa08] sm:$0xf0]  ;;  %v6903_v9 = vld [vmem:[#allocation7 + $0x2c0] sm:$0xf] }
 0x1c3   :  { %3071 = vmatpush.bf16.msra.mxu2 %v7424_v15  ;;  %3085 = vmatpush.bf16.msra.mxu3 %v7808_v16  ;;  %v9860_v15 = vld [vmem:[#allocation7 + $0x7fc] sm:$0xf]  ;;  %v6561_v3 = vld [vmem:[#allocation7 + $0x48] sm:$0xf0] }
 0x1c4   :  { %v10760_v16 = vadd.f32 %v2809_v10, %v2796_v4  ;;  %v7572_v26 = vor.u32 %v9860_v15, %v7569_v18  ;;  %v9704_v4 = vld [vmem:[#allocation7 + $0x31c] sm:$0xf]  ;;  %v6945_v8 = vld [vmem:[#allocation7 + $0x348] sm:$0xf0]  ;;  %v9699_v10 = vld [vmem:[#allocation7 + $0x2ec] sm:$0xf0]  ;;  %v6564_v17 = vor.u32 %v9608_v2, %v6561_v3 }
 0x1c5   :  { %3045 = vmatpush.bf16.msra.mxu0 %v6560_v29  ;;  %3059 = vmatpush.bf16.msra.mxu1 %v6944_v30  ;;  %v7089_v29 = vld [vmem:[#allocation7 + $0x468] sm:$0xf0]  ;;  %v9848_v30 = vld [vmem:[#allocation7 + $0x79c] sm:$0xf]  ;;  %v6948_v19 = vor.u32 %v9704_v4, %v6945_v8  ;;  %v7575_v2 = vld [vmem:[#allocation7 + $0x800] sm:$0xf] }
 0x1c6   :  { %v7092_v37 = vor.u32 %v9740_v28, %v7089_v29  ;;  %v9908_v15 = vld [vmem:[#allocation7 + $0x97c] sm:$0xf]  ;;  %v7761_v18 = vld [vmem:[#allocation7 + $0x9a8] sm:$0xf0]  ;;  %v9783_v29 = vld [vmem:[#allocation7 + $0x58c] sm:$0xf0] }
 0x1c7   :  { %3072 = vmatpush.bf16.msra.mxu2 %v7376_v38  ;;  %3086 = vmatpush.bf16.msra.mxu3 %v7760_v39  ;;  %v9632_v38 = vld [vmem:[#allocation7 + $0xdc] sm:$0xf]  ;;  %v6657_v39 = vld [vmem:[#allocation7 + $0x108] sm:$0xf0]  ;;  %v7764_v28 = vor.u32 %v9908_v15, %v7761_v18  ;;  %v9867_v3 = vld [vmem:[#allocation7 + $0x82c] sm:$0xf0] }
 0x1c8   :  { %3046 = vmatmul.bf16.vlgmr.msra.gmra.mxu0 %v10716_v22  ;;  %3060 = vmatmul.bf16.vlgmr.msra.gmra.mxu1 %v10718_v23  ;;  %v6660_v52 = vor.u32 %v9632_v38, %v6657_v39  ;;  %v8055_v38 = vld [vmem:[#allocation7 + $0xbc0] sm:$0xf]  ;;  %v9987_v39 = vld [vmem:[#allocation7 + $0xbec] sm:$0xf0] }
 0x1c9   :  { %3094 = vmatpush.bf16.msrb.mxu0 %v6900_v33  ;;  %3108 = vmatpush.bf16.msrb.mxu1 %v7284_v34  ;;  %v7521_v33 = vld [vmem:[#allocation7 + $0x7c8] sm:$0xf0]  ;;  %v9944_v34 = vld [vmem:[#allocation7 + $0xa9c] sm:$0xf]  ;;  %v8056_v51 = vor.u32 %v9987_v39, %v8055_v38  ;;  %v7959_v4 = vld [vmem:[#allocation7 + $0xb00] sm:$0xf] }
 0x1ca   :  { %v7524_v40 = vor.u32 %v9848_v30, %v7521_v33  ;;  %v7908_v41 = vor.u32 %v9944_v34, %v7905_v35  ;;  %v9800_v30 = vld [vmem:[#allocation7 + $0x61c] sm:$0xf]  ;;  %v7329_v33 = vld [vmem:[#allocation7 + $0x648] sm:$0xf0]  ;;  %v7527_v15 = vld [vmem:[#allocation7 + $0x7a0] sm:$0xf] }
 0x1cb   :  { %3073 = vmatpush.bf16.msra.mxu2 %v7328_v55  ;;  %3087 = vmatpush.bf16.msra.mxu3 %v7712_v56  ;;  %v6609_v55 = vld [vmem:[#allocation7 + $0xa8] sm:$0xf0]  ;;  %v7476_v56 = vor.u32 %v9836_v46, %v7473_v47  ;;  %v9896_v34 = vld [vmem:[#allocation7 + $0x91c] sm:$0xf]  ;;  %v6807_v46 = vld [vmem:[#allocation7 + $0x200] sm:$0xf] }
 0x1cc   :  { %v7713_v35 = vld [vmem:[#allocation7 + $0x948] sm:$0xf0]  ;;  %v9675_v47 = vld [vmem:[#allocation7 + $0x22c] sm:$0xf0]  ;;  %v6615_v38 = vld [vmem:[#allocation7 + $0x80] sm:$0xf] }
 0x1cd   :  { %3095 = vmatpush.bf16.msrb.mxu0 %v6852_v53  ;;  %3109 = vmatpush.bf16.msrb.mxu1 %v7236_v54  ;;  %v7044_v53 = vor.u32 %v9728_v44, %v7041_v45  ;;  %v9620_v54 = vld [vmem:[#allocation7 + $0x7c] sm:$0xf]  ;;  %v7332_v44 = vor.u32 %v9800_v30, %v7329_v33  ;;  %v7716_v45 = vor.u32 %v9896_v34, %v7713_v35  ;;  %v9855_v18 = vld [vmem:[#allocation7 + $0x7cc] sm:$0xf0]  ;;  %v7479_v30 = vld [vmem:[#allocation7 + $0x740] sm:$0xf] }
 0x1ce   :  { %3074 = vmatmul.bf16.vlgmr.msra.gmra.mxu2 %v10722_v48  ;;  %3088 = vmatmul.bf16.vlgmr.msra.gmra.mxu3 %v10724_v49  ;;  %v6612_v0 = vor.u32 %v9620_v54, %v6609_v55  ;;  %v7623_v54 = vld [vmem:[#allocation7 + $0x860] sm:$0xf]  ;;  %v9879_v55 = vld [vmem:[#allocation7 + $0x88c] sm:$0xf0] }
 0x1cf   :  { %3122 = vmatpush.bf16.msrb.mxu2 %v7668_v59  ;;  %3136 = vmatpush.bf16.msrb.mxu3 %v8052_v60  ;;  %v6993_v59 = vld [vmem:[#allocation7 + $0x3a8] sm:$0xf0]  ;;  %v9824_v60 = vld [vmem:[#allocation7 + $0x6dc] sm:$0xf]  ;;  %v9843_v33 = vld [vmem:[#allocation7 + $0x76c] sm:$0xf0] }
 0x1d0   :  { %v6996_v1 = vor.u32 %v9716_v58, %v6993_v59  ;;  %v6808_v58 = vor.u32 %v9675_v47, %v6807_v46  ;;  %v7863_v34 = vld [vmem:[#allocation7 + $0xa40] sm:$0xf]  ;;  %v9939_v35 = vld [vmem:[#allocation7 + $0xa6c] sm:$0xf0] }
 0x1d1   :  { %3096 = vmatpush.bf16.msrb.mxu0 %v6804_v5  ;;  %3110 = vmatpush.bf16.msrb.mxu1 %v7188_v6  ;;  %v7428_v5 = vor.u32 %v9824_v60, %v7425_v61  ;;  %v7812_v6 = vor.u32 %v9920_v62, %v7809_v63  ;;  %v6759_v60 = vld [vmem:[#allocation7 + $0x1a0] sm:$0xf]  ;;  %v9663_v61 = vld [vmem:[#allocation7 + $0x1cc] sm:$0xf0]  ;;  %v7624_v62 = vor.u32 %v9879_v55, %v7623_v54 }
 0x1d2   :  { %v9627_v39 = vld [vmem:[#allocation7 + $0xac] sm:$0xf0]  ;;  %v7431_v46 = vld [vmem:[#allocation7 + $0x6e0] sm:$0xf] }
 0x1d3   :  { %3123 = vmatpush.bf16.msrb.mxu2 %v7620_v11  ;;  %3137 = vmatpush.bf16.msrb.mxu3 %v8004_v12  ;;  %v7287_v11 = vld [vmem:[#allocation7 + $0x5c0] sm:$0xf]  ;;  %v9795_v12 = vld [vmem:[#allocation7 + $0x5ec] sm:$0xf0] }
 0x1d4   :  { %v9831_v47 = vld [vmem:[#allocation7 + $0x70c] sm:$0xf0]  ;;  %v6567_v54 = vld [vmem:[#allocation7 + $0x20] sm:$0xf] }
 0x1d5   :  { %3097 = vmatpush.bf16.msrb.mxu0 %v6756_v20  ;;  %3111 = vmatpush.bf16.msrb.mxu1 %v7140_v21  ;;  %v6904_v20 = vor.u32 %v9699_v10, %v6903_v9  ;;  %v7288_v21 = vor.u32 %v9795_v12, %v7287_v11  ;;  %v6711_v9 = vld [vmem:[#allocation7 + $0x140] sm:$0xf]  ;;  %v9651_v10 = vld [vmem:[#allocation7 + $0x16c] sm:$0xf0]  ;;  %v7576_v11 = vor.u32 %v9867_v3, %v7575_v2 }
 0x1d6   :  { %v9615_v55 = vld [vmem:[#allocation7 + $0x4c] sm:$0xf0]  ;;  %v7767_v2 = vld [vmem:[#allocation7 + $0x980] sm:$0xf] }
 0x1d7   :  { %3124 = vmatpush.bf16.msrb.mxu2 %v7572_v26  ;;  %3138 = vmatpush.bf16.msrb.mxu3 %v7956_v27  ;;  %v7239_v26 = vld [vmem:[#allocation7 + $0x560] sm:$0xf]  ;;  %v7380_v27 = vor.u32 %v9812_v13, %v7377_v14  ;;  %v9747_v14 = vld [vmem:[#allocation7 + $0x46c] sm:$0xf0] }
 0x1d8   :  { %v7095_v13 = vld [vmem:[#allocation7 + $0x440] sm:$0xf]  ;;  %v9915_v3 = vld [vmem:[#allocation7 + $0x9ac] sm:$0xf0] }
 0x1d9   :  { %3098 = vmatpush.bf16.msrb.mxu0 %v6708_v36  ;;  %3112 = vmatpush.bf16.msrb.mxu1 %v7092_v37  ;;  %v7671_v36 = vld [vmem:[#allocation7 + $0x8c0] sm:$0xf]  ;;  %v9891_v37 = vld [vmem:[#allocation7 + $0x8ec] sm:$0xf0] }
 0x1da   :  { %v7672_v50 = vor.u32 %v9891_v37, %v7671_v36 }
 0x1db   :  { %3125 = vmatpush.bf16.msrb.mxu2 %v7524_v40  ;;  %3139 = vmatpush.bf16.msrb.mxu3 %v7908_v41  ;;  %v6856_v40 = vor.u32 %v9687_v25, %v6855_v24  ;;  %v7240_v41 = vor.u32 %v9783_v29, %v7239_v26  ;;  %v6663_v24 = vld [vmem:[#allocation7 + $0xe0] sm:$0xf]  ;;  %v9639_v25 = vld [vmem:[#allocation7 + $0x10c] sm:$0xf0]  ;;  %v7528_v26 = vor.u32 %v9855_v18, %v7527_v15 }
 0x1dc   :  { %v9735_v29 = vld [vmem:[#allocation7 + $0x40c] sm:$0xf0]  ;;  %v6664_v36 = vor.u32 %v9639_v25, %v6663_v24  ;;  %v7335_v15 = vld [vmem:[#allocation7 + $0x620] sm:$0xf]  ;;  %v9981_v24 = vld [vmem:[#allocation7 + $0xbc4] sm:$0xf] }
 0x1dd   :  { %3099 = vmatpush.bf16.msrb.mxu0 %v6660_v52  ;;  %3113 = vmatpush.bf16.msrb.mxu1 %v7044_v53  ;;  %v7191_v52 = vld [vmem:[#allocation7 + $0x500] sm:$0xf]  ;;  %v9771_v53 = vld [vmem:[#allocation7 + $0x52c] sm:$0xf0]  ;;  %v8057_v25 = vld [vmem:[#allocation7 + $0xbf0] sm:$0xf0] }
 0x1de   :  { %v7192_v59 = vor.u32 %v9771_v53, %v7191_v52  ;;  %v6616_v52 = vor.u32 %v9627_v39, %v6615_v38  ;;  %v9807_v18 = vld [vmem:[#allocation7 + $0x64c] sm:$0xf0]  ;;  %v9873_v38 = vld [vmem:[#allocation7 + $0x864] sm:$0xf]  ;;  %v7625_v39 = vld [vmem:[#allocation7 + $0x890] sm:$0xf0] }
 0x1df   :  { %3126 = vmatpush.bf16.msrb.mxu2 %v7476_v56  ;;  %3140 = vmatpush.bf16.msrb.mxu3 %v7860_v57  ;;  %v8007_v56 = vld [vmem:[#allocation7 + $0xb60] sm:$0xf]  ;;  %v9975_v57 = vld [vmem:[#allocation7 + $0xb8c] sm:$0xf0] }
 0x1e0   :  { %v8008_v63 = vor.u32 %v9975_v57, %v8007_v56  ;;  %v6951_v56 = vld [vmem:[#allocation7 + $0x320] sm:$0xf]  ;;  %v7432_v57 = vor.u32 %v9831_v47, %v7431_v46  ;;  %v9657_v46 = vld [vmem:[#allocation7 + $0x1a4] sm:$0xf]  ;;  %v6761_v47 = vld [vmem:[#allocation7 + $0x1d0] sm:$0xf0] }
 0x1e1   :  { %3100 = vmatpush.bf16.msrb.mxu0 %v6612_v0  ;;  %3114 = vmatpush.bf16.msrb.mxu1 %v6996_v1  ;;  %v7143_v0 = vld [vmem:[#allocation7 + $0x4a0] sm:$0xf]  ;;  %v9759_v1 = vld [vmem:[#allocation7 + $0x4cc] sm:$0xf0] }
 0x1e2   :  { %v7144_v8 = vor.u32 %v9759_v1, %v7143_v0  ;;  %v7383_v0 = vld [vmem:[#allocation7 + $0x680] sm:$0xf]  ;;  %v9819_v1 = vld [vmem:[#allocation7 + $0x6ac] sm:$0xf0] }
 0x1e3   :  { %3127 = vmatpush.bf16.msrb.mxu2 %v7428_v5  ;;  %3141 = vmatpush.bf16.msrb.mxu3 %v7812_v6  ;;  %v9963_v5 = vld [vmem:[#allocation7 + $0xb2c] sm:$0xf0]  ;;  %v6760_v6 = vor.u32 %v9663_v61, %v6759_v60  ;;  %v9693_v60 = vld [vmem:[#allocation7 + $0x2c4] sm:$0xf]  ;;  %v6905_v61 = vld [vmem:[#allocation7 + $0x2f0] sm:$0xf0] }
 0x1e4   :  { %v7960_v12 = vor.u32 %v9963_v5, %v7959_v4  ;;  %v6568_v4 = vor.u32 %v9615_v55, %v6567_v54  ;;  %v9861_v54 = vld [vmem:[#allocation7 + $0x804] sm:$0xf]  ;;  %v7577_v55 = vld [vmem:[#allocation7 + $0x830] sm:$0xf0] }
 0x1e5   :  { %3101 = vmatpush.bf16.msrb.mxu0 %v6564_v17  ;;  %3115 = vmatpush.bf16.msrb.mxu1 %v6948_v19  ;;  %v7911_v17 = vld [vmem:[#allocation7 + $0xaa0] sm:$0xf]  ;;  %v9951_v19 = vld [vmem:[#allocation7 + $0xacc] sm:$0xf0] }
 0x1e7   :  { %3128 = vmatpush.bf16.msrb.mxu2 %v7380_v27  ;;  %3142 = vmatpush.bf16.msrb.mxu3 %v7764_v28  ;;  %v7912_v27 = vor.u32 %v9951_v19, %v7911_v17  ;;  %v7047_v28 = vld [vmem:[#allocation7 + $0x3e0] sm:$0xf]  ;;  %v9903_v19 = vld [vmem:[#allocation7 + $0x94c] sm:$0xf0] }
 0x1e8   :  { %3102 = vmatmul.bf16.vlgmr.msrb.gmra.mxu0 %v10716_v22  ;;  %3116 = vmatmul.bf16.vlgmr.msrb.gmra.mxu1 %v10718_v23  ;;  %v7048_v37 = vor.u32 %v9735_v29, %v7047_v28  ;;  %v7719_v17 = vld [vmem:[#allocation7 + $0x920] sm:$0xf]  ;;  %v7336_v28 = vor.u32 %v9807_v18, %v7335_v15  ;;  %v9837_v15 = vld [vmem:[#allocation7 + $0x744] sm:$0xf]  ;;  %v7481_v18 = vld [vmem:[#allocation7 + $0x770] sm:$0xf0] }
 0x1e9   :  { %3150 = vmatpush.bf16.msra.mxu0 %v6904_v20  ;;  %3164 = vmatpush.bf16.msra.mxu1 %v7288_v21  ;;  %v6712_v20 = vor.u32 %v9651_v10, %v6711_v9  ;;  %v7096_v21 = vor.u32 %v9747_v14, %v7095_v13  ;;  %v9681_v9 = vld [vmem:[#allocation7 + $0x264] sm:$0xf]  ;;  %v6857_v10 = vld [vmem:[#allocation7 + $0x290] sm:$0xf0]  ;;  %v7768_v13 = vor.u32 %v9915_v3, %v7767_v2 }
 0x1ea   :  { %v7241_v14 = vld [vmem:[#allocation7 + $0x590] sm:$0xf0]  ;;  %v7720_v29 = vor.u32 %v9903_v19, %v7719_v17  ;;  %v9849_v2 = vld [vmem:[#allocation7 + $0x7a4] sm:$0xf] }
 0x1eb   :  { %3129 = vmatpush.bf16.msrb.mxu2 %v7332_v44  ;;  %3143 = vmatpush.bf16.msrb.mxu3 %v7716_v45  ;;  %v6999_v44 = vld [vmem:[#allocation7 + $0x380] sm:$0xf]  ;;  %v9723_v45 = vld [vmem:[#allocation7 + $0x3ac] sm:$0xf0]  ;;  %v7529_v3 = vld [vmem:[#allocation7 + $0x7d0] sm:$0xf0] }
 0x1ec   :  { %v7000_v53 = vor.u32 %v9723_v45, %v6999_v44  ;;  %v9933_v17 = vld [vmem:[#allocation7 + $0xa44] sm:$0xf]  ;;  %v7865_v19 = vld [vmem:[#allocation7 + $0xa70] sm:$0xf0] }
 0x1ed   :  { %3151 = vmatpush.bf16.msra.mxu0 %v6856_v40  ;;  %3165 = vmatpush.bf16.msra.mxu1 %v7240_v41  ;;  %v7480_v40 = vor.u32 %v9843_v33, %v7479_v30  ;;  %v7864_v41 = vor.u32 %v9939_v35, %v7863_v34  ;;  %v9669_v30 = vld [vmem:[#allocation7 + $0x204] sm:$0xf]  ;;  %v6809_v33 = vld [vmem:[#allocation7 + $0x230] sm:$0xf0]  ;;  %v8060_v35 = vor.u32 %v9981_v24, %v8057_v25 }
 0x1ee   :  { %3130 = vmatmul.bf16.vlgmr.msrb.gmra.mxu2 %v10722_v48  ;;  %3144 = vmatmul.bf16.vlgmr.msrb.gmra.mxu3 %v10724_v49  ;;  %v6812_v44 = vor.u32 %v9669_v30, %v6809_v33  ;;  %v9621_v24 = vld [vmem:[#allocation7 + $0x84] sm:$0xf]  ;;  %v6617_v25 = vld [vmem:[#allocation7 + $0xb0] sm:$0xf0] }
 0x1ef   :  { %3178 = vmatpush.bf16.msra.mxu2 %v7672_v50  ;;  %3192 = vmatpush.bf16.msra.mxu3 %v8056_v51  ;;  %v7815_v50 = vld [vmem:[#allocation7 + $0x9e0] sm:$0xf]  ;;  %v9927_v51 = vld [vmem:[#allocation7 + $0xa0c] sm:$0xf0]  ;;  %v9825_v30 = vld [vmem:[#allocation7 + $0x6e4] sm:$0xf] }
 0x1f0   :  { %v7433_v33 = vld [vmem:[#allocation7 + $0x710] sm:$0xf0] }
 0x1f1   :  { %3152 = vmatpush.bf16.msra.mxu0 %v6808_v58  ;;  %3166 = vmatpush.bf16.msra.mxu1 %v7192_v59  ;;  %v7816_v58 = vor.u32 %v9927_v51, %v7815_v50  ;;  %v9711_v59 = vld [vmem:[#allocation7 + $0x34c] sm:$0xf0]  ;;  %v7628_v50 = vor.u32 %v9873_v38, %v7625_v39  ;;  %v9609_v38 = vld [vmem:[#allocation7 + $0x24] sm:$0xf]  ;;  %v6569_v39 = vld [vmem:[#allocation7 + $0x50] sm:$0xf0] }
 0x1f2   :  { %v6952_v5 = vor.u32 %v9711_v59, %v6951_v56  ;;  %v9957_v56 = vld [vmem:[#allocation7 + $0xb04] sm:$0xf] }
 0x1f3   :  { %3179 = vmatpush.bf16.msra.mxu2 %v7624_v62  ;;  %3193 = vmatpush.bf16.msra.mxu3 %v8008_v63  ;;  %v9789_v62 = vld [vmem:[#allocation7 + $0x5c4] sm:$0xf]  ;;  %v7289_v63 = vld [vmem:[#allocation7 + $0x5f0] sm:$0xf0] }
 0x1f5   :  { %3153 = vmatpush.bf16.msra.mxu0 %v6760_v6  ;;  %3167 = vmatpush.bf16.msra.mxu1 %v7144_v8  ;;  %v6908_v6 = vor.u32 %v9693_v60, %v6905_v61  ;;  %v7292_v8 = vor.u32 %v9789_v62, %v7289_v63  ;;  %v9645_v60 = vld [vmem:[#allocation7 + $0x144] sm:$0xf]  ;;  %v6713_v61 = vld [vmem:[#allocation7 + $0x170] sm:$0xf0]  ;;  %v7580_v62 = vor.u32 %v9861_v54, %v7577_v55 }
 0x1f6   :  { %v9909_v54 = vld [vmem:[#allocation7 + $0x984] sm:$0xf]  ;;  %v7769_v55 = vld [vmem:[#allocation7 + $0x9b0] sm:$0xf0] }
 0x1f7   :  { %3180 = vmatpush.bf16.msra.mxu2 %v7576_v11  ;;  %3194 = vmatpush.bf16.msra.mxu3 %v7960_v12  ;;  %v9777_v11 = vld [vmem:[#allocation7 + $0x564] sm:$0xf]  ;;  %v7384_v12 = vor.u32 %v9819_v1, %v7383_v0  ;;  %v7097_v1 = vld [vmem:[#allocation7 + $0x470] sm:$0xf0] }
 0x1f8   :  { %v9741_v0 = vld [vmem:[#allocation7 + $0x444] sm:$0xf] }
 0x1f9   :  { %3154 = vmatpush.bf16.msra.mxu0 %v6712_v20  ;;  %3168 = vmatpush.bf16.msra.mxu1 %v7096_v21  ;;  %v9885_v20 = vld [vmem:[#allocation7 + $0x8c4] sm:$0xf]  ;;  %v7673_v21 = vld [vmem:[#allocation7 + $0x8f0] sm:$0xf0] }
 0x1fa   :  { %v7676_v34 = vor.u32 %v9885_v20, %v7673_v21 }
 0x1fb   :  { %3181 = vmatpush.bf16.msra.mxu2 %v7528_v26  ;;  %3195 = vmatpush.bf16.msra.mxu3 %v7912_v27  ;;  %v6860_v26 = vor.u32 %v9681_v9, %v6857_v10  ;;  %v7244_v27 = vor.u32 %v9777_v11, %v7241_v14  ;;  %v9633_v9 = vld [vmem:[#allocation7 + $0xe4] sm:$0xf]  ;;  %v6665_v10 = vld [vmem:[#allocation7 + $0x110] sm:$0xf0]  ;;  %v7532_v11 = vor.u32 %v9849_v2, %v7529_v3  ;;  %v9784_v3 = vld [vmem:[#allocation7 + $0x594] sm:$0xf0] }
 0x1fc   :  { %v7049_v14 = vld [vmem:[#allocation7 + $0x410] sm:$0xf0]  ;;  %v6668_v20 = vor.u32 %v9633_v9, %v6665_v10  ;;  %v7772_v2 = vor.u32 %v9909_v54, %v7769_v55  ;;  %v7679_v9 = vld [vmem:[#allocation7 + $0x8c8] sm:$0xf]  ;;  %v9892_v10 = vld [vmem:[#allocation7 + $0x8f4] sm:$0xf0] }
 0x1fd   :  { %3155 = vmatpush.bf16.msra.mxu0 %v6664_v36  ;;  %3169 = vmatpush.bf16.msra.mxu1 %v7048_v37  ;;  %v9765_v36 = vld [vmem:[#allocation7 + $0x504] sm:$0xf]  ;;  %v7193_v37 = vld [vmem:[#allocation7 + $0x530] sm:$0xf0]  ;;  %v6719_v54 = vld [vmem:[#allocation7 + $0x148] sm:$0xf] }
 0x1fe   :  { %v7196_v45 = vor.u32 %v9765_v36, %v7193_v37  ;;  %v6620_v36 = vor.u32 %v9621_v24, %v6617_v25  ;;  %v7199_v25 = vld [vmem:[#allocation7 + $0x508] sm:$0xf]  ;;  %v9652_v55 = vld [vmem:[#allocation7 + $0x174] sm:$0xf0] }
 0x1ff   :  { %3182 = vmatpush.bf16.msra.mxu2 %v7480_v40  ;;  %3196 = vmatpush.bf16.msra.mxu3 %v7864_v41  ;;  %v9969_v40 = vld [vmem:[#allocation7 + $0xb64] sm:$0xf]  ;;  %v8009_v41 = vld [vmem:[#allocation7 + $0xb90] sm:$0xf0] }
 0x200   :  { %v8012_v51 = vor.u32 %v9969_v40, %v8009_v41  ;;  %v9705_v40 = vld [vmem:[#allocation7 + $0x324] sm:$0xf]  ;;  %v7436_v41 = vor.u32 %v9825_v30, %v7433_v33  ;;  %v8015_v30 = vld [vmem:[#allocation7 + $0xb68] sm:$0xf]  ;;  %v9976_v33 = vld [vmem:[#allocation7 + $0xb94] sm:$0xf0] }
 0x201   :  { %3156 = vmatpush.bf16.msra.mxu0 %v6616_v52  ;;  %3170 = vmatpush.bf16.msra.mxu1 %v7000_v53  ;;  %v9753_v52 = vld [vmem:[#allocation7 + $0x4a4] sm:$0xf]  ;;  %v7145_v53 = vld [vmem:[#allocation7 + $0x4d0] sm:$0xf0] }
 0x202   :  { %v7148_v59 = vor.u32 %v9753_v52, %v7145_v53  ;;  %v9813_v52 = vld [vmem:[#allocation7 + $0x684] sm:$0xf]  ;;  %v7385_v53 = vld [vmem:[#allocation7 + $0x6b0] sm:$0xf0] }
 0x203   :  { %3183 = vmatpush.bf16.msra.mxu2 %v7432_v57  ;;  %3197 = vmatpush.bf16.msra.mxu3 %v7816_v58  ;;  %v7961_v57 = vld [vmem:[#allocation7 + $0xb30] sm:$0xf0]  ;;  %v6764_v58 = vor.u32 %v9657_v46, %v6761_v47  ;;  %v6911_v46 = vld [vmem:[#allocation7 + $0x2c8] sm:$0xf]  ;;  %v9700_v47 = vld [vmem:[#allocation7 + $0x2f4] sm:$0xf0] }
 0x204   :  { %v7964_v63 = vor.u32 %v9957_v56, %v7961_v57  ;;  %v6572_v56 = vor.u32 %v9609_v38, %v6569_v39  ;;  %v8016_v39 = vor.u32 %v9976_v33, %v8015_v30  ;;  %v7007_v30 = vld [vmem:[#allocation7 + $0x388] sm:$0xf]  ;;  %v9724_v33 = vld [vmem:[#allocation7 + $0x3b4] sm:$0xf0] }
 0x205   :  { %3157 = vmatpush.bf16.msra.mxu0 %v6568_v4  ;;  %3171 = vmatpush.bf16.msra.mxu1 %v6952_v5  ;;  %v9945_v4 = vld [vmem:[#allocation7 + $0xaa4] sm:$0xf]  ;;  %v7913_v5 = vld [vmem:[#allocation7 + $0xad0] sm:$0xf0] }
 0x207   :  { %3184 = vmatpush.bf16.msra.mxu2 %v7384_v12  ;;  %3198 = vmatpush.bf16.msra.mxu3 %v7768_v13  ;;  %v7916_v12 = vor.u32 %v9945_v4, %v7913_v5  ;;  %v9729_v13 = vld [vmem:[#allocation7 + $0x3e4] sm:$0xf]  ;;  %v7337_v5 = vld [vmem:[#allocation7 + $0x650] sm:$0xf0] }
 0x208   :  { %3158 = vmatmul.bf16.vlgmr.msra.gmra.mxu0 %v10716_v22  ;;  %3172 = vmatmul.bf16.vlgmr.msra.gmra.mxu1 %v10718_v23  ;;  %v7052_v21 = vor.u32 %v9729_v13, %v7049_v14  ;;  %v9801_v4 = vld [vmem:[#allocation7 + $0x624] sm:$0xf] }
 0x209   :  { %3206 = vmatpush.bf16.msrb.mxu0 %v6908_v6  ;;  %3220 = vmatpush.bf16.msrb.mxu1 %v7292_v8  ;;  %v6716_v6 = vor.u32 %v9645_v60, %v6713_v61  ;;  %v7100_v8 = vor.u32 %v9741_v0, %v7097_v1  ;;  %v6863_v60 = vld [vmem:[#allocation7 + $0x268] sm:$0xf]  ;;  %v9688_v61 = vld [vmem:[#allocation7 + $0x294] sm:$0xf0]  ;;  %v10774_v0 = vpop.f32.mrf.mxu1  ;;  %v7388_v1 = vor.u32 %v9813_v52, %v7385_v53 }
 0x20a   :  { %v6864_v13 = vor.u32 %v9688_v61, %v6863_v60  ;;  %v7535_v60 = vld [vmem:[#allocation7 + $0x7a8] sm:$0xf] }
 0x20b   :  { %3185 = vmatpush.bf16.msra.mxu2 %v7336_v28  ;;  %3199 = vmatpush.bf16.msra.mxu3 %v7720_v29  ;;  %v9717_v28 = vld [vmem:[#allocation7 + $0x384] sm:$0xf]  ;;  %v7001_v29 = vld [vmem:[#allocation7 + $0x3b0] sm:$0xf0] }
 0x20c   :  { %v7004_v37 = vor.u32 %v9717_v28, %v7001_v29  ;;  %v10780_v28 = vpop.f32.mrf.mxu3  ;;  %v9880_v29 = vld [vmem:[#allocation7 + $0x894] sm:$0xf0] }
 0x20d   :  { %3207 = vmatpush.bf16.msrb.mxu0 %v6860_v26  ;;  %3221 = vmatpush.bf16.msrb.mxu1 %v7244_v27  ;;  %v7484_v26 = vor.u32 %v9837_v15, %v7481_v18  ;;  %v7868_v27 = vor.u32 %v9933_v17, %v7865_v19  ;;  %v10776_v15 = vpop.f32.mrf.mxu2  ;;  %v7340_v18 = vor.u32 %v9801_v4, %v7337_v5  ;;  %v6815_v19 = vld [vmem:[#allocation7 + $0x208] sm:$0xf] }
 0x20e   :  { %3186 = vmatmul.bf16.vlgmr.msra.gmra.mxu2 %v10722_v48  ;;  %3200 = vmatmul.bf16.vlgmr.msra.gmra.mxu3 %v10724_v49  ;;  %v6720_v4 = vor.u32 %v9652_v55, %v6719_v54  ;;  %v6913_v54 = vld [vmem:[#allocation7 + $0x2f8] sm:$0xf0] }
 0x20f   :  { %3234 = vmatpush.bf16.msrb.mxu2 %v7676_v34  ;;  %3248 = vmatpush.bf16.msrb.mxu3 %v8060_v35  ;;  %v9921_v34 = vld [vmem:[#allocation7 + $0x9e4] sm:$0xf]  ;;  %v7817_v35 = vld [vmem:[#allocation7 + $0xa10] sm:$0xf0] }
 0x211   :  { %3208 = vmatpush.bf16.msrb.mxu0 %v6812_v44  ;;  %3222 = vmatpush.bf16.msrb.mxu1 %v7196_v45  ;;  %v7820_v44 = vor.u32 %v9921_v34, %v7817_v35  ;;  %v6953_v45 = vld [vmem:[#allocation7 + $0x350] sm:$0xf0] }
 0x212   :  { %v6956_v57 = vor.u32 %v9705_v40, %v6953_v45  ;;  %v7151_v40 = vld [vmem:[#allocation7 + $0x4a8] sm:$0xf] }
 0x213   :  { %3235 = vmatpush.bf16.msrb.mxu2 %v7628_v50  ;;  %3249 = vmatpush.bf16.msrb.mxu3 %v8012_v51  ;;  %v7295_v50 = vld [vmem:[#allocation7 + $0x5c8] sm:$0xf]  ;;  %v9796_v51 = vld [vmem:[#allocation7 + $0x5f4] sm:$0xf0] }
 0x215   :  { %3209 = vmatpush.bf16.msrb.mxu0 %v6764_v58  ;;  %3223 = vmatpush.bf16.msrb.mxu1 %v7148_v59  ;;  %v6912_v58 = vor.u32 %v9700_v47, %v6911_v46  ;;  %v7296_v59 = vor.u32 %v9796_v51, %v7295_v50  ;;  %v10784_v46 = vpop.f32.mrf.mxu1  ;;  %v9868_v47 = vld [vmem:[#allocation7 + $0x834] sm:$0xf0]  ;;  %v7967_v50 = vld [vmem:[#allocation7 + $0xb08] sm:$0xf]  ;;  %v10788_v61 = vpop.f32.mrf.mxu2 }
 0x216   :  { %v9964_v51 = vld [vmem:[#allocation7 + $0xb34] sm:$0xf0] }
 0x217   :  { %3236 = vmatpush.bf16.msrb.mxu2 %v7580_v62  ;;  %3250 = vmatpush.bf16.msrb.mxu3 %v7964_v63  ;;  %v7247_v62 = vld [vmem:[#allocation7 + $0x568] sm:$0xf]  ;;  %v10772_v63 = vpop.f32.mrf.mxu0 }
 0x218   :  { %v7248_v14 = vor.u32 %v9784_v3, %v7247_v62  ;;  %v9856_v62 = vld [vmem:[#allocation7 + $0x7d4] sm:$0xf0]  ;;  %v10790_v3 = vpop.f32.mrf.mxu3 }
 0x219   :  { %3210 = vmatpush.bf16.msrb.mxu0 %v6716_v6  ;;  %3224 = vmatpush.bf16.msrb.mxu1 %v7100_v8  ;;  %v9897_v6 = vld [vmem:[#allocation7 + $0x924] sm:$0xf]  ;;  %v7721_v8 = vld [vmem:[#allocation7 + $0x950] sm:$0xf0] }
 0x21a   :  { %v7724_v17 = vor.u32 %v9897_v6, %v7721_v8  ;;  %v6671_v6 = vld [vmem:[#allocation7 + $0xe8] sm:$0xf]  ;;  %v9640_v8 = vld [vmem:[#allocation7 + $0x114] sm:$0xf0] }
 0x21b   :  { %3237 = vmatpush.bf16.msrb.mxu2 %v7532_v11  ;;  %3251 = vmatpush.bf16.msrb.mxu3 %v7916_v12  ;;  %v8063_v11 = vld [vmem:[#allocation7 + $0xbc8] sm:$0xf]  ;;  %v9988_v12 = vld [vmem:[#allocation7 + $0xbf4] sm:$0xf0] }
 0x21c   :  { %v8064_v24 = vor.u32 %v9988_v12, %v8063_v11  ;;  %v7055_v11 = vld [vmem:[#allocation7 + $0x3e8] sm:$0xf]  ;;  %v9736_v12 = vld [vmem:[#allocation7 + $0x414] sm:$0xf0] }
 0x21d   :  { %3211 = vmatpush.bf16.msrb.mxu0 %v6668_v20  ;;  %3225 = vmatpush.bf16.msrb.mxu1 %v7052_v21  ;;  %v9676_v20 = vld [vmem:[#allocation7 + $0x234] sm:$0xf0]  ;;  %v7680_v21 = vor.u32 %v9892_v10, %v7679_v9  ;;  %v7536_v9 = vor.u32 %v9856_v62, %v7535_v60  ;;  %v7775_v60 = vld [vmem:[#allocation7 + $0x988] sm:$0xf] }
 0x21e   :  { %v6816_v34 = vor.u32 %v9676_v20, %v6815_v19  ;;  %v10794_v20 = vpop.f32.mrf.mxu1  ;;  %v9916_v62 = vld [vmem:[#allocation7 + $0x9b4] sm:$0xf0] }
 0x21f   :  { %3238 = vmatpush.bf16.msrb.mxu2 %v7484_v26  ;;  %3252 = vmatpush.bf16.msrb.mxu3 %v7868_v27  ;;  %v9772_v26 = vld [vmem:[#allocation7 + $0x534] sm:$0xf0]  ;;  %v7631_v27 = vld [vmem:[#allocation7 + $0x868] sm:$0xf]  ;;  %v10782_v45 = vpop.f32.mrf.mxu0 }
 0x220   :  { %v7200_v35 = vor.u32 %v9772_v26, %v7199_v25  ;;  %v7632_v38 = vor.u32 %v9880_v29, %v7631_v27  ;;  %v6623_v25 = vld [vmem:[#allocation7 + $0x88] sm:$0xf]  ;;  %v9628_v26 = vld [vmem:[#allocation7 + $0xb4] sm:$0xf0]  ;;  %v10798_v55 = vpop.f32.mrf.mxu3 }
 0x221   :  { %3212 = vmatpush.bf16.msrb.mxu0 %v6620_v36  ;;  %3226 = vmatpush.bf16.msrb.mxu1 %v7004_v37  ;;  %v6767_v36 = vld [vmem:[#allocation7 + $0x1a8] sm:$0xf]  ;;  %v9664_v37 = vld [vmem:[#allocation7 + $0x1d4] sm:$0xf0] }
 0x222   :  { %v6768_v52 = vor.u32 %v9664_v37, %v6767_v36  ;;  %v7823_v36 = vld [vmem:[#allocation7 + $0x9e8] sm:$0xf]  ;;  %v9928_v37 = vld [vmem:[#allocation7 + $0xa14] sm:$0xf0] }
 0x223   :  { %3239 = vmatpush.bf16.msrb.mxu2 %v7436_v41  ;;  %3253 = vmatpush.bf16.msrb.mxu3 %v7820_v44  ;;  %v9760_v41 = vld [vmem:[#allocation7 + $0x4d4] sm:$0xf0]  ;;  %v7583_v44 = vld [vmem:[#allocation7 + $0x808] sm:$0xf] }
 0x224   :  { %v7152_v53 = vor.u32 %v9760_v41, %v7151_v40  ;;  %v7008_v40 = vor.u32 %v9724_v33, %v7007_v30  ;;  %v6575_v41 = vld [vmem:[#allocation7 + $0x28] sm:$0xf]  ;;  %v8065_v30 = vld [vmem:[#allocation7 + $0xbf8] sm:$0xf0] }
 0x225   :  { %3213 = vmatpush.bf16.msrb.mxu0 %v6572_v56  ;;  %3227 = vmatpush.bf16.msrb.mxu1 %v6956_v57  ;;  %v7584_v56 = vor.u32 %v9868_v47, %v7583_v44  ;;  %v7968_v57 = vor.u32 %v9964_v51, %v7967_v50  ;;  %v9616_v44 = vld [vmem:[#allocation7 + $0x54] sm:$0xf0]  ;;  %v6959_v47 = vld [vmem:[#allocation7 + $0x328] sm:$0xf]  ;;  %v7824_v51 = vor.u32 %v9928_v37, %v7823_v36 }
 0x227   :  { %3240 = vmatpush.bf16.msrb.mxu2 %v7388_v1  ;;  %3254 = vmatpush.bf16.msrb.mxu3 %v7772_v2  ;;  %v7919_v1 = vld [vmem:[#allocation7 + $0xaa8] sm:$0xf]  ;;  %v9952_v2 = vld [vmem:[#allocation7 + $0xad4] sm:$0xf0]  ;;  %v10792_v19 = vpop.f32.mrf.mxu0 }
 0x228   :  { %3214 = vmatmul.bf16.vlgmr.msrb.gmra.mxu0 %v10716_v22  ;;  %3228 = vmatmul.bf16.vlgmr.msrb.gmra.mxu1 %v10718_v23  ;;  %v7920_v10 = vor.u32 %v9952_v2, %v7919_v1  ;;  %v10802_v2 = vpop.f32.mrf.mxu1 }
 0x229   :  { %3262 = vmatpush.bf16.msra.mxu0 %v6912_v58  ;;  %3276 = vmatpush.bf16.msra.mxu1 %v7296_v59  ;;  %v7103_v58 = vld [vmem:[#allocation7 + $0x448] sm:$0xf]  ;;  %v9748_v59 = vld [vmem:[#allocation7 + $0x474] sm:$0xf0] }
 0x22a   :  { %v7104_v5 = vor.u32 %v9748_v59, %v7103_v58  ;;  %v7391_v58 = vld [vmem:[#allocation7 + $0x688] sm:$0xf]  ;;  %v9820_v59 = vld [vmem:[#allocation7 + $0x6b4] sm:$0xf0] }
 0x22b   :  { %3241 = vmatpush.bf16.msrb.mxu2 %v7340_v18  ;;  %3255 = vmatpush.bf16.msrb.mxu3 %v7724_v17  ;;  %v7871_v18 = vld [vmem:[#allocation7 + $0xa48] sm:$0xf]  ;;  %v9940_v17 = vld [vmem:[#allocation7 + $0xa74] sm:$0xf0] }
 0x22c   :  { %v7872_v29 = vor.u32 %v9940_v17, %v7871_v18  ;;  %v7343_v18 = vld [vmem:[#allocation7 + $0x628] sm:$0xf]  ;;  %v9808_v17 = vld [vmem:[#allocation7 + $0x654] sm:$0xf0] }
 0x22d   :  { %3263 = vmatpush.bf16.msra.mxu0 %v6864_v13  ;;  %3277 = vmatpush.bf16.msra.mxu1 %v7248_v14  ;;  %v7487_v13 = vld [vmem:[#allocation7 + $0x748] sm:$0xf]  ;;  %v9844_v14 = vld [vmem:[#allocation7 + $0x774] sm:$0xf0]  ;;  %v7344_v36 = vor.u32 %v9808_v17, %v7343_v18  ;;  %v9646_v17 = vld [vmem:[#allocation7 + $0x14c] sm:$0xf] }
 0x22e   :  { %3242 = vmatmul.bf16.vlgmr.msrb.gmra.mxu2 %v10722_v48  ;;  %3256 = vmatmul.bf16.vlgmr.msrb.gmra.mxu3 %v10724_v49  ;;  %v7488_v27 = vor.u32 %v9844_v14, %v7487_v13  ;;  %v7776_v13 = vor.u32 %v9916_v62, %v7775_v60  ;;  %v7249_v14 = vld [vmem:[#allocation7 + $0x598] sm:$0xf0]  ;;  %v9658_v60 = vld [vmem:[#allocation7 + $0x1ac] sm:$0xf] }
 0x22f   :  { %3290 = vmatpush.bf16.msra.mxu2 %v7680_v21  ;;  %3304 = vmatpush.bf16.msra.mxu3 %v8064_v24  ;;  %v6672_v21 = vor.u32 %v9640_v8, %v6671_v6  ;;  %v7056_v24 = vor.u32 %v9736_v12, %v7055_v11  ;;  %v10800_v1 = vpop.f32.mrf.mxu0  ;;  %v9778_v11 = vld [vmem:[#allocation7 + $0x56c] sm:$0xf]  ;;  %v7392_v12 = vor.u32 %v9820_v59, %v7391_v58  ;;  %v6769_v62 = vld [vmem:[#allocation7 + $0x1d8] sm:$0xf0] }
 0x231   :  { %3264 = vmatpush.bf16.msra.mxu0 %v6816_v34  ;;  %3278 = vmatpush.bf16.msra.mxu1 %v7200_v35  ;;  %v7439_v34 = vld [vmem:[#allocation7 + $0x6e8] sm:$0xf]  ;;  %v9832_v35 = vld [vmem:[#allocation7 + $0x714] sm:$0xf0] }
 0x232   :  { %v7440_v50 = vor.u32 %v9832_v35, %v7439_v34  ;;  %v7252_v34 = vor.u32 %v9778_v11, %v7249_v14  ;;  %v10806_v35 = vpop.f32.mrf.mxu3  ;;  %v9958_v11 = vld [vmem:[#allocation7 + $0xb0c] sm:$0xf]  ;;  %v6772_v14 = vor.u32 %v9658_v60, %v6769_v62  ;;  %v7873_v62 = vld [vmem:[#allocation7 + $0xa78] sm:$0xf0] }
 0x233   :  { %3291 = vmatpush.bf16.msra.mxu2 %v7632_v38  ;;  %3305 = vmatpush.bf16.msra.mxu3 %v8016_v39  ;;  %v10796_v38 = vpop.f32.mrf.mxu2  ;;  %v6624_v39 = vor.u32 %v9628_v26, %v6623_v25  ;;  %v9886_v25 = vld [vmem:[#allocation7 + $0x8cc] sm:$0xf] }
 0x234   :  { %v9934_v60 = vld [vmem:[#allocation7 + $0xa4c] sm:$0xf] }
 0x235   :  { %3265 = vmatpush.bf16.msra.mxu0 %v6768_v52  ;;  %3279 = vmatpush.bf16.msra.mxu1 %v7152_v53  ;;  %v9712_v52 = vld [vmem:[#allocation7 + $0x354] sm:$0xf0]  ;;  %v9694_v53 = vld [vmem:[#allocation7 + $0x2cc] sm:$0xf] }
 0x236   :  { %v6916_v6 = vor.u32 %v9694_v53, %v6913_v54  ;;  %v9970_v53 = vld [vmem:[#allocation7 + $0xb6c] sm:$0xf]  ;;  %v8017_v54 = vld [vmem:[#allocation7 + $0xb98] sm:$0xf0] }
 0x237   :  { %3292 = vmatpush.bf16.msra.mxu2 %v7584_v56  ;;  %3306 = vmatpush.bf16.msra.mxu3 %v7968_v57  ;;  %v9790_v56 = vld [vmem:[#allocation7 + $0x5cc] sm:$0xf]  ;;  %v7297_v57 = vld [vmem:[#allocation7 + $0x5f8] sm:$0xf0] }
 0x238   :  { %v7300_v8 = vor.u32 %v9790_v56, %v7297_v57  ;;  %v10810_v56 = vpop.f32.mrf.mxu0  ;;  %v10812_v57 = vpop.f32.mrf.mxu1 }
 0x239   :  { %3266 = vmatpush.bf16.msra.mxu0 %v6720_v4  ;;  %3280 = vmatpush.bf16.msra.mxu1 %v7104_v5  ;;  %v6576_v4 = vor.u32 %v9616_v44, %v6575_v41  ;;  %v6960_v5 = vor.u32 %v9712_v52, %v6959_v47  ;;  %v9766_v47 = vld [vmem:[#allocation7 + $0x50c] sm:$0xf]  ;;  %v7633_v52 = vld [vmem:[#allocation7 + $0x898] sm:$0xf0] }
 0x23b   :  { %3293 = vmatpush.bf16.msra.mxu2 %v7536_v9  ;;  %3307 = vmatpush.bf16.msra.mxu3 %v7920_v10  ;;  %v9682_v9 = vld [vmem:[#allocation7 + $0x26c] sm:$0xf]  ;;  %v6865_v10 = vld [vmem:[#allocation7 + $0x298] sm:$0xf0]  ;;  %v10804_v26 = vpop.f32.mrf.mxu2 }
 0x23c   :  { %v6868_v33 = vor.u32 %v9682_v9, %v6865_v10  ;;  %v9862_v9 = vld [vmem:[#allocation7 + $0x80c] sm:$0xf]  ;;  %v7585_v10 = vld [vmem:[#allocation7 + $0x838] sm:$0xf0] }
 0x23d   :  { %3267 = vmatpush.bf16.msra.mxu0 %v6672_v21  ;;  %3281 = vmatpush.bf16.msra.mxu1 %v7056_v24  ;;  %v7727_v21 = vld [vmem:[#allocation7 + $0x928] sm:$0xf]  ;;  %v9904_v24 = vld [vmem:[#allocation7 + $0x954] sm:$0xf0] }
 0x23e   :  { %v7728_v37 = vor.u32 %v9904_v24, %v7727_v21  ;;  %v6721_v21 = vld [vmem:[#allocation7 + $0x178] sm:$0xf0]  ;;  %v7588_v24 = vor.u32 %v9862_v9, %v7585_v10 }
 0x23f   :  { %3294 = vmatpush.bf16.msra.mxu2 %v7488_v27  ;;  %3308 = vmatpush.bf16.msra.mxu3 %v7872_v29  ;;  %v7681_v27 = vld [vmem:[#allocation7 + $0x8f8] sm:$0xf0]  ;;  %v9982_v29 = vld [vmem:[#allocation7 + $0xbcc] sm:$0xf] }
 0x240   :  { %v7684_v41 = vor.u32 %v9886_v25, %v7681_v27  ;;  %v8068_v44 = vor.u32 %v9982_v29, %v8065_v30  ;;  %v9742_v27 = vld [vmem:[#allocation7 + $0x44c] sm:$0xf]  ;;  %v7105_v29 = vld [vmem:[#allocation7 + $0x478] sm:$0xf0] }
 0x241   :  { %3268 = vmatpush.bf16.msra.mxu0 %v6624_v39  ;;  %3282 = vmatpush.bf16.msra.mxu1 %v7008_v40  ;;  %v9670_v39 = vld [vmem:[#allocation7 + $0x20c] sm:$0xf]  ;;  %v6817_v40 = vld [vmem:[#allocation7 + $0x238] sm:$0xf0] }
 0x242   :  { %v6820_v58 = vor.u32 %v9670_v39, %v6817_v40  ;;  %v9850_v30 = vld [vmem:[#allocation7 + $0x7ac] sm:$0xf]  ;;  %v10820_v39 = vpop.f32.mrf.mxu0  ;;  %v10822_v40 = vpop.f32.mrf.mxu1  ;;  %v6625_v9 = vld [vmem:[#allocation7 + $0xb8] sm:$0xf0] }
 0x243   :  { %3295 = vmatpush.bf16.msra.mxu2 %v7440_v50  ;;  %3309 = vmatpush.bf16.msra.mxu3 %v7824_v51  ;;  %v7201_v50 = vld [vmem:[#allocation7 + $0x538] sm:$0xf0]  ;;  %v9874_v51 = vld [vmem:[#allocation7 + $0x86c] sm:$0xf]  ;;  %11177 = vst [vmem:[#allocation16_spill] sm:$0xff] %v10822_v40 }
 0x244   :  { %v7204_v59 = vor.u32 %v9766_v47, %v7201_v50  ;;  %v9634_v47 = vld [vmem:[#allocation7 + $0xec] sm:$0xf]  ;;  %v6673_v50 = vld [vmem:[#allocation7 + $0x118] sm:$0xf0] }
 0x245   :  { %3269 = vmatpush.bf16.msra.mxu0 %v6576_v4  ;;  %3283 = vmatpush.bf16.msra.mxu1 %v6960_v5  ;;  %v7636_v4 = vor.u32 %v9874_v51, %v7633_v52  ;;  %v8020_v5 = vor.u32 %v9970_v53, %v8017_v54  ;;  %v9730_v53 = vld [vmem:[#allocation7 + $0x3ec] sm:$0xf]  ;;  %v7057_v54 = vld [vmem:[#allocation7 + $0x418] sm:$0xf0] }
 0x246   :  { %v7729_v40 = vld [vmem:[#allocation7 + $0x958] sm:$0xf0] }
 0x247   :  { %3296 = vmatpush.bf16.msra.mxu2 %v7392_v12  ;;  %3310 = vmatpush.bf16.msra.mxu3 %v7776_v13  ;;  %v7969_v12 = vld [vmem:[#allocation7 + $0xb38] sm:$0xf0]  ;;  %v10816_v13 = vpop.f32.mrf.mxu2 }
 0x248   :  { %3270 = vmatmul.bf16.vlgmr.msra.gmra.mxu0 %v10716_v22  ;;  %3284 = vmatmul.bf16.vlgmr.msra.gmra.mxu1 %v10718_v23  ;;  %v7972_v25 = vor.u32 %v9958_v11, %v7969_v12  ;;  %v7876_v11 = vor.u32 %v9934_v60, %v7873_v62  ;;  %v9718_v12 = vld [vmem:[#allocation7 + $0x38c] sm:$0xf]  ;;  %v7777_v62 = vld [vmem:[#allocation7 + $0x9b8] sm:$0xf0] }
 0x249   :  { %3318 = vmatpush.bf16.msrb.mxu0 %v6916_v6  ;;  %3332 = vmatpush.bf16.msrb.mxu1 %v7300_v8  ;;  %v9754_v6 = vld [vmem:[#allocation7 + $0x4ac] sm:$0xf]  ;;  %v7153_v8 = vld [vmem:[#allocation7 + $0x4d8] sm:$0xf0] }
 0x24a   :  { %v7156_v18 = vor.u32 %v9754_v6, %v7153_v8  ;;  %v7060_v6 = vor.u32 %v9730_v53, %v7057_v54  ;;  %v9622_v8 = vld [vmem:[#allocation7 + $0x8c] sm:$0xf]  ;;  %v8311_v53 = vld [vmem:[#allocation8 + $0x1e0] sm:$0xf]  ;;  %v10051_v54 = vld [vmem:[#allocation8 + $0x1ec] sm:$0xf0] }
 0x24b   :  { %3297 = vmatpush.bf16.msra.mxu2 %v7344_v36  ;;  %3311 = vmatpush.bf16.msra.mxu3 %v7728_v37  ;;  %v9946_v36 = vld [vmem:[#allocation7 + $0xaac] sm:$0xf]  ;;  %v7921_v37 = vld [vmem:[#allocation7 + $0xad8] sm:$0xf0] }
 0x24c   :  { %v7924_v52 = vor.u32 %v9946_v36, %v7921_v37  ;;  %v9706_v36 = vld [vmem:[#allocation7 + $0x32c] sm:$0xf] }
 0x24d   :  { %3319 = vmatpush.bf16.msrb.mxu0 %v6868_v33  ;;  %3333 = vmatpush.bf16.msrb.mxu1 %v7252_v34  ;;  %v10818_v33 = vpop.f32.mrf.mxu3  ;;  %v7537_v34 = vld [vmem:[#allocation7 + $0x7d8] sm:$0xf0]  ;;  %v9910_v60 = vld [vmem:[#allocation7 + $0x98c] sm:$0xf] }
 0x24e   :  { %3298 = vmatmul.bf16.vlgmr.msra.gmra.mxu2 %v10722_v48  ;;  %3312 = vmatmul.bf16.vlgmr.msra.gmra.mxu3 %v10724_v49  ;;  %v7540_v51 = vor.u32 %v9850_v30, %v7537_v34  ;;  %v9610_v30 = vld [vmem:[#allocation7 + $0x2c] sm:$0xf]  ;;  %v6577_v34 = vld [vmem:[#allocation7 + $0x58] sm:$0xf0] }
 0x24f   :  { %3346 = vmatpush.bf16.msrb.mxu2 %v7684_v41  ;;  %3360 = vmatpush.bf16.msrb.mxu3 %v8068_v44  ;;  %v6724_v41 = vor.u32 %v9646_v17, %v6721_v21  ;;  %v7108_v44 = vor.u32 %v9742_v27, %v7105_v29  ;;  %v7441_v21 = vld [vmem:[#allocation7 + $0x718] sm:$0xf0]  ;;  %v6628_v27 = vor.u32 %v9622_v8, %v6625_v9 }
 0x250   :  { %v8312_v9 = vor.u32 %v10051_v54, %v8311_v53  ;;  %v8151_v54 = vld [vmem:[#allocation8 + $0xa0] sm:$0xf] }
 0x251   :  { %3320 = vmatpush.bf16.msrb.mxu0 %v6820_v58  ;;  %3334 = vmatpush.bf16.msrb.mxu1 %v7204_v59  ;;  %v9838_v58 = vld [vmem:[#allocation7 + $0x74c] sm:$0xf]  ;;  %v7489_v59 = vld [vmem:[#allocation7 + $0x778] sm:$0xf0] }
 0x252   :  { %v7492_v10 = vor.u32 %v9838_v58, %v7489_v59  ;;  %v9814_v58 = vld [vmem:[#allocation7 + $0x68c] sm:$0xf]  ;;  %v7393_v59 = vld [vmem:[#allocation7 + $0x6b8] sm:$0xf0] }
 0x253   :  { %3347 = vmatpush.bf16.msrb.mxu2 %v7636_v4  ;;  %3361 = vmatpush.bf16.msrb.mxu3 %v8020_v5  ;;  %v10824_v4 = vpop.f32.mrf.mxu2  ;;  %v6676_v5 = vor.u32 %v9634_v47, %v6673_v50  ;;  %v8183_v47 = vld [vmem:[#allocation8 + $0xe0] sm:$0xf]  ;;  %v10019_v50 = vld [vmem:[#allocation8 + $0xec] sm:$0xf0] }
 0x254   :  { %11178 = vst [vmem:[#allocation17_spill] sm:$0xff] %v10824_v4  ;;  %v8184_v8 = vor.u32 %v10019_v50, %v8183_v47  ;;  %v9898_v4 = vld [vmem:[#allocation7 + $0x92c] sm:$0xf] }
 0x255   :  { %3321 = vmatpush.bf16.msrb.mxu0 %v6772_v14  ;;  %3335 = vmatpush.bf16.msrb.mxu1 %v7156_v18  ;;  %v7009_v14 = vld [vmem:[#allocation7 + $0x3b8] sm:$0xf0]  ;;  %v9826_v18 = vld [vmem:[#allocation7 + $0x6ec] sm:$0xf]  ;;  %v10826_v17 = vpop.f32.mrf.mxu3  ;;  %v7732_v53 = vor.u32 %v9898_v4, %v7729_v40 }
 0x256   :  { %11179 = vst [vmem:[#allocation18_spill] sm:$0xff] %v10826_v17  ;;  %v7012_v29 = vor.u32 %v9718_v12, %v7009_v14  ;;  %v7444_v37 = vor.u32 %v9826_v18, %v7441_v21  ;;  %v8295_v12 = vld [vmem:[#allocation8 + $0x1c0] sm:$0xf]  ;;  %v7396_v18 = vor.u32 %v9814_v58, %v7393_v59  ;;  %v7780_v21 = vor.u32 %v9910_v60, %v7777_v62  ;;  %v7345_v17 = vld [vmem:[#allocation7 + $0x658] sm:$0xf0] }
 0x257   :  { %3348 = vmatpush.bf16.msrb.mxu2 %v7588_v24  ;;  %3362 = vmatpush.bf16.msrb.mxu3 %v7972_v25  ;;  %v9922_v24 = vld [vmem:[#allocation7 + $0x9ec] sm:$0xf]  ;;  %v7825_v25 = vld [vmem:[#allocation7 + $0xa18] sm:$0xf0]  ;;  %v10011_v58 = vld [vmem:[#allocation8 + $0xac] sm:$0xf0] }
 0x258   :  { %v8279_v62 = vld [vmem:[#allocation8 + $0x1a0] sm:$0xf]  ;;  %v8152_v40 = vor.u32 %v10011_v58, %v8151_v54 }
 0x259   :  { %3322 = vmatpush.bf16.msrb.mxu0 %v6724_v41  ;;  %3336 = vmatpush.bf16.msrb.mxu1 %v7108_v44  ;;  %v7828_v41 = vor.u32 %v9922_v24, %v7825_v25  ;;  %v6961_v44 = vld [vmem:[#allocation7 + $0x358] sm:$0xf0]  ;;  %v10047_v24 = vld [vmem:[#allocation8 + $0x1cc] sm:$0xf0]  ;;  %v9802_v25 = vld [vmem:[#allocation7 + $0x62c] sm:$0xf] }
 0x25a   :  { %v7348_v50 = vor.u32 %v9802_v25, %v7345_v17  ;;  %v8135_v17 = vld [vmem:[#allocation8 + $0x80] sm:$0xf] }
 0x25b   :  { %3349 = vmatpush.bf16.msrb.mxu2 %v7540_v51  ;;  %3363 = vmatpush.bf16.msrb.mxu3 %v7924_v52  ;;  %v10828_v51 = vpop.f32.mrf.mxu0  ;;  %v10830_v52 = vpop.f32.mrf.mxu1  ;;  %v8247_v58 = vld [vmem:[#allocation8 + $0x160] sm:$0xf] }
 0x25c   :  { %v10832_v14 = vpop.f32.mrf.mxu2 }
 0x25d   :  { %3323 = vmatpush.bf16.msrb.mxu0 %v6676_v5  ;;  %3337 = vmatpush.bf16.msrb.mxu1 %v7060_v6  ;;  %v6580_v5 = vor.u32 %v9610_v30, %v6577_v34  ;;  %v6964_v6 = vor.u32 %v9706_v36, %v6961_v44  ;;  %v10083_v30 = vld [vmem:[#allocation8 + $0x2ec] sm:$0xf0]  ;;  %v8567_v34 = vld [vmem:[#allocation8 + $0x3e0] sm:$0xf] }
 0x25e   :  { %v10115_v36 = vld [vmem:[#allocation8 + $0x3ec] sm:$0xf0] }
 0x25f   :  { %3350 = vmatpush.bf16.msrb.mxu2 %v7492_v10  ;;  %3364 = vmatpush.bf16.msrb.mxu3 %v7876_v11  ;;  %v8167_v10 = vld [vmem:[#allocation8 + $0xc0] sm:$0xf]  ;;  %v10015_v11 = vld [vmem:[#allocation8 + $0xcc] sm:$0xf0]  ;;  %v8568_v60 = vor.u32 %v10115_v36, %v8567_v34 }
 0x260   :  { %v10107_v34 = vld [vmem:[#allocation8 + $0x3ac] sm:$0xf0] }
 0x261   :  { %3324 = vmatpush.bf16.msrb.mxu0 %v6628_v27  ;;  %3338 = vmatpush.bf16.msrb.mxu1 %v7012_v29  ;;  %v8439_v27 = vld [vmem:[#allocation8 + $0x2e0] sm:$0xf]  ;;  %v10834_v29 = vpop.f32.mrf.mxu3 }
 0x262   :  { %v8440_v59 = vor.u32 %v10083_v30, %v8439_v27  ;;  %v10075_v27 = vld [vmem:[#allocation8 + $0x2ac] sm:$0xf0]  ;;  %v8535_v30 = vld [vmem:[#allocation8 + $0x3a0] sm:$0xf] }
 0x263   :  { %3351 = vmatpush.bf16.msrb.mxu2 %v7444_v37  ;;  %3365 = vmatpush.bf16.msrb.mxu3 %v7828_v41  ;;  %v8168_v37 = vor.u32 %v10015_v11, %v8167_v10  ;;  %v8296_v41 = vor.u32 %v10047_v24, %v8295_v12  ;;  %v10836_v44 = vpop.f32.mrf.mxu0  ;;  %v10838_v47 = vpop.f32.mrf.mxu1  ;;  %v10111_v10 = vld [vmem:[#allocation8 + $0x3cc] sm:$0xf0]  ;;  %v8407_v24 = vld [vmem:[#allocation8 + $0x2a0] sm:$0xf]  ;;  %v8536_v54 = vor.u32 %v10107_v34, %v8535_v30 }
 0x264   :  { %v10842_v11 = vpop.f32.mrf.mxu2 }
 0x265   :  { %3325 = vmatpush.bf16.msrb.mxu0 %v6580_v5  ;;  %3339 = vmatpush.bf16.msrb.mxu1 %v6964_v6  ;;  %v10043_v5 = vld [vmem:[#allocation8 + $0x1ac] sm:$0xf0]  ;;  %v8423_v6 = vld [vmem:[#allocation8 + $0x2c0] sm:$0xf] }
 0x266   :  { %v8280_v4 = vor.u32 %v10043_v5, %v8279_v62 }
 0x267   :  { %3352 = vmatpush.bf16.msrb.mxu2 %v7396_v18  ;;  %3366 = vmatpush.bf16.msrb.mxu3 %v7780_v21  ;;  %v8263_v18 = vld [vmem:[#allocation8 + $0x180] sm:$0xf]  ;;  %v10039_v21 = vld [vmem:[#allocation8 + $0x18c] sm:$0xf0] }
 0x268   :  { %3326 = vmatmul.bf16.vlgmr.msrb.gmra.mxu0 %v10716_v22  ;;  %3340 = vmatmul.bf16.vlgmr.msrb.gmra.mxu1 %v10718_v23  ;;  %v10007_v22 = vld [vmem:[#allocation8 + $0x8c] sm:$0xf0] }
 0x269   :  { %5736 = vmatpush.bf16.msra.mxu0 %v8184_v8  ;;  %5750 = vmatpush.bf16.msra.mxu1 %v8312_v9  ;;  %v10079_v8 = vld [vmem:[#allocation8 + $0x2cc] sm:$0xf0]  ;;  %v8551_v9 = vld [vmem:[#allocation8 + $0x3c0] sm:$0xf]  ;;  %v10844_v25 = vpop.f32.mrf.mxu3  ;;  %v8136_v36 = vor.u32 %v10007_v22, %v8135_v17  ;;  %v2784_v17 = vadd.f32 %v10774_v0, %v10772_v63 }
 0x26a   :  { %v8424_v23 = vor.u32 %v10079_v8, %v8423_v6  ;;  %v8552_v12 = vor.u32 %v10111_v10, %v8551_v9  ;;  %v8519_v6 = vld [vmem:[#allocation8 + $0x380] sm:$0xf]  ;;  %v2728_v8 = vadd.f32 %v10750_v43, %v10748_v42  ;;  %v10099_v43 = vld [vmem:[#allocation8 + $0x36c] sm:$0xf0] }
 0x26b   :  { %3353 = vmatpush.bf16.msrb.mxu2 %v7348_v50  ;;  %3367 = vmatpush.bf16.msrb.mxu3 %v7732_v53  ;;  %v10003_v50 = vld [vmem:[#allocation8 + $0x6c] sm:$0xf0]  ;;  %v8408_v53 = vor.u32 %v10075_v27, %v8407_v24  ;;  %v10848_v62 = vpop.f32.mrf.mxu0  ;;  %v10850_v5 = vpop.f32.mrf.mxu1  ;;  %v8503_v42 = vld [vmem:[#allocation8 + $0x360] sm:$0xf]  ;;  %v2798_v34 = vadd.f32 %v10776_v15, %v2784_v17 }
 0x26c   :  { %v10856_v24 = vpop.f32.mrf.mxu2  ;;  %v10067_v27 = vld [vmem:[#allocation8 + $0x26c] sm:$0xf0]  ;;  %v2742_v30 = vadd.f32 %v10754_v31, %v2728_v8 }
 0x26d   :  { %5737 = vmatpush.bf16.msra.mxu0 %v8168_v37  ;;  %5751 = vmatpush.bf16.msra.mxu1 %v8296_v41  ;;  %v8264_v37 = vor.u32 %v10039_v21, %v8263_v18  ;;  %v8119_v41 = vld [vmem:[#allocation8 + $0x60] sm:$0xf]  ;;  %v10031_v18 = vld [vmem:[#allocation8 + $0x14c] sm:$0xf0] }
 0x26e   :  { %3354 = vmatmul.bf16.vlgmr.msrb.gmra.mxu2 %v10722_v48  ;;  %3368 = vmatmul.bf16.vlgmr.msrb.gmra.mxu3 %v10724_v49  ;;  %v10071_v48 = vld [vmem:[#allocation8 + $0x28c] sm:$0xf0]  ;;  %v8120_v9 = vor.u32 %v10003_v50, %v8119_v41  ;;  %v8375_v21 = vld [vmem:[#allocation8 + $0x260] sm:$0xf]  ;;  %v2756_v8 = vadd.f32 %v10756_v32, %v2742_v30 }
 0x26f   :  { %5764 = vmatpush.bf16.msra.mxu2 %v8440_v59  ;;  %5778 = vmatpush.bf16.msra.mxu3 %v8568_v60  ;;  %v10035_v59 = vld [vmem:[#allocation8 + $0x16c] sm:$0xf0]  ;;  %v8391_v60 = vld [vmem:[#allocation8 + $0x280] sm:$0xf]  ;;  %v8376_v50 = vor.u32 %v10067_v27, %v8375_v21 }
 0x270   :  { %v10103_v49 = vld [vmem:[#allocation8 + $0x38c] sm:$0xf0]  ;;  %v8248_v10 = vor.u32 %v10035_v59, %v8247_v58  ;;  %v8392_v22 = vor.u32 %v10071_v48, %v8391_v60  ;;  %v8359_v59 = vld [vmem:[#allocation8 + $0x240] sm:$0xf] }
 0x271   :  { %5738 = vmatpush.bf16.msra.mxu0 %v8152_v40  ;;  %5752 = vmatpush.bf16.msra.mxu1 %v8280_v4  ;;  %v8103_v40 = vld [vmem:[#allocation8 + $0x40] sm:$0xf]  ;;  %v9999_v4 = vld [vmem:[#allocation8 + $0x4c] sm:$0xf0] }
 0x272   :  { %v8104_v63 = vor.u32 %v9999_v4, %v8103_v40  ;;  %v9995_v41 = vld [vmem:[#allocation8 + $0x2c] sm:$0xf0]  ;;  %v8487_v48 = vld [vmem:[#allocation8 + $0x340] sm:$0xf]  ;;  %v2840_v40 = vadd.f32 %v10794_v20, %v10792_v19  ;;  %v2838_v19 = vadd.f32 %v10784_v46, %v10782_v45 }
 0x273   :  { %5765 = vmatpush.bf16.msra.mxu2 %v8424_v23  ;;  %5779 = vmatpush.bf16.msra.mxu3 %v8552_v12  ;;  %v8520_v23 = vor.u32 %v10103_v49, %v8519_v6  ;;  %v8231_v12 = vld [vmem:[#allocation8 + $0x140] sm:$0xf]  ;;  %v10027_v58 = vld [vmem:[#allocation8 + $0x12c] sm:$0xf0]  ;;  %v10862_v60 = vpop.f32.mrf.mxu0  ;;  %v10864_v31 = vpop.f32.mrf.mxu1 }
 0x274   :  { %v8232_v0 = vor.u32 %v10031_v18, %v8231_v12  ;;  %v10063_v15 = vld [vmem:[#allocation8 + $0x24c] sm:$0xf0]  ;;  %v3374_v49 = vld [vmem:[%s11172_s8] sm:$0xff]  ;;  %v2896_v18 = vadd.f32 %v10812_v57, %v10810_v56  ;;  %v2854_v20 = vadd.f32 %v10796_v38, %v2840_v40  ;;  %v10882_v30 = vpop.f32.mrf.mxu2 }
 0x275   :  { %5739 = vmatpush.bf16.msra.mxu0 %v8136_v36  ;;  %5753 = vmatpush.bf16.msra.mxu1 %v8264_v37  ;;  %v10860_v36 = vpop.f32.mrf.mxu3  ;;  %v8087_v37 = vld [vmem:[#allocation8 + $0x20] sm:$0xf]  ;;  %v10095_v6 = vld [vmem:[#allocation8 + $0x34c] sm:$0xf0]  ;;  %v8360_v32 = vor.u32 %v10063_v15, %v8359_v59  ;;  %v3398_v56 = vadd.f32 %v3374_v49, %v2756_v8 }
 0x276   :  { %v8088_v4 = vor.u32 %v9995_v41, %v8087_v37  ;;  %v8199_v12 = vld [vmem:[#allocation8 + $0x100] sm:$0xf]  ;;  %v10023_v21 = vld [vmem:[#allocation8 + $0x10c] sm:$0xf0]  ;;  %v2894_v37 = vadd.f32 %v10802_v2, %v10800_v1  ;;  %v2910_v41 = vadd.f32 %v10816_v13, %v2896_v18 }
 0x277   :  { %5766 = vmatpush.bf16.msra.mxu2 %v8408_v53  ;;  %5780 = vmatpush.bf16.msra.mxu3 %v8536_v54  ;;  %v8504_v53 = vor.u32 %v10099_v43, %v8503_v42  ;;  %v8215_v54 = vld [vmem:[#allocation8 + $0x120] sm:$0xf]  ;;  %v10147_v42 = vld [vmem:[#allocation8 + $0x4ec] sm:$0xf0]  ;;  %v3386_v43 = vadd.f32 %v3374_v49, %v10752_v7  ;;  %v8200_v38 = vor.u32 %v10023_v21, %v8199_v12 }
 0x278   :  { %v8216_v17 = vor.u32 %v10027_v58, %v8215_v54  ;;  %v8695_v27 = vld [vmem:[#allocation8 + $0x4e0] sm:$0xf]  ;;  %v10091_v7 = vld [vmem:[#allocation8 + $0x32c] sm:$0xf0]  ;;  %v2852_v54 = vadd.f32 %v10788_v61, %v2838_v19  ;;  %v2908_v58 = vadd.f32 %v10804_v26, %v2894_v37 }
 0x279   :  { %5740 = vmatpush.bf16.msra.mxu0 %v8120_v9  ;;  %5754 = vmatpush.bf16.msra.mxu1 %v8248_v10  ;;  %v2812_v9 = vadd.f32 %v10780_v28, %v2798_v34  ;;  %v3375_v10 = vld [vmem:[%s11172_s8 + $0x8] sm:$0xff]  ;;  %v8488_v28 = vor.u32 %v10095_v6, %v8487_v48  ;;  %v8823_v34 = vld [vmem:[#allocation8 + $0x5e0] sm:$0xf]  ;;  %v8696_v59 = vor.u32 %v10147_v42, %v8695_v27  ;;  %v10143_v2 = vld [vmem:[#allocation8 + $0x4cc] sm:$0xf0] }
 0x27a   :  { %v8679_v1 = vld [vmem:[#allocation8 + $0x4c0] sm:$0xf]  ;;  %v3387_v48 = vadd.f32 %v3375_v10, %v10760_v16  ;;  %v2868_v6 = vadd.f32 %v10798_v55, %v2854_v20  ;;  %v10175_v8 = vld [vmem:[#allocation8 + $0x5cc] sm:$0xf0]  ;;  %v2866_v18 = vadd.f32 %v10790_v3, %v2852_v54  ;;  %v2922_v21 = vadd.f32 %v10806_v35, %v2908_v58 }
 0x27b   :  { %5767 = vmatpush.bf16.msra.mxu2 %v8392_v22  ;;  %5781 = vmatpush.bf16.msra.mxu3 %v8520_v23  ;;  %v8071_v22 = vld [vmem:[#allocation8] sm:$0xf]  ;;  %v9991_v23 = vld [vmem:[#allocation8 + $0xc] sm:$0xf0]  ;;  %v3399_v57 = vadd.f32 %v3375_v10, %v2812_v9  ;;  %v10901_v16 = vpop.f32.mrf.mxu1  ;;  %v8680_v27 = vor.u32 %v10143_v2, %v8679_v1 }
 0x27c   :  { %v8072_v46 = vor.u32 %v9991_v23, %v8071_v22  ;;  %v8807_v13 = vld [vmem:[#allocation8 + $0x5c0] sm:$0xf]  ;;  %v10055_v40 = vld [vmem:[#allocation8 + $0x20c] sm:$0xf0]  ;;  %v10894_v23 = vpack.c.bf16 %v3398_v56, %v3386_v43  ;;  %v3377_v43 = vld [vmem:[%s11172_s8 + $0x18] sm:$0xff] }
 0x27d   :  { %5741 = vmatpush.bf16.msra.mxu0 %v8104_v63  ;;  %5755 = vmatpush.bf16.msra.mxu1 %v8232_v0  ;;  %v10179_v63 = vld [vmem:[#allocation8 + $0x5ec] sm:$0xf0]  ;;  %v8343_v0 = vld [vmem:[#allocation8 + $0x220] sm:$0xf]  ;;  %v10888_v45 = vpop.f32.mrf.mxu3  ;;  %v10896_v12 = vpack.c.bf16 %v3399_v57, %v3387_v48  ;;  %v8808_v42 = vor.u32 %v10175_v8, %v8807_v13 }
 0x27e   :  { %v8824_v15 = vor.u32 %v10179_v63, %v8823_v34  ;;  %v8327_v9 = vld [vmem:[#allocation8 + $0x200] sm:$0xf]  ;;  %v10087_v26 = vld [vmem:[#allocation8 + $0x30c] sm:$0xf0] }
 0x27f   :  { %5768 = vmatpush.bf16.msra.mxu2 %v8376_v50  ;;  %5782 = vmatpush.bf16.msra.mxu3 %v8504_v53  ;;  %v10059_v50 = vld [vmem:[#allocation8 + $0x22c] sm:$0xf0]  ;;  %v8471_v53 = vld [vmem:[#allocation8 + $0x320] sm:$0xf]  ;;  %v8328_v19 = vor.u32 %v10055_v40, %v8327_v9 }
 0x280   :  { %v8344_v61 = vor.u32 %v10059_v50, %v8343_v0  ;;  %v8472_v49 = vor.u32 %v10091_v7, %v8471_v53  ;;  %v8951_v22 = vld [vmem:[#allocation8 + $0x6e0] sm:$0xf]  ;;  %v10211_v55 = vld [vmem:[#allocation8 + $0x6ec] sm:$0xf0]  ;;  %v10912_v53 = vpop.f32.mrf.mxu2 }
 0x281   :  { %5742 = vmatpush.bf16.msra.mxu0 %v8088_v4  ;;  %5756 = vmatpush.bf16.msra.mxu1 %v8216_v17  ;;  %v2924_v4 = vadd.f32 %v10818_v33, %v2910_v41  ;;  %v8455_v17 = vld [vmem:[#allocation8 + $0x300] sm:$0xf]  ;;  %v3376_v33 = vld [vmem:[%s11172_s8 + $0x10] sm:$0xff]  ;;  %v8952_v35 = vor.u32 %v10211_v55, %v8951_v22 }
 0x282   :  { %v9079_v10 = vld [vmem:[#allocation8 + $0x7e0] sm:$0xf]  ;;  %v3400_v3 = vadd.f32 %v3376_v33, %v2868_v6  ;;  %v8456_v20 = vor.u32 %v10087_v26, %v8455_v17  ;;  %v10139_v63 = vld [vmem:[#allocation8 + $0x4ac] sm:$0xf0]  ;;  %v3388_v50 = vadd.f32 %v3376_v33, %v2866_v18 }
 0x283   :  { %5769 = vmatpush.bf16.msra.mxu2 %v8360_v32  ;;  %5783 = vmatpush.bf16.msra.mxu3 %v8488_v28  ;;  %v10899_v32 = vpop.f32.mrf.mxu0  ;;  %v10243_v28 = vld [vmem:[#allocation8 + $0x7ec] sm:$0xf0]  ;;  %v8663_v34 = vld [vmem:[#allocation8 + $0x4a0] sm:$0xf]  ;;  %v3401_v0 = vadd.f32 %v3377_v43, %v2924_v4  ;;  %v10922_v4 = vpop.f32.mrf.mxu1 }
 0x284   :  { %v9080_v56 = vor.u32 %v10243_v28, %v9079_v10  ;;  %v8791_v57 = vld [vmem:[#allocation8 + $0x5a0] sm:$0xf]  ;;  %v10171_v37 = vld [vmem:[#allocation8 + $0x5ac] sm:$0xf0]  ;;  %v10914_v58 = vpack.c.bf16 %v3400_v3, %v3388_v50 }
 0x285   :  { %5743 = vmatpush.bf16.msra.mxu0 %v8072_v46  ;;  %5757 = vmatpush.bf16.msra.mxu1 %v8200_v38  ;;  %v8935_v41 = vld [vmem:[#allocation8 + $0x6c0] sm:$0xf]  ;;  %v10207_v7 = vld [vmem:[#allocation8 + $0x6cc] sm:$0xf0]  ;;  %v3389_v38 = vadd.f32 %v3377_v43, %v2922_v21  ;;  %v8792_v1 = vor.u32 %v10171_v37, %v8791_v57 }
 0x286   :  { %v9063_v54 = vld [vmem:[#allocation8 + $0x7c0] sm:$0xf]  ;;  %v10239_v46 = vld [vmem:[#allocation8 + $0x7cc] sm:$0xf0]  ;;  %v8936_v6 = vor.u32 %v10207_v7, %v8935_v41  ;;  %v3008_v41 = vadd.f32 %v10850_v5, %v10848_v62  ;;  %v3006_v62 = vadd.f32 %v10838_v47, %v10836_v44 }
 0x287   :  { %5770 = vmatpush.bf16.msra.mxu2 %v8344_v61  ;;  %5784 = vmatpush.bf16.msra.mxu3 %v8472_v49  ;;  %v8647_v2 = vld [vmem:[#allocation8 + $0x480] sm:$0xf]  ;;  %v10135_v13 = vld [vmem:[#allocation8 + $0x48c] sm:$0xf0]  ;;  %v10918_v48 = vpack.c.bf16 %v3401_v0, %v3389_v38  ;;  %v9064_v61 = vor.u32 %v10239_v46, %v9063_v54 }
 0x288   :  { %5744 = vmatmul.bf16.vlgmr.msra.gmra.mxu0 %v10894_v23  ;;  %5758 = vmatmul.bf16.vlgmr.msra.gmra.mxu1 %v10896_v12  ;;  %v8775_v49 = vld [vmem:[#allocation8 + $0x580] sm:$0xf]  ;;  %v10167_v8 = vld [vmem:[#allocation8 + $0x58c] sm:$0xf0]  ;;  %v8648_v18 = vor.u32 %v10135_v13, %v8647_v2  ;;  %v10926_v43 = vpop.f32.mrf.mxu2  ;;  %v11180_v2 = vld [vmem:[#allocation16_spill] sm:$0xff]  ;;  %v3020_v44 = vadd.f32 %v10842_v11, %v3006_v62 }
 0x289   :  { %5792 = vmatpush.bf16.msrb.mxu0 %v8696_v59  ;;  %5806 = vmatpush.bf16.msrb.mxu1 %v8824_v15  ;;  %v10916_v59 = vpop.f32.mrf.mxu3  ;;  %v8664_v15 = vor.u32 %v10139_v63, %v8663_v34  ;;  %v8919_v9 = vld [vmem:[#allocation8 + $0x6a0] sm:$0xf]  ;;  %v10203_v17 = vld [vmem:[#allocation8 + $0x6ac] sm:$0xf0]  ;;  %v8776_v55 = vor.u32 %v10167_v8, %v8775_v49  ;;  %v2952_v63 = vadd.f32 %v10830_v52, %v10828_v51 }
 0x28a   :  { %v9047_v26 = vld [vmem:[#allocation8 + $0x7a0] sm:$0xf]  ;;  %v10235_v22 = vld [vmem:[#allocation8 + $0x7ac] sm:$0xf0]  ;;  %v8920_v33 = vor.u32 %v10203_v17, %v8919_v9  ;;  %v2950_v13 = vadd.f32 %v11180_v2, %v10820_v39 }
 0x28b   :  { %5771 = vmatpush.bf16.msra.mxu2 %v8328_v19  ;;  %5785 = vmatpush.bf16.msra.mxu3 %v8456_v20  ;;  %v10920_v40 = vpop.f32.mrf.mxu0  ;;  %v8631_v10 = vld [vmem:[#allocation8 + $0x460] sm:$0xf]  ;;  %v10131_v28 = vld [vmem:[#allocation8 + $0x46c] sm:$0xf0]  ;;  %v9048_v21 = vor.u32 %v10235_v22, %v9047_v26  ;;  %v2966_v51 = vadd.f32 %v10832_v14, %v2952_v63 }
 0x28c   :  { %v8903_v3 = vld [vmem:[#allocation8 + $0x680] sm:$0xf]  ;;  %v10199_v19 = vld [vmem:[#allocation8 + $0x68c] sm:$0xf0]  ;;  %v3118_v2 = vadd.f32 %v10922_v4, %v10920_v40 }
 0x28d   :  { %5793 = vmatpush.bf16.msrb.mxu0 %v8680_v27  ;;  %5807 = vmatpush.bf16.msrb.mxu1 %v8808_v42  ;;  %v8759_v27 = vld [vmem:[#allocation8 + $0x560] sm:$0xf]  ;;  %v10163_v42 = vld [vmem:[#allocation8 + $0x56c] sm:$0xf0]  ;;  %v8904_v50 = vor.u32 %v10199_v19, %v8903_v3  ;;  %v3064_v3 = vadd.f32 %v10901_v16, %v10899_v32  ;;  %v3034_v32 = vadd.f32 %v10844_v25, %v3020_v44 }
 0x28e   :  { %5772 = vmatmul.bf16.vlgmr.msra.gmra.mxu2 %v10914_v58  ;;  %5786 = vmatmul.bf16.vlgmr.msra.gmra.mxu3 %v10918_v48  ;;  %v9031_v20 = vld [vmem:[#allocation8 + $0x780] sm:$0xf]  ;;  %v10231_v34 = vld [vmem:[#allocation8 + $0x78c] sm:$0xf0]  ;;  %v3062_v16 = vadd.f32 %v10864_v31, %v10862_v60 }
 0x28f   :  { %5820 = vmatpush.bf16.msrb.mxu2 %v8952_v35  ;;  %5834 = vmatpush.bf16.msrb.mxu3 %v9080_v56  ;;  %v8632_v35 = vor.u32 %v10131_v28, %v8631_v10  ;;  %v8760_v56 = vor.u32 %v10163_v42, %v8759_v27  ;;  %v8615_v57 = vld [vmem:[#allocation8 + $0x440] sm:$0xf]  ;;  %v10127_v37 = vld [vmem:[#allocation8 + $0x44c] sm:$0xf0]  ;;  %v9032_v7 = vor.u32 %v10231_v34, %v9031_v20  ;;  %v3379_v42 = vld [vmem:[%s11172_s8 + $0x28] sm:$0xff] }
 0x290   :  { %v8743_v54 = vld [vmem:[#allocation8 + $0x540] sm:$0xf]  ;;  %v10159_v46 = vld [vmem:[#allocation8 + $0x54c] sm:$0xf0]  ;;  %v8616_v49 = vor.u32 %v10127_v37, %v8615_v57  ;;  %v2980_v10 = vadd.f32 %v10834_v29, %v2966_v51  ;;  %v3133_v19 = vpop.f32.mrf.mxu2 }
 0x291   :  { %5794 = vmatpush.bf16.msrb.mxu0 %v8664_v15  ;;  %5808 = vmatpush.bf16.msrb.mxu1 %v8792_v1  ;;  %v10930_v0 = vpop.f32.mrf.mxu3  ;;  %v8887_v38 = vld [vmem:[#allocation8 + $0x660] sm:$0xf]  ;;  %v10195_v52 = vld [vmem:[#allocation8 + $0x66c] sm:$0xf0]  ;;  %v8744_v8 = vor.u32 %v10159_v46, %v8743_v54 }
 0x292   :  { %v9015_v15 = vld [vmem:[#allocation8 + $0x760] sm:$0xf]  ;;  %v10227_v1 = vld [vmem:[#allocation8 + $0x76c] sm:$0xf0]  ;;  %v8888_v14 = vor.u32 %v10195_v52, %v8887_v38 }
 0x293   :  { %5821 = vmatpush.bf16.msrb.mxu2 %v8936_v6  ;;  %5835 = vmatpush.bf16.msrb.mxu3 %v9064_v61  ;;  %v3022_v6 = vadd.f32 %v10856_v24, %v3008_v41  ;;  %v3105_v5 = vpop.f32.mrf.mxu0  ;;  %v3119_v61 = vpop.f32.mrf.mxu1  ;;  %v8599_v9 = vld [vmem:[#allocation8 + $0x420] sm:$0xf]  ;;  %v10123_v17 = vld [vmem:[#allocation8 + $0x42c] sm:$0xf0]  ;;  %v9016_v26 = vor.u32 %v10227_v1, %v9015_v15  ;;  %v3078_v1 = vadd.f32 %v10912_v53, %v3064_v3 }
 0x294   :  { %v8727_v22 = vld [vmem:[#allocation8 + $0x520] sm:$0xf]  ;;  %v10191_v47 = vld [vmem:[#allocation8 + $0x64c] sm:$0xf0]  ;;  %v8600_v29 = vor.u32 %v10123_v17, %v8599_v9 }
 0x295   :  { %5795 = vmatpush.bf16.msrb.mxu0 %v8648_v18  ;;  %5809 = vmatpush.bf16.msrb.mxu1 %v8776_v55  ;;  %v10155_v18 = vld [vmem:[#allocation8 + $0x52c] sm:$0xf0]  ;;  %v8871_v39 = vld [vmem:[#allocation8 + $0x640] sm:$0xf]  ;;  %v3036_v27 = vadd.f32 %v10860_v36, %v3022_v6 }
 0x296   :  { %v11181_v55 = vld [vmem:[#allocation17_spill] sm:$0xff]  ;;  %v8999_v28 = vld [vmem:[#allocation8 + $0x740] sm:$0xf]  ;;  %v8728_v11 = vor.u32 %v10155_v18, %v8727_v22 }
 0x297   :  { %5822 = vmatpush.bf16.msrb.mxu2 %v8920_v33  ;;  %5836 = vmatpush.bf16.msrb.mxu3 %v9048_v21  ;;  %v2964_v24 = vadd.f32 %v11181_v55, %v2950_v13  ;;  %v10223_v33 = vld [vmem:[#allocation8 + $0x74c] sm:$0xf0]  ;;  %v3378_v21 = vld [vmem:[%s11172_s8 + $0x20] sm:$0xff]  ;;  %v3403_v15 = vadd.f32 %v3379_v42, %v3036_v27  ;;  %v3092_v55 = vadd.f32 %v10916_v59, %v3078_v1 }
 0x298   :  { %v8583_v20 = vld [vmem:[#allocation8 + $0x400] sm:$0xf]  ;;  %v10119_v34 = vld [vmem:[#allocation8 + $0x40c] sm:$0xf0]  ;;  %v9000_v36 = vor.u32 %v10223_v33, %v8999_v28  ;;  %v3402_v54 = vadd.f32 %v3378_v21, %v2980_v10 }
 0x299   :  { %5796 = vmatpush.bf16.msrb.mxu0 %v8632_v35  ;;  %5810 = vmatpush.bf16.msrb.mxu1 %v8760_v56  ;;  %v8711_v63 = vld [vmem:[#allocation8 + $0x500] sm:$0xf]  ;;  %v3120_v35 = vadd.f32 %v3119_v61, %v3105_v5  ;;  %v8872_v56 = vor.u32 %v10191_v47, %v8871_v39  ;;  %v10151_v57 = vld [vmem:[#allocation8 + $0x50c] sm:$0xf0]  ;;  %v3147_v46 = vpop.f32.mrf.mxu3  ;;  %v3076_v61 = vadd.f32 %v10882_v30, %v3062_v16 }
 0x29a   :  { %v9207_v37 = vld [vmem:[#allocation8 + $0x8e0] sm:$0xf]  ;;  %v10275_v41 = vld [vmem:[#allocation8 + $0x8ec] sm:$0xf0]  ;;  %v8584_v60 = vor.u32 %v10119_v34, %v8583_v20  ;;  %v8712_v31 = vor.u32 %v10151_v57, %v8711_v63 }
 0x29b   :  { %5823 = vmatpush.bf16.msrb.mxu2 %v8904_v50  ;;  %5837 = vmatpush.bf16.msrb.mxu3 %v9032_v7  ;;  %v11182_v50 = vld [vmem:[#allocation18_spill] sm:$0xff]  ;;  %v9335_v38 = vld [vmem:[#allocation8 + $0x9e0] sm:$0xf]  ;;  %v10307_v51 = vld [vmem:[#allocation8 + $0x9ec] sm:$0xf0]  ;;  %v3134_v13 = vadd.f32 %v3133_v19, %v3120_v35  ;;  %v10960_v25 = vpop.f32.mrf.mxu0  ;;  %v9208_v53 = vor.u32 %v10275_v41, %v9207_v37  ;;  %v3090_v33 = vadd.f32 %v10888_v45, %v3076_v61 }
 0x29c   :  { %v2978_v7 = vadd.f32 %v11182_v50, %v2964_v24  ;;  %v8855_v52 = vld [vmem:[#allocation8 + $0x620] sm:$0xf]  ;;  %v10187_v6 = vld [vmem:[#allocation8 + $0x62c] sm:$0xf0]  ;;  %v9336_v40 = vor.u32 %v10307_v51, %v9335_v38 }
 0x29d   :  { %5797 = vmatpush.bf16.msrb.mxu0 %v8616_v49  ;;  %5811 = vmatpush.bf16.msrb.mxu1 %v8744_v8  ;;  %v8983_v62 = vld [vmem:[#allocation8 + $0x720] sm:$0xf]  ;;  %v10219_v5 = vld [vmem:[#allocation8 + $0x72c] sm:$0xf0]  ;;  %v10962_v49 = vpop.f32.mrf.mxu1  ;;  %v3132_v8 = vadd.f32 %v10926_v43, %v3118_v2  ;;  %v3148_v24 = vadd.f32 %v3147_v46, %v3134_v13 }
 0x29e   :  { %v9191_v4 = vld [vmem:[#allocation8 + $0x8c0] sm:$0xf]  ;;  %v10271_v9 = vld [vmem:[#allocation8 + $0x8cc] sm:$0xf0]  ;;  %v3390_v17 = vadd.f32 %v3378_v21, %v2978_v7  ;;  %v8984_v30 = vor.u32 %v10219_v5, %v8983_v62 }
 0x29f   :  { %5824 = vmatpush.bf16.msrb.mxu2 %v8888_v14  ;;  %5838 = vmatpush.bf16.msrb.mxu3 %v9016_v26  ;;  %v3391_v14 = vadd.f32 %v3379_v42, %v3034_v32  ;;  %v8856_v26 = vor.u32 %v10187_v6, %v8855_v52  ;;  %v9319_v22 = vld [vmem:[#allocation8 + $0x9c0] sm:$0xf]  ;;  %v10303_v18 = vld [vmem:[#allocation8 + $0x9cc] sm:$0xf0]  ;;  %v3146_v42 = vadd.f32 %v10930_v0, %v3132_v8 }
 0x2a0   :  { %v8839_v39 = vld [vmem:[#allocation8 + $0x600] sm:$0xf]  ;;  %v10183_v10 = vld [vmem:[#allocation8 + $0x60c] sm:$0xf0]  ;;  %v10966_v43 = vpack.c.bf16 %v3402_v54, %v3390_v17  ;;  %v9192_v3 = vor.u32 %v10271_v9, %v9191_v4  ;;  %v9320_v59 = vor.u32 %v10303_v18, %v9319_v22 }
 0x2a1   :  { %5798 = vmatpush.bf16.msrb.mxu0 %v8600_v29  ;;  %5812 = vmatpush.bf16.msrb.mxu1 %v8728_v11  ;;  %v8967_v44 = vld [vmem:[#allocation8 + $0x700] sm:$0xf]  ;;  %v10215_v47 = vld [vmem:[#allocation8 + $0x70c] sm:$0xf0]  ;;  %v10968_v28 = vpack.c.bf16 %v3403_v15, %v3391_v14  ;;  %v3381_v29 = vld [vmem:[%s11172_s8 + $0x38] sm:$0xff]  ;;  %v10978_v11 = vpop.f32.mrf.mxu2  ;;  %v10980_v45 = vpop.f32.mrf.mxu3  ;;  %v8840_v20 = vor.u32 %v10183_v10, %v8839_v39 }
 0x2a2   :  { %v9463_v21 = vld [vmem:[#allocation8 + $0xae0] sm:$0xf]  ;;  %v10339_v27 = vld [vmem:[#allocation8 + $0xaec] sm:$0xf0]  ;;  %v8968_v0 = vor.u32 %v10215_v47, %v8967_v44  ;;  %v3405_v35 = vadd.f32 %v3381_v29, %v3148_v24  ;;  %v3393_v54 = vadd.f32 %v3381_v29, %v3146_v42 }
 0x2a3   :  { %5825 = vmatpush.bf16.msrb.mxu2 %v8872_v56  ;;  %5839 = vmatpush.bf16.msrb.mxu3 %v9000_v36  ;;  %v3380_v19 = vld [vmem:[%s11172_s8 + $0x30] sm:$0xff]  ;;  %v9175_v34 = vld [vmem:[#allocation8 + $0x8a0] sm:$0xf]  ;;  %v9464_v37 = vor.u32 %v10339_v27, %v9463_v21  ;;  %v3161_v32 = vpop.f32.mrf.mxu0 }
 0x2a4   :  { %v3404_v63 = vadd.f32 %v3380_v19, %v3092_v55  ;;  %v10267_v56 = vld [vmem:[#allocation8 + $0x8ac] sm:$0xf0]  ;;  %v9303_v36 = vld [vmem:[#allocation8 + $0x9a0] sm:$0xf]  ;;  %v3392_v7 = vadd.f32 %v3380_v19, %v3090_v33  ;;  %v10986_v2 = vpack.c.bf16 %v3405_v35, %v3393_v54 }
 0x2a5   :  { %5799 = vmatpush.bf16.msrb.mxu0 %v8584_v60  ;;  %5813 = vmatpush.bf16.msrb.mxu1 %v8712_v31  ;;  %v10299_v57 = vld [vmem:[#allocation8 + $0x9ac] sm:$0xf0]  ;;  %v9447_v41 = vld [vmem:[#allocation8 + $0xac0] sm:$0xf]  ;;  %v3175_v16 = vpop.f32.mrf.mxu1  ;;  %v9176_v46 = vor.u32 %v10267_v56, %v9175_v34 }
 0x2a6   :  { %v10335_v50 = vld [vmem:[#allocation8 + $0xacc] sm:$0xf0]  ;;  %v9304_v38 = vor.u32 %v10299_v57, %v9303_v36  ;;  %v9159_v51 = vld [vmem:[#allocation8 + $0x880] sm:$0xf]  ;;  %v10984_v1 = vpack.c.bf16 %v3404_v63, %v3392_v7  ;;  %v3176_v63 = vadd.f32 %v3175_v16, %v3161_v32 }
 0x2a7   :  { %5826 = vmatpush.bf16.msrb.mxu2 %v8856_v26  ;;  %5840 = vmatpush.bf16.msrb.mxu3 %v8984_v30  ;;  %v10263_v52 = vld [vmem:[#allocation8 + $0x88c] sm:$0xf0]  ;;  %v9287_v15 = vld [vmem:[#allocation8 + $0x980] sm:$0xf]  ;;  %v9448_v6 = vor.u32 %v10335_v50, %v9447_v41  ;;  %v3174_v41 = vadd.f32 %v10962_v49, %v10960_v25 }
 0x2a8   :  { %5800 = vmatmul.bf16.vlgmr.msrb.gmra.mxu0 %v10966_v43  ;;  %5814 = vmatmul.bf16.vlgmr.msrb.gmra.mxu1 %v10968_v28  ;;  %v10295_v13 = vld [vmem:[#allocation8 + $0x98c] sm:$0xf0]  ;;  %v9591_v62 = vld [vmem:[#allocation8 + $0xbe0] sm:$0xf]  ;;  %v9160_v8 = vor.u32 %v10263_v52, %v9159_v51 }
 0x2a9   :  { %5848 = vmatpush.bf16.msra.mxu0 %v9208_v53  ;;  %5862 = vmatpush.bf16.msra.mxu1 %v9336_v40  ;;  %v10371_v5 = vld [vmem:[#allocation8 + $0xbec] sm:$0xf0]  ;;  %v9431_v61 = vld [vmem:[#allocation8 + $0xaa0] sm:$0xf]  ;;  %v9288_v53 = vor.u32 %v10295_v13, %v9287_v15  ;;  %v3189_v22 = vpop.f32.mrf.mxu2  ;;  %v3203_v18 = vpop.f32.mrf.mxu3  ;;  %v3188_v13 = vadd.f32 %v10978_v11, %v3174_v41  ;;  %v10049_v11 = vld [vmem:[#allocation8 + $0x1e4] sm:$0xf] }
 0x2aa   :  { %v10331_v60 = vld [vmem:[#allocation8 + $0xaac] sm:$0xf0]  ;;  %v9592_v31 = vor.u32 %v10371_v5, %v9591_v62  ;;  %v9143_v40 = vld [vmem:[#allocation8 + $0x860] sm:$0xf]  ;;  %v3190_v50 = vadd.f32 %v3189_v22, %v3176_v63 }
 0x2ab   :  { %5827 = vmatpush.bf16.msrb.mxu2 %v8840_v20  ;;  %5841 = vmatpush.bf16.msrb.mxu3 %v8968_v0  ;;  %v10259_v4 = vld [vmem:[#allocation8 + $0x86c] sm:$0xf0]  ;;  %v9271_v9 = vld [vmem:[#allocation8 + $0x960] sm:$0xf]  ;;  %v9432_v14 = vor.u32 %v10331_v60, %v9431_v61  ;;  %v3215_v10 = vpop.f32.mrf.mxu0  ;;  %v10017_v60 = vld [vmem:[#allocation8 + $0xe4] sm:$0xf]  ;;  %v3202_v22 = vadd.f32 %v10980_v45, %v3188_v13 }
 0x2ac   :  { %v10291_v17 = vld [vmem:[#allocation8 + $0x96c] sm:$0xf0]  ;;  %v9575_v26 = vld [vmem:[#allocation8 + $0xbc0] sm:$0xf]  ;;  %v9144_v47 = vor.u32 %v10259_v4, %v9143_v40  ;;  %v10041_v13 = vld [vmem:[#allocation8 + $0x1a4] sm:$0xf] }
 0x2ad   :  { %5849 = vmatpush.bf16.msra.mxu0 %v9192_v3  ;;  %5863 = vmatpush.bf16.msra.mxu1 %v9320_v59  ;;  %v10367_v30 = vld [vmem:[#allocation8 + $0xbcc] sm:$0xf0]  ;;  %v9415_v39 = vld [vmem:[#allocation8 + $0xa80] sm:$0xf]  ;;  %v3229_v44 = vpop.f32.mrf.mxu1  ;;  %v9272_v33 = vor.u32 %v10291_v17, %v9271_v9 }
 0x2ae   :  { %5828 = vmatmul.bf16.vlgmr.msrb.gmra.mxu2 %v10984_v1  ;;  %5842 = vmatmul.bf16.vlgmr.msrb.gmra.mxu3 %v10986_v2  ;;  %v10327_v55 = vld [vmem:[#allocation8 + $0xa8c] sm:$0xf0]  ;;  %v9576_v24 = vor.u32 %v10367_v30, %v9575_v26  ;;  %v9127_v21 = vld [vmem:[#allocation8 + $0x840] sm:$0xf]  ;;  %v8313_v26 = vld [vmem:[#allocation8 + $0x1f0] sm:$0xf0] }
 0x2af   :  { %5876 = vmatpush.bf16.msra.mxu2 %v9464_v37  ;;  %5890 = vmatpush.bf16.msra.mxu3 %v9592_v31  ;;  %v10255_v27 = vld [vmem:[#allocation8 + $0x84c] sm:$0xf0]  ;;  %v9255_v42 = vld [vmem:[#allocation8 + $0x940] sm:$0xf]  ;;  %v9416_v59 = vor.u32 %v10327_v55, %v9415_v39  ;;  %v3204_v31 = vadd.f32 %v3203_v18, %v3190_v50 }
 0x2b0   :  { %v10287_v3 = vld [vmem:[#allocation8 + $0x94c] sm:$0xf0]  ;;  %v9559_v19 = vld [vmem:[#allocation8 + $0xba0] sm:$0xf]  ;;  %v9128_v35 = vor.u32 %v10255_v27, %v9127_v21 }
 0x2b1   :  { %5850 = vmatpush.bf16.msra.mxu0 %v9176_v46  ;;  %5864 = vmatpush.bf16.msra.mxu1 %v9304_v38  ;;  %v10363_v29 = vld [vmem:[#allocation8 + $0xbac] sm:$0xf0]  ;;  %v9399_v20 = vld [vmem:[#allocation8 + $0xa60] sm:$0xf]  ;;  %v9256_v56 = vor.u32 %v10287_v3, %v9255_v42  ;;  %v3243_v51 = vpop.f32.mrf.mxu2  ;;  %v3257_v52 = vpop.f32.mrf.mxu3  ;;  %v8316_v42 = vor.u32 %v10049_v11, %v8313_v26  ;;  %v8169_v3 = vld [vmem:[#allocation8 + $0xd0] sm:$0xf0] }
 0x2b2   :  { %v10323_v0 = vld [vmem:[#allocation8 + $0xa6c] sm:$0xf0]  ;;  %v9560_v34 = vor.u32 %v10363_v29, %v9559_v19  ;;  %v9111_v36 = vld [vmem:[#allocation8 + $0x820] sm:$0xf]  ;;  %v10045_v29 = vld [vmem:[#allocation8 + $0x1c4] sm:$0xf] }
 0x2b3   :  { %5877 = vmatpush.bf16.msra.mxu2 %v9448_v6  ;;  %5891 = vmatpush.bf16.msra.mxu3 %v9576_v24  ;;  %v10251_v57 = vld [vmem:[#allocation8 + $0x82c] sm:$0xf0]  ;;  %v9239_v37 = vld [vmem:[#allocation8 + $0x920] sm:$0xf]  ;;  %v9400_v54 = vor.u32 %v10323_v0, %v9399_v20  ;;  %v3217_v17 = vpop.f32.mrf.mxu0  ;;  %v8297_v20 = vld [vmem:[#allocation8 + $0x1d0] sm:$0xf0] }
 0x2b4   :  { %v10283_v7 = vld [vmem:[#allocation8 + $0x92c] sm:$0xf0]  ;;  %v9543_v46 = vld [vmem:[#allocation8 + $0xb80] sm:$0xf]  ;;  %v9112_v5 = vor.u32 %v10251_v57, %v9111_v36  ;;  %v8265_v26 = vld [vmem:[#allocation8 + $0x190] sm:$0xf0] }
 0x2b5   :  { %5851 = vmatpush.bf16.msra.mxu0 %v9160_v8  ;;  %5865 = vmatpush.bf16.msra.mxu1 %v9288_v53  ;;  %v10359_v38 = vld [vmem:[#allocation8 + $0xb8c] sm:$0xf0]  ;;  %v9383_v32 = vld [vmem:[#allocation8 + $0xa40] sm:$0xf]  ;;  %v9240_v25 = vor.u32 %v10283_v7, %v9239_v37  ;;  %v3230_v8 = vadd.f32 %v3229_v44, %v3215_v10  ;;  %v8185_v53 = vld [vmem:[#allocation8 + $0xf0] sm:$0xf0] }
 0x2b6   :  { %v10319_v16 = vld [vmem:[#allocation8 + $0xa4c] sm:$0xf0]  ;;  %v9544_v15 = vor.u32 %v10359_v38, %v9543_v46  ;;  %v9095_v6 = vld [vmem:[#allocation8 + $0x800] sm:$0xf]  ;;  %v3383_v37 = vld [vmem:[%s11172_s8 + $0x48] sm:$0xff] }
 0x2b7   :  { %5878 = vmatpush.bf16.msra.mxu2 %v9432_v14  ;;  %5892 = vmatpush.bf16.msra.mxu3 %v9560_v34  ;;  %v10247_v62 = vld [vmem:[#allocation8 + $0x80c] sm:$0xf0]  ;;  %v9223_v49 = vld [vmem:[#allocation8 + $0x900] sm:$0xf]  ;;  %v9384_v40 = vor.u32 %v10319_v16, %v9383_v32  ;;  %v3231_v14 = vpop.f32.mrf.mxu1  ;;  %v3244_v39 = vadd.f32 %v3243_v51, %v3230_v8  ;;  %v10081_v7 = vld [vmem:[#allocation8 + $0x2e4] sm:$0xf]  ;;  %v8300_v51 = vor.u32 %v10045_v29, %v8297_v20 }
 0x2b8   :  { %v10279_v61 = vld [vmem:[#allocation8 + $0x90c] sm:$0xf0]  ;;  %v9527_v4 = vld [vmem:[#allocation8 + $0xb60] sm:$0xf]  ;;  %v9096_v10 = vor.u32 %v10247_v62, %v9095_v6  ;;  %v3232_v27 = vadd.f32 %v3231_v14, %v3217_v17  ;;  %v8281_v6 = vld [vmem:[#allocation8 + $0x1b0] sm:$0xf0] }
 0x2b9   :  { %5852 = vmatpush.bf16.msra.mxu0 %v9144_v47  ;;  %5866 = vmatpush.bf16.msra.mxu1 %v9272_v33  ;;  %v10355_v9 = vld [vmem:[#allocation8 + $0xb6c] sm:$0xf0]  ;;  %v9367_v55 = vld [vmem:[#allocation8 + $0xa20] sm:$0xf]  ;;  %v9224_v44 = vor.u32 %v10279_v61, %v9223_v49  ;;  %v8188_v47 = vor.u32 %v10017_v60, %v8185_v53  ;;  %v10013_v33 = vld [vmem:[#allocation8 + $0xc4] sm:$0xf]  ;;  %v3245_v19 = vpop.f32.mrf.mxu2  ;;  %v3259_v41 = vpop.f32.mrf.mxu3 }
 0x2ba   :  { %v9528_v30 = vor.u32 %v10355_v9, %v9527_v4  ;;  %v10315_v24 = vld [vmem:[#allocation8 + $0xa2c] sm:$0xf0]  ;;  %v3382_v18 = vld [vmem:[%s11172_s8 + $0x40] sm:$0xff]  ;;  %v8172_v50 = vor.u32 %v10013_v33, %v8169_v3  ;;  %v8425_v53 = vld [vmem:[#allocation8 + $0x2d0] sm:$0xf0]  ;;  %v8284_v9 = vor.u32 %v10041_v13, %v8281_v6 }
 0x2bb   :  { %5879 = vmatpush.bf16.msra.mxu2 %v9416_v59  ;;  %5893 = vmatpush.bf16.msra.mxu3 %v9544_v15  ;;  %v3406_v21 = vadd.f32 %v3382_v18, %v3204_v31  ;;  %v9511_v45 = vld [vmem:[#allocation8 + $0xb40] sm:$0xf]  ;;  %v10351_v59 = vld [vmem:[#allocation8 + $0xb4c] sm:$0xf0]  ;;  %v9368_v0 = vor.u32 %v10315_v24, %v9367_v55  ;;  %v3394_v63 = vadd.f32 %v3382_v18, %v3202_v22  ;;  %v8153_v15 = vld [vmem:[#allocation8 + $0xb0] sm:$0xf0] }
 0x2bc   :  { %v9512_v34 = vor.u32 %v10351_v59, %v9511_v45  ;;  %v9351_v36 = vld [vmem:[#allocation8 + $0xa00] sm:$0xf]  ;;  %v10311_v57 = vld [vmem:[#allocation8 + $0xa0c] sm:$0xf0]  ;;  %v10005_v60 = vld [vmem:[#allocation8 + $0x84] sm:$0xf] }
 0x2bd   :  { %5853 = vmatpush.bf16.msra.mxu0 %v9128_v35  ;;  %5867 = vmatpush.bf16.msra.mxu1 %v9256_v56  ;;  %v3258_v35 = vadd.f32 %v3257_v52, %v3244_v39  ;;  %v3246_v56 = vadd.f32 %v3245_v19, %v3232_v27  ;;  %v11000_v46 = vpack.c.bf16 %v3406_v21, %v3394_v63  ;;  %v10009_v52 = vld [vmem:[#allocation8 + $0xa4] sm:$0xf]  ;;  %v9495_v32 = vld [vmem:[#allocation8 + $0xb20] sm:$0xf]  ;;  %v10347_v16 = vld [vmem:[#allocation8 + $0xb2c] sm:$0xf0] }
 0x2be   :  { %v9352_v62 = vor.u32 %v10311_v57, %v9351_v36  ;;  %v8137_v31 = vld [vmem:[#allocation8 + $0x90] sm:$0xf0]  ;;  %v10077_v8 = vld [vmem:[#allocation8 + $0x2c4] sm:$0xf]  ;;  %v8156_v4 = vor.u32 %v10009_v52, %v8153_v15  ;;  %v9479_v14 = vld [vmem:[#allocation8 + $0xb00] sm:$0xf] }
 0x2bf   :  { %5880 = vmatpush.bf16.msra.mxu2 %v9400_v54  ;;  %5894 = vmatpush.bf16.msra.mxu3 %v9528_v30  ;;  %v8441_v54 = vld [vmem:[#allocation8 + $0x2f0] sm:$0xf0]  ;;  %v3260_v38 = vadd.f32 %v3259_v41, %v3246_v56  ;;  %v10037_v17 = vld [vmem:[#allocation8 + $0x184] sm:$0xf]  ;;  %v10343_v11 = vld [vmem:[#allocation8 + $0xb0c] sm:$0xf0]  ;;  %v8428_v55 = vor.u32 %v10077_v8, %v8425_v53 }
 0x2c0   :  { %v8444_v61 = vor.u32 %v10081_v7, %v8441_v54  ;;  %v9480_v30 = vor.u32 %v10343_v11, %v9479_v14  ;;  %v10113_v22 = vld [vmem:[#allocation8 + $0x3e4] sm:$0xf]  ;;  %v8569_v39 = vld [vmem:[#allocation8 + $0x3f0] sm:$0xf0] }
 0x2c1   :  { %5854 = vmatpush.bf16.msra.mxu0 %v9112_v5  ;;  %5868 = vmatpush.bf16.msra.mxu1 %v9240_v25  ;;  %v9496_v5 = vor.u32 %v10347_v16, %v9495_v32  ;;  %v3395_v25 = vadd.f32 %v3383_v37, %v3258_v35  ;;  %v3407_v49 = vadd.f32 %v3383_v37, %v3260_v38  ;;  %v10073_v18 = vld [vmem:[#allocation8 + $0x2a4] sm:$0xf]  ;;  %v8121_v21 = vld [vmem:[#allocation8 + $0x70] sm:$0xf0] }
 0x2c2   :  { %v8572_v24 = vor.u32 %v10113_v22, %v8569_v39  ;;  %v10001_v33 = vld [vmem:[#allocation8 + $0x64] sm:$0xf]  ;;  %v8553_v45 = vld [vmem:[#allocation8 + $0x3d0] sm:$0xf0] }
 0x2c3   :  { %5881 = vmatpush.bf16.msra.mxu2 %v9384_v40  ;;  %5895 = vmatpush.bf16.msra.mxu3 %v9512_v34  ;;  %v11003_v40 = vpack.c.bf16 %v3407_v49, %v3395_v25  ;;  %v10033_v27 = vld [vmem:[#allocation8 + $0x164] sm:$0xf]  ;;  %v8393_v20 = vld [vmem:[#allocation8 + $0x290] sm:$0xf0] }
 0x2c4   :  { %v10109_v3 = vld [vmem:[#allocation8 + $0x3c4] sm:$0xf]  ;;  %v8105_v35 = vld [vmem:[#allocation8 + $0x50] sm:$0xf0] }
 0x2c5   :  { %5855 = vmatpush.bf16.msra.mxu0 %v9096_v10  ;;  %5869 = vmatpush.bf16.msra.mxu1 %v9224_v44  ;;  %v8409_v10 = vld [vmem:[#allocation8 + $0x2b0] sm:$0xf0]  ;;  %v8140_v44 = vor.u32 %v10005_v60, %v8137_v31  ;;  %v8556_v19 = vor.u32 %v10109_v3, %v8553_v45  ;;  %v10069_v29 = vld [vmem:[#allocation8 + $0x284] sm:$0xf]  ;;  %v3271_v36 = vpop.f32.mrf.mxu0  ;;  %v3285_v57 = vpop.f32.mrf.mxu1 }
 0x2c6   :  { %v8412_v59 = vor.u32 %v10073_v18, %v8409_v10  ;;  %v9997_v63 = vld [vmem:[#allocation8 + $0x44] sm:$0xf]  ;;  %v8233_v37 = vld [vmem:[#allocation8 + $0x150] sm:$0xf0]  ;;  %v8396_v7 = vor.u32 %v10069_v29, %v8393_v20  ;;  %v3286_v39 = vadd.f32 %v3285_v57, %v3271_v36 }
 0x2c7   :  { %5882 = vmatpush.bf16.msra.mxu2 %v9368_v0  ;;  %5896 = vmatpush.bf16.msra.mxu3 %v9496_v5  ;;  %v8124_v0 = vor.u32 %v10001_v33, %v8121_v21  ;;  %v10029_v56 = vld [vmem:[#allocation8 + $0x144] sm:$0xf]  ;;  %v8108_v52 = vor.u32 %v9997_v63, %v8105_v35  ;;  %v8089_v15 = vld [vmem:[#allocation8 + $0x30] sm:$0xf0] }
 0x2c8   :  { %5856 = vmatmul.bf16.vlgmr.msra.gmra.mxu0 %v11000_v46  ;;  %5870 = vmatmul.bf16.vlgmr.msra.gmra.mxu1 %v11003_v40  ;;  %v10105_v41 = vld [vmem:[#allocation8 + $0x3a4] sm:$0xf]  ;;  %v8236_v32 = vor.u32 %v10029_v56, %v8233_v37  ;;  %v8217_v6 = vld [vmem:[#allocation8 + $0x130] sm:$0xf0] }
 0x2c9   :  { %5904 = vmatpush.bf16.msrb.mxu0 %v8188_v47  ;;  %5918 = vmatpush.bf16.msrb.mxu1 %v8316_v42  ;;  %v8268_v47 = vor.u32 %v10037_v17, %v8265_v26  ;;  %v8249_v42 = vld [vmem:[#allocation8 + $0x170] sm:$0xf0]  ;;  %v10065_v38 = vld [vmem:[#allocation8 + $0x264] sm:$0xf] }
 0x2ca   :  { %v8252_v34 = vor.u32 %v10033_v27, %v8249_v42  ;;  %v9993_v16 = vld [vmem:[#allocation8 + $0x24] sm:$0xf]  ;;  %v8521_v5 = vld [vmem:[#allocation8 + $0x390] sm:$0xf0] }
 0x2cb   :  { %5883 = vmatpush.bf16.msra.mxu2 %v9352_v62  ;;  %5897 = vmatpush.bf16.msra.mxu3 %v9480_v30  ;;  %v10025_v13 = vld [vmem:[#allocation8 + $0x124] sm:$0xf]  ;;  %v8361_v53 = vld [vmem:[#allocation8 + $0x250] sm:$0xf0] }
 0x2cc   :  { %v10101_v62 = vld [vmem:[#allocation8 + $0x384] sm:$0xf]  ;;  %v8073_v17 = vld [vmem:[#allocation8 + $0x10] sm:$0xf0] }
 0x2cd   :  { %5905 = vmatpush.bf16.msrb.mxu0 %v8172_v50  ;;  %5919 = vmatpush.bf16.msrb.mxu1 %v8300_v51  ;;  %v8537_v50 = vld [vmem:[#allocation8 + $0x3b0] sm:$0xf0]  ;;  %v8524_v49 = vor.u32 %v10101_v62, %v8521_v5  ;;  %v9989_v31 = vld [vmem:[#allocation8 + $0x4] sm:$0xf]  ;;  %v3287_v33 = vpop.f32.mrf.mxu1 }
 0x2ce   :  { %v8540_v54 = vor.u32 %v10105_v41, %v8537_v50  ;;  %v8377_v51 = vld [vmem:[#allocation8 + $0x270] sm:$0xf0]  ;;  %v10061_v8 = vld [vmem:[#allocation8 + $0x244] sm:$0xf]  ;;  %v8076_v3 = vor.u32 %v9989_v31, %v8073_v17 }
 0x2cf   :  { %5932 = vmatpush.bf16.msrb.mxu2 %v8444_v61  ;;  %5946 = vmatpush.bf16.msrb.mxu3 %v8572_v24  ;;  %v8380_v25 = vor.u32 %v10065_v38, %v8377_v51  ;;  %v10021_v14 = vld [vmem:[#allocation8 + $0x104] sm:$0xf]  ;;  %v8201_v11 = vld [vmem:[#allocation8 + $0x110] sm:$0xf0]  ;;  %v8364_v10 = vor.u32 %v10061_v8, %v8361_v53 }
 0x2d0   :  { %v10145_v26 = vld [vmem:[#allocation8 + $0x4e4] sm:$0xf]  ;;  %v8505_v22 = vld [vmem:[#allocation8 + $0x370] sm:$0xf0]  ;;  %v8204_v45 = vor.u32 %v10021_v14, %v8201_v11 }
 0x2d1   :  { %5906 = vmatpush.bf16.msrb.mxu0 %v8156_v4  ;;  %5920 = vmatpush.bf16.msrb.mxu1 %v8284_v9  ;;  %v3299_v61 = vpop.f32.mrf.mxu2  ;;  %v3313_v60 = vpop.f32.mrf.mxu3  ;;  %v8092_v4 = vor.u32 %v9993_v16, %v8089_v15  ;;  %v8220_v9 = vor.u32 %v10025_v13, %v8217_v6  ;;  %v10097_v30 = vld [vmem:[#allocation8 + $0x364] sm:$0xf]  ;;  %v8825_v18 = vld [vmem:[#allocation8 + $0x5f0] sm:$0xf0] }
 0x2d2   :  { %v10177_v24 = vld [vmem:[#allocation8 + $0x5e4] sm:$0xf]  ;;  %v8345_v27 = vld [vmem:[#allocation8 + $0x230] sm:$0xf0]  ;;  %v3300_v42 = vadd.f32 %v3299_v61, %v3286_v39 }
 0x2d3   :  { %5933 = vmatpush.bf16.msrb.mxu2 %v8428_v55  ;;  %5947 = vmatpush.bf16.msrb.mxu3 %v8556_v19  ;;  %v8697_v55 = vld [vmem:[#allocation8 + $0x4f0] sm:$0xf0]  ;;  %v10057_v21 = vld [vmem:[#allocation8 + $0x224] sm:$0xf]  ;;  %v8828_v19 = vor.u32 %v10177_v24, %v8825_v18 }
 0x2d4   :  { %v10141_v29 = vld [vmem:[#allocation8 + $0x4c4] sm:$0xf]  ;;  %v8681_v63 = vld [vmem:[#allocation8 + $0x4d0] sm:$0xf0]  ;;  %v8348_v36 = vor.u32 %v10057_v21, %v8345_v27 }
 0x2d5   :  { %5907 = vmatpush.bf16.msrb.mxu0 %v8140_v44  ;;  %5921 = vmatpush.bf16.msrb.mxu1 %v8268_v47  ;;  %v8508_v44 = vor.u32 %v10097_v30, %v8505_v22  ;;  %v3273_v47 = vpop.f32.mrf.mxu0  ;;  %v10093_v20 = vld [vmem:[#allocation8 + $0x344] sm:$0xf]  ;;  %v8809_v56 = vld [vmem:[#allocation8 + $0x5d0] sm:$0xf0] }
 0x2d6   :  { %v10173_v35 = vld [vmem:[#allocation8 + $0x5c4] sm:$0xf]  ;;  %v8329_v50 = vld [vmem:[#allocation8 + $0x210] sm:$0xf0] }
 0x2d7   :  { %5934 = vmatpush.bf16.msrb.mxu2 %v8412_v59  ;;  %5948 = vmatpush.bf16.msrb.mxu3 %v8540_v54  ;;  %v8700_v59 = vor.u32 %v10145_v26, %v8697_v55  ;;  %v10053_v41 = vld [vmem:[#allocation8 + $0x204] sm:$0xf]  ;;  %v3384_v54 = vld [vmem:[%s11172_s8 + $0x50] sm:$0xff] }
 0x2d8   :  { %v10137_v16 = vld [vmem:[#allocation8 + $0x4a4] sm:$0xf]  ;;  %v8473_v13 = vld [vmem:[#allocation8 + $0x330] sm:$0xf0] }
 0x2d9   :  { %5908 = vmatpush.bf16.msrb.mxu0 %v8124_v0  ;;  %5922 = vmatpush.bf16.msrb.mxu1 %v8252_v34  ;;  %v8489_v0 = vld [vmem:[#allocation8 + $0x350] sm:$0xf0]  ;;  %v3288_v34 = vadd.f32 %v3287_v33, %v3273_v47  ;;  %v3301_v37 = vpop.f32.mrf.mxu2  ;;  %v3315_v51 = vpop.f32.mrf.mxu3  ;;  %v10089_v15 = vld [vmem:[#allocation8 + $0x324] sm:$0xf] }
 0x2da   :  { %v8492_v57 = vor.u32 %v10093_v20, %v8489_v0  ;;  %v8665_v62 = vld [vmem:[#allocation8 + $0x4b0] sm:$0xf0]  ;;  %v10169_v5 = vld [vmem:[#allocation8 + $0x5a4] sm:$0xf]  ;;  %v8476_v61 = vor.u32 %v10089_v15, %v8473_v13 }
 0x2db   :  { %5935 = vmatpush.bf16.msrb.mxu2 %v8396_v7  ;;  %5949 = vmatpush.bf16.msrb.mxu3 %v8524_v49  ;;  %v3314_v7 = vadd.f32 %v3313_v60, %v3300_v42  ;;  %v3302_v38 = vadd.f32 %v3301_v37, %v3288_v34  ;;  %v8332_v49 = vor.u32 %v10053_v41, %v8329_v50  ;;  %v10209_v60 = vld [vmem:[#allocation8 + $0x6e4] sm:$0xf]  ;;  %v8953_v31 = vld [vmem:[#allocation8 + $0x6f0] sm:$0xf0] }
 0x2dc   :  { %v10133_v17 = vld [vmem:[#allocation8 + $0x484] sm:$0xf]  ;;  %v8457_v11 = vld [vmem:[#allocation8 + $0x310] sm:$0xf0]  ;;  %v8956_v30 = vor.u32 %v10209_v60, %v8953_v31 }
 0x2dd   :  { %5909 = vmatpush.bf16.msrb.mxu0 %v8108_v52  ;;  %5923 = vmatpush.bf16.msrb.mxu1 %v8236_v32  ;;  %v8684_v52 = vor.u32 %v10141_v29, %v8681_v63  ;;  %v8812_v32 = vor.u32 %v10173_v35, %v8809_v56  ;;  %v3316_v6 = vadd.f32 %v3315_v51, %v3302_v38  ;;  %v10085_v14 = vld [vmem:[#allocation8 + $0x304] sm:$0xf]  ;;  %v8649_v22 = vld [vmem:[#allocation8 + $0x490] sm:$0xf0] }
 0x2de   :  { %v3396_v8 = vadd.f32 %v3384_v54, %v3314_v7  ;;  %v10165_v39 = vld [vmem:[#allocation8 + $0x584] sm:$0xf]  ;;  %v8777_v55 = vld [vmem:[#allocation8 + $0x590] sm:$0xf0]  ;;  %v8460_v24 = vor.u32 %v10085_v14, %v8457_v11 }
 0x2df   :  { %5936 = vmatpush.bf16.msrb.mxu2 %v8380_v25  ;;  %5950 = vmatpush.bf16.msrb.mxu3 %v8508_v44  ;;  %v8793_v25 = vld [vmem:[#allocation8 + $0x5b0] sm:$0xf0]  ;;  %v3408_v53 = vadd.f32 %v3384_v54, %v3316_v6  ;;  %v10205_v18 = vld [vmem:[#allocation8 + $0x6c4] sm:$0xf]  ;;  %v8652_v44 = vor.u32 %v10133_v17, %v8649_v22  ;;  %v8780_v47 = vor.u32 %v10165_v39, %v8777_v55 }
 0x2e0   :  { %v10129_v33 = vld [vmem:[#allocation8 + $0x464] sm:$0xf]  ;;  %v8633_v27 = vld [vmem:[#allocation8 + $0x470] sm:$0xf0] }
 0x2e1   :  { %5910 = vmatpush.bf16.msrb.mxu0 %v8092_v4  ;;  %5924 = vmatpush.bf16.msrb.mxu1 %v8220_v9  ;;  %v8668_v4 = vor.u32 %v10137_v16, %v8665_v62  ;;  %v8796_v9 = vor.u32 %v10169_v5, %v8793_v25  ;;  %v11011_v26 = vpack.c.bf16 %v3408_v53, %v3396_v8  ;;  %v10161_v42 = vld [vmem:[#allocation8 + $0x564] sm:$0xf]  ;;  %v8617_v34 = vld [vmem:[#allocation8 + $0x450] sm:$0xf0] }
 0x2e2   :  { %v10125_v20 = vld [vmem:[#allocation8 + $0x444] sm:$0xf]  ;;  %v8745_v35 = vld [vmem:[#allocation8 + $0x550] sm:$0xf0] }
 0x2e3   :  { %5937 = vmatpush.bf16.msrb.mxu2 %v8364_v10  ;;  %5951 = vmatpush.bf16.msrb.mxu3 %v8492_v57  ;;  %v8937_v10 = vld [vmem:[#allocation8 + $0x6d0] sm:$0xf0]  ;;  %v10157_v63 = vld [vmem:[#allocation8 + $0x544] sm:$0xf]  ;;  %v8620_v41 = vor.u32 %v10125_v20, %v8617_v34 }
 0x2e4   :  { %5884 = vmatmul.bf16.vlgmr.msra.gmra.mxu2 %v11011_v26  ;;  %v8940_v21 = vor.u32 %v10205_v18, %v8937_v10  ;;  %v10197_v57 = vld [vmem:[#allocation8 + $0x684] sm:$0xf]  ;;  %v8905_v37 = vld [vmem:[#allocation8 + $0x690] sm:$0xf0]  ;;  %v8748_v50 = vor.u32 %v10157_v63, %v8745_v35  ;;  %v3385_v63 = vld [vmem:[%s11172_s8 + $0x58] sm:$0xff] }
 0x2e5   :  { %5911 = vmatpush.bf16.msrb.mxu0 %v8076_v3  ;;  %5925 = vmatpush.bf16.msrb.mxu1 %v8204_v45  ;;  %v8761_v3 = vld [vmem:[#allocation8 + $0x570] sm:$0xf0]  ;;  %v10201_v45 = vld [vmem:[#allocation8 + $0x6a4] sm:$0xf]  ;;  %v3327_v56 = vpop.f32.mrf.mxu0  ;;  %v8908_v54 = vor.u32 %v10197_v57, %v8905_v37 }
 0x2e6   :  { %v8764_v29 = vor.u32 %v10161_v42, %v8761_v3  ;;  %v10121_v7 = vld [vmem:[#allocation8 + $0x424] sm:$0xf]  ;;  %v8601_v38 = vld [vmem:[#allocation8 + $0x430] sm:$0xf0] }
 0x2e7   :  { %5938 = vmatpush.bf16.msrb.mxu2 %v8348_v36  ;;  %5952 = vmatpush.bf16.msrb.mxu3 %v8476_v61  ;;  %v3341_v36 = vpop.f32.mrf.mxu1  ;;  %v10153_v51 = vld [vmem:[#allocation8 + $0x524] sm:$0xf]  ;;  %v8889_v16 = vld [vmem:[#allocation8 + $0x670] sm:$0xf0]  ;;  %v8604_v6 = vor.u32 %v10121_v7, %v8601_v38 }
 0x2e8   :  { %5912 = vmatmul.bf16.vlgmr.msrb.gmra.mxu0 %v10894_v23  ;;  %5926 = vmatmul.bf16.vlgmr.msrb.gmra.mxu1 %v10896_v12  ;;  %v10117_v5 = vld [vmem:[#allocation8 + $0x404] sm:$0xf]  ;;  %v8585_v25 = vld [vmem:[#allocation8 + $0x410] sm:$0xf0] }
 0x2e9   :  { %5960 = vmatpush.bf16.msra.mxu0 %v8700_v59  ;;  %5974 = vmatpush.bf16.msra.mxu1 %v8828_v19  ;;  %v8921_v59 = vld [vmem:[#allocation8 + $0x6b0] sm:$0xf0]  ;;  %v8636_v19 = vor.u32 %v10129_v33, %v8633_v27  ;;  %v10149_v61 = vld [vmem:[#allocation8 + $0x504] sm:$0xf]  ;;  %v8588_v22 = vor.u32 %v10117_v5, %v8585_v25 }
 0x2ea   :  { %v8924_v0 = vor.u32 %v10201_v45, %v8921_v59  ;;  %v8713_v60 = vld [vmem:[#allocation8 + $0x510] sm:$0xf0]  ;;  %v10273_v31 = vld [vmem:[#allocation8 + $0x8e4] sm:$0xf] }
 0x2eb   :  { %5939 = vmatpush.bf16.msrb.mxu2 %v8332_v49  ;;  %5953 = vmatpush.bf16.msrb.mxu3 %v8460_v24  ;;  %v9209_v8 = vld [vmem:[#allocation8 + $0x8f0] sm:$0xf0]  ;;  %v10305_v53 = vld [vmem:[#allocation8 + $0x9e4] sm:$0xf]  ;;  %v8716_v39 = vor.u32 %v10149_v61, %v8713_v60 }
 0x2ec   :  { %v10189_v17 = vld [vmem:[#allocation8 + $0x644] sm:$0xf]  ;;  %v8873_v14 = vld [vmem:[#allocation8 + $0x650] sm:$0xf0]  ;;  %v9212_v24 = vor.u32 %v10273_v31, %v9209_v8 }
 0x2ed   :  { %5961 = vmatpush.bf16.msra.mxu0 %v8684_v52  ;;  %5975 = vmatpush.bf16.msra.mxu1 %v8812_v32  ;;  %v8729_v52 = vld [vmem:[#allocation8 + $0x530] sm:$0xf0]  ;;  %v10193_v32 = vld [vmem:[#allocation8 + $0x664] sm:$0xf]  ;;  %v3329_v11 = vpop.f32.mrf.mxu0 }
 0x2ee   :  { %v8732_v62 = vor.u32 %v10153_v51, %v8729_v52  ;;  %v8892_v49 = vor.u32 %v10193_v32, %v8889_v16  ;;  %v10269_v10 = vld [vmem:[#allocation8 + $0x8c4] sm:$0xf]  ;;  %v8857_v3 = vld [vmem:[#allocation8 + $0x630] sm:$0xf0] }
 0x2ef   :  { %5988 = vmatpush.bf16.msra.mxu2 %v8956_v30  ;;  %v3343_v30 = vpop.f32.mrf.mxu1  ;;  %v10301_v33 = vld [vmem:[#allocation8 + $0x9c4] sm:$0xf]  ;;  %v9177_v34 = vld [vmem:[#allocation8 + $0x8b0] sm:$0xf0] }
 0x2f0   :  { %v3344_v27 = vadd.f32 %v3343_v30, %v3329_v11  ;;  %v10185_v42 = vld [vmem:[#allocation8 + $0x624] sm:$0xf]  ;;  %v9305_v57 = vld [vmem:[#allocation8 + $0x9b0] sm:$0xf0] }
 0x2f1   :  { %5962 = vmatpush.bf16.msra.mxu0 %v8668_v4  ;;  %5976 = vmatpush.bf16.msra.mxu1 %v8796_v9  ;;  %v3355_v15 = vpop.f32.mrf.mxu2  ;;  %v3369_v13 = vpop.f32.mrf.mxu3  ;;  %v9337_v4 = vld [vmem:[#allocation8 + $0x9f0] sm:$0xf0]  ;;  %v3342_v9 = vadd.f32 %v3341_v36, %v3327_v56  ;;  %v8860_v56 = vor.u32 %v10185_v42, %v8857_v3  ;;  %v10297_v36 = vld [vmem:[#allocation8 + $0x9a4] sm:$0xf] }
 0x2f2   :  { %v9340_v18 = vor.u32 %v10305_v53, %v9337_v4  ;;  %v10241_v7 = vld [vmem:[#allocation8 + $0x7e4] sm:$0xf]  ;;  %v9081_v38 = vld [vmem:[#allocation8 + $0x7f0] sm:$0xf0] }
 0x2f3   :  { %5989 = vmatpush.bf16.msra.mxu2 %v8940_v21  ;;  %v3356_v55 = vadd.f32 %v3355_v15, %v3342_v9  ;;  %v9321_v21 = vld [vmem:[#allocation8 + $0x9d0] sm:$0xf0]  ;;  %v10337_v51 = vld [vmem:[#allocation8 + $0xae4] sm:$0xf]  ;;  %v9308_v15 = vor.u32 %v10297_v36, %v9305_v57  ;;  %v9084_v61 = vor.u32 %v10241_v7, %v9081_v38 }
 0x2f4   :  { %5940 = vmatmul.bf16.vlgmr.msrb.gmra.mxu2 %v10914_v58  ;;  %v9324_v20 = vor.u32 %v10301_v33, %v9321_v21  ;;  %v9465_v52 = vld [vmem:[#allocation8 + $0xaf0] sm:$0xf0]  ;;  %v10293_v5 = vld [vmem:[#allocation8 + $0x984] sm:$0xf] }
 0x2f5   :  { %5963 = vmatpush.bf16.msra.mxu0 %v8652_v44  ;;  %5977 = vmatpush.bf16.msra.mxu1 %v8780_v47  ;;  %v9193_v44 = vld [vmem:[#allocation8 + $0x8d0] sm:$0xf0]  ;;  %v8876_v47 = vor.u32 %v10189_v17, %v8873_v14  ;;  %v9468_v60 = vor.u32 %v10337_v51, %v9465_v52  ;;  %v10237_v31 = vld [vmem:[#allocation8 + $0x7c4] sm:$0xf] }
 0x2f6   :  { %v9196_v59 = vor.u32 %v10269_v10, %v9193_v44  ;;  %v9289_v25 = vld [vmem:[#allocation8 + $0x990] sm:$0xf0]  ;;  %v10333_v53 = vld [vmem:[#allocation8 + $0xac4] sm:$0xf] }
 0x2f7   :  { %5990 = vmatpush.bf16.msra.mxu2 %v8924_v0  ;;  %v10265_v0 = vld [vmem:[#allocation8 + $0x8a4] sm:$0xf]  ;;  %v9065_v8 = vld [vmem:[#allocation8 + $0x7d0] sm:$0xf0]  ;;  %v9292_v17 = vor.u32 %v10293_v5, %v9289_v25 }
 0x2f8   :  { %v9449_v4 = vld [vmem:[#allocation8 + $0xad0] sm:$0xf0]  ;;  %v10257_v14 = vld [vmem:[#allocation8 + $0x864] sm:$0xf] }
 0x2f9   :  { %5964 = vmatpush.bf16.msra.mxu0 %v8636_v19  ;;  %5978 = vmatpush.bf16.msra.mxu1 %v8764_v29  ;;  %v3357_v45 = vpop.f32.mrf.mxu2  ;;  %v3370_v19 = vadd.f32 %v3369_v13, %v3356_v55  ;;  %v3371_v35 = vpop.f32.mrf.mxu3  ;;  %v10261_v13 = vld [vmem:[#allocation8 + $0x884] sm:$0xf]  ;;  %v9145_v11 = vld [vmem:[#allocation8 + $0x870] sm:$0xf0]  ;;  %v9452_v55 = vor.u32 %v10333_v53, %v9449_v4 }
 0x2fa   :  { %v3358_v29 = vadd.f32 %v3357_v45, %v3344_v27  ;;  %v10289_v30 = vld [vmem:[#allocation8 + $0x964] sm:$0xf]  ;;  %v9433_v44 = vld [vmem:[#allocation8 + $0xab0] sm:$0xf0] }
 0x2fb   :  { %5991 = vmatpush.bf16.msra.mxu2 %v8908_v54  ;;  %v9180_v54 = vor.u32 %v10265_v0, %v9177_v34  ;;  %v3397_v32 = vadd.f32 %v3385_v63, %v3370_v19  ;;  %v10329_v10 = vld [vmem:[#allocation8 + $0xaa4] sm:$0xf]  ;;  %v9129_v27 = vld [vmem:[#allocation8 + $0x850] sm:$0xf0] }
 0x2fc   :  { %v3372_v37 = vadd.f32 %v3371_v35, %v3358_v29  ;;  %v10253_v21 = vld [vmem:[#allocation8 + $0x844] sm:$0xf]  ;;  %v9257_v3 = vld [vmem:[#allocation8 + $0x950] sm:$0xf0] }
 0x2fd   :  { %5965 = vmatpush.bf16.msra.mxu0 %v8620_v41  ;;  %5979 = vmatpush.bf16.msra.mxu1 %v8748_v50  ;;  %v10181_v41 = vld [vmem:[#allocation8 + $0x604] sm:$0xf]  ;;  %v8841_v50 = vld [vmem:[#allocation8 + $0x610] sm:$0xf0]  ;;  %v9132_v34 = vor.u32 %v10253_v21, %v9129_v27 }
 0x2fe   :  { %v3409_v16 = vadd.f32 %v3385_v63, %v3372_v37  ;;  %v10285_v42 = vld [vmem:[#allocation8 + $0x944] sm:$0xf]  ;;  %v9033_v29 = vld [vmem:[#allocation8 + $0x790] sm:$0xf0] }
 0x2ff   :  { %5992 = vmatpush.bf16.msra.mxu2 %v8892_v49  ;;  %v10229_v19 = vld [vmem:[#allocation8 + $0x784] sm:$0xf]  ;;  %v9417_v0 = vld [vmem:[#allocation8 + $0xa90] sm:$0xf0]  ;;  %v9260_v63 = vor.u32 %v10285_v42, %v9257_v3  ;;  %v8159_v42 = vld [vmem:[#allocation8 + $0xa8] sm:$0xf] }
 0x300   :  { %v11020_v49 = vpack.c.bf16 %v3409_v16, %v3397_v32  ;;  %v10249_v35 = vld [vmem:[#allocation8 + $0x824] sm:$0xf]  ;;  %v9241_v57 = vld [vmem:[#allocation8 + $0x930] sm:$0xf0]  ;;  %v9036_v37 = vor.u32 %v10229_v19, %v9033_v29  ;;  %v10012_v3 = vld [vmem:[#allocation8 + $0xb4] sm:$0xf0] }
 0x301   :  { %5966 = vmatpush.bf16.msra.mxu0 %v8604_v6  ;;  %5980 = vmatpush.bf16.msra.mxu1 %v8732_v62  ;;  %v8844_v6 = vor.u32 %v10181_v41, %v8841_v50  ;;  %v9161_v62 = vld [vmem:[#allocation8 + $0x890] sm:$0xf0]  ;;  %v10281_v36 = vld [vmem:[#allocation8 + $0x924] sm:$0xf]  ;;  %v10044_v29 = vld [vmem:[#allocation8 + $0x1b4] sm:$0xf0] }
 0x302   :  { %v9164_v9 = vor.u32 %v10261_v13, %v9161_v62  ;;  %5898 = vmatmul.bf16.vlgmr.msra.gmra.mxu3 %v11020_v49  ;;  %v10225_v50 = vld [vmem:[#allocation8 + $0x764] sm:$0xf]  ;;  %v9017_v7 = vld [vmem:[#allocation8 + $0x770] sm:$0xf0]  ;;  %v9244_v52 = vor.u32 %v10281_v36, %v9241_v57  ;;  %v10020_v62 = vld [vmem:[#allocation8 + $0xf4] sm:$0xf0] }
 0x303   :  { %5993 = vmatpush.bf16.msra.mxu2 %v8876_v47  ;;  %6002 = vmatpush.bf16.msra.mxu3 %v9084_v61  ;;  %v9148_v47 = vor.u32 %v10257_v14, %v9145_v11  ;;  %v9401_v38 = vld [vmem:[#allocation8 + $0xa70] sm:$0xf0]  ;;  %v10245_v32 = vld [vmem:[#allocation8 + $0x804] sm:$0xf]  ;;  %v9020_v5 = vor.u32 %v10225_v50, %v9017_v7  ;;  %v8319_v61 = vld [vmem:[#allocation8 + $0x1e8] sm:$0xf] }
 0x304   :  { %v9097_v16 = vld [vmem:[#allocation8 + $0x810] sm:$0xf0]  ;;  %v10317_v53 = vld [vmem:[#allocation8 + $0xa44] sm:$0xf]  ;;  %v8447_v36 = vld [vmem:[#allocation8 + $0x2e8] sm:$0xf] }
 0x305   :  { %5967 = vmatpush.bf16.msra.mxu0 %v8588_v22  ;;  %5981 = vmatpush.bf16.msra.mxu1 %v8716_v39  ;;  %v9273_v22 = vld [vmem:[#allocation8 + $0x970] sm:$0xf0]  ;;  %v9068_v39 = vor.u32 %v10237_v31, %v9065_v8  ;;  %v10221_v31 = vld [vmem:[#allocation8 + $0x744] sm:$0xf]  ;;  %v10084_v57 = vld [vmem:[#allocation8 + $0x2f4] sm:$0xf0] }
 0x306   :  { %v9276_v33 = vor.u32 %v10289_v30, %v9273_v22  ;;  %v9225_v13 = vld [vmem:[#allocation8 + $0x910] sm:$0xf0]  ;;  %v8175_v30 = vld [vmem:[#allocation8 + $0xc8] sm:$0xf]  ;;  %v10016_v22 = vld [vmem:[#allocation8 + $0xd4] sm:$0xf0] }
 0x307   :  { %5994 = vmatpush.bf16.msra.mxu2 %v8860_v56  ;;  %6003 = vmatpush.bf16.msra.mxu3 %v9068_v39  ;;  %v9113_v56 = vld [vmem:[#allocation8 + $0x830] sm:$0xf0]  ;;  %v8176_v21 = vor.u32 %v10016_v22, %v8175_v30  ;;  %v8143_v50 = vld [vmem:[#allocation8 + $0x88] sm:$0xf] }
 0x308   :  { %5968 = vmatmul.bf16.vlgmr.msra.gmra.mxu0 %v10966_v43  ;;  %5982 = vmatmul.bf16.vlgmr.msra.gmra.mxu1 %v10968_v28  ;;  %v9116_v51 = vor.u32 %v10249_v35, %v9113_v56  ;;  %v9001_v8 = vld [vmem:[#allocation8 + $0x750] sm:$0xf0]  ;;  %v10369_v35 = vld [vmem:[#allocation8 + $0xbe4] sm:$0xf] }
 0x309   :  { %6016 = vmatpush.bf16.msrb.mxu0 %v9212_v24  ;;  %6030 = vmatpush.bf16.msrb.mxu1 %v9340_v18  ;;  %v10233_v24 = vld [vmem:[#allocation8 + $0x7a4] sm:$0xf]  ;;  %v9049_v18 = vld [vmem:[#allocation8 + $0x7b0] sm:$0xf0]  ;;  %v9004_v39 = vor.u32 %v10221_v31, %v9001_v8  ;;  %v8255_v31 = vld [vmem:[#allocation8 + $0x168] sm:$0xf] }
 0x30a   :  { %v9052_v45 = vor.u32 %v10233_v24, %v9049_v18  ;;  %v9385_v4 = vld [vmem:[#allocation8 + $0xa50] sm:$0xf0]  ;;  %v8303_v24 = vld [vmem:[#allocation8 + $0x1c8] sm:$0xf]  ;;  %v10048_v18 = vld [vmem:[#allocation8 + $0x1d4] sm:$0xf0] }
 0x30b   :  { %5995 = vmatpush.bf16.msra.mxu2 %v8844_v6  ;;  %v8191_v6 = vld [vmem:[#allocation8 + $0xe8] sm:$0xf]  ;;  %v8304_v27 = vor.u32 %v10048_v18, %v8303_v24  ;;  %v9593_v56 = vld [vmem:[#allocation8 + $0xbf0] sm:$0xf0]  ;;  %v10036_v8 = vld [vmem:[#allocation8 + $0x174] sm:$0xf0] }
 0x30c   :  { %6004 = vmatpush.bf16.msra.mxu3 %v9052_v45  ;;  %v8192_v14 = vor.u32 %v10020_v62, %v8191_v6  ;;  %v8287_v45 = vld [vmem:[#allocation8 + $0x1a8] sm:$0xf]  ;;  %v10080_v62 = vld [vmem:[#allocation8 + $0x2d4] sm:$0xf0]  ;;  %v8256_v22 = vor.u32 %v10036_v8, %v8255_v31 }
 0x30d   :  { %6017 = vmatpush.bf16.msrb.mxu0 %v9196_v59  ;;  %6031 = vmatpush.bf16.msrb.mxu1 %v9324_v20  ;;  %v9436_v59 = vor.u32 %v10329_v10, %v9433_v44  ;;  %v10325_v20 = vld [vmem:[#allocation8 + $0xa84] sm:$0xf]  ;;  %v8985_v44 = vld [vmem:[#allocation8 + $0x730] sm:$0xf0]  ;;  %v8431_v6 = vld [vmem:[#allocation8 + $0x2c8] sm:$0xf] }
 0x30e   :  { %5996 = vmatmul.bf16.vlgmr.msra.gmra.mxu2 %v10984_v1  ;;  %v9420_v41 = vor.u32 %v10325_v20, %v9417_v0  ;;  %v10217_v10 = vld [vmem:[#allocation8 + $0x724] sm:$0xf]  ;;  %v8969_v0 = vld [vmem:[#allocation8 + $0x710] sm:$0xf0]  ;;  %v8239_v24 = vld [vmem:[#allocation8 + $0x148] sm:$0xf] }
 0x30f   :  { %6044 = vmatpush.bf16.msrb.mxu2 %v9468_v60  ;;  %v10052_v60 = vld [vmem:[#allocation8 + $0x1f4] sm:$0xf0]  ;;  %v10213_v20 = vld [vmem:[#allocation8 + $0x704] sm:$0xf]  ;;  %v8687_v31 = vld [vmem:[#allocation8 + $0x4c8] sm:$0xf] }
 0x310   :  { %6005 = vmatpush.bf16.msra.mxu3 %v9036_v37  ;;  %v8320_v11 = vor.u32 %v10052_v60, %v8319_v61  ;;  %v8160_v37 = vor.u32 %v10012_v3, %v8159_v42  ;;  %v8972_v7 = vor.u32 %v10213_v20, %v8969_v0  ;;  %v8127_v61 = vld [vmem:[#allocation8 + $0x68] sm:$0xf]  ;;  %v10004_v60 = vld [vmem:[#allocation8 + $0x74] sm:$0xf0] }
 0x311   :  { %6018 = vmatpush.bf16.msrb.mxu0 %v9180_v54  ;;  %6032 = vmatpush.bf16.msrb.mxu1 %v9308_v15  ;;  %v10321_v54 = vld [vmem:[#allocation8 + $0xa64] sm:$0xf]  ;;  %v8128_v30 = vor.u32 %v10004_v60, %v8127_v61  ;;  %v10032_v18 = vld [vmem:[#allocation8 + $0x154] sm:$0xf0] }
 0x312   :  { %v10277_v15 = vld [vmem:[#allocation8 + $0x904] sm:$0xf]  ;;  %v9404_v25 = vor.u32 %v10321_v54, %v9401_v38  ;;  %5954 = vmatmul.bf16.vlgmr.msrb.gmra.mxu3 %v10918_v48  ;;  %v10008_v38 = vld [vmem:[#allocation8 + $0x94] sm:$0xf0]  ;;  %v8240_v3 = vor.u32 %v10032_v18, %v8239_v24  ;;  %v8671_v24 = vld [vmem:[#allocation8 + $0x4a8] sm:$0xf] }
 0x313   :  { %6045 = vmatpush.bf16.msrb.mxu2 %v9452_v55  ;;  %v9388_v55 = vor.u32 %v10317_v53, %v9385_v4  ;;  %v8432_v4 = vor.u32 %v10080_v62, %v8431_v6  ;;  %v8367_v6 = vld [vmem:[#allocation8 + $0x248] sm:$0xf]  ;;  %v10064_v62 = vld [vmem:[#allocation8 + $0x254] sm:$0xf0] }
 0x314   :  { %6006 = vmatpush.bf16.msra.mxu3 %v9020_v5  ;;  %v8144_v5 = vor.u32 %v10008_v38, %v8143_v50  ;;  %v8207_v50 = vld [vmem:[#allocation8 + $0x108] sm:$0xf]  ;;  %v10148_v38 = vld [vmem:[#allocation8 + $0x4f4] sm:$0xf0] }
 0x315   :  { %6019 = vmatpush.bf16.msrb.mxu0 %v9164_v9  ;;  %6033 = vmatpush.bf16.msrb.mxu1 %v9292_v17  ;;  %v9100_v9 = vor.u32 %v10245_v32, %v9097_v16  ;;  %v9228_v17 = vor.u32 %v10277_v15, %v9225_v13  ;;  %v9596_v32 = vor.u32 %v10369_v35, %v9593_v56  ;;  %v10365_v15 = vld [vmem:[#allocation8 + $0xbc4] sm:$0xf]  ;;  %v9577_v13 = vld [vmem:[#allocation8 + $0xbd0] sm:$0xf0]  ;;  %v8383_v35 = vld [vmem:[#allocation8 + $0x268] sm:$0xf] }
 0x316   :  { %v8448_v16 = vor.u32 %v10084_v57, %v8447_v36  ;;  %v9580_v53 = vor.u32 %v10365_v15, %v9577_v13  ;;  %v10068_v56 = vld [vmem:[#allocation8 + $0x274] sm:$0xf0]  ;;  %v10349_v15 = vld [vmem:[#allocation8 + $0xb44] sm:$0xf]  ;;  %v9513_v13 = vld [vmem:[#allocation8 + $0xb50] sm:$0xf0] }
 0x317   :  { %6046 = vmatpush.bf16.msrb.mxu2 %v9436_v59  ;;  %v8988_v59 = vor.u32 %v10217_v10, %v8985_v44  ;;  %v10144_v8 = vld [vmem:[#allocation8 + $0x4d4] sm:$0xf0] }
 0x318   :  { %6007 = vmatpush.bf16.msra.mxu3 %v9004_v39  ;;  %v8111_v39 = vld [vmem:[#allocation8 + $0x48] sm:$0xf]  ;;  %v10140_v18 = vld [vmem:[#allocation8 + $0x4b4] sm:$0xf0] }
 0x319   :  { %6020 = vmatpush.bf16.msrb.mxu0 %v9148_v47  ;;  %6034 = vmatpush.bf16.msrb.mxu1 %v9276_v33  ;;  %v10313_v47 = vld [vmem:[#allocation8 + $0xa24] sm:$0xf]  ;;  %v9369_v33 = vld [vmem:[#allocation8 + $0xa30] sm:$0xf0] }
 0x31a   :  { %v9372_v19 = vor.u32 %v10313_v47, %v9369_v33  ;;  %v10357_v47 = vld [vmem:[#allocation8 + $0xb84] sm:$0xf]  ;;  %v9545_v33 = vld [vmem:[#allocation8 + $0xb90] sm:$0xf0] }
 0x31b   :  { %6047 = vmatpush.bf16.msrb.mxu2 %v9420_v41  ;;  %v8288_v41 = vor.u32 %v10044_v29, %v8287_v45  ;;  %v8095_v45 = vld [vmem:[#allocation8 + $0x28] sm:$0xf]  ;;  %v10028_v29 = vld [vmem:[#allocation8 + $0x134] sm:$0xf0]  ;;  %v9548_v20 = vor.u32 %v10357_v47, %v9545_v33 }
 0x31c   :  { %6008 = vmatpush.bf16.msra.mxu3 %v8988_v59  ;;  %v9996_v59 = vld [vmem:[#allocation8 + $0x34] sm:$0xf0] }
 0x31d   :  { %6021 = vmatpush.bf16.msrb.mxu0 %v9132_v34  ;;  %6035 = vmatpush.bf16.msrb.mxu1 %v9260_v63  ;;  %v10309_v34 = vld [vmem:[#allocation8 + $0xa04] sm:$0xf]  ;;  %v9353_v63 = vld [vmem:[#allocation8 + $0xa10] sm:$0xf0]  ;;  %v8096_v36 = vor.u32 %v9996_v59, %v8095_v45  ;;  %v10172_v33 = vld [vmem:[#allocation8 + $0x5b4] sm:$0xf0] }
 0x31e   :  { %v9356_v54 = vor.u32 %v10309_v34, %v9353_v63  ;;  %v10353_v34 = vld [vmem:[#allocation8 + $0xb64] sm:$0xf]  ;;  %v9529_v63 = vld [vmem:[#allocation8 + $0xb70] sm:$0xf0]  ;;  %v8575_v45 = vld [vmem:[#allocation8 + $0x3e8] sm:$0xf] }
 0x31f   :  { %6048 = vmatpush.bf16.msrb.mxu2 %v9404_v25  ;;  %v10116_v59 = vld [vmem:[#allocation8 + $0x3f4] sm:$0xf0] }
 0x320   :  { %6009 = vmatpush.bf16.msra.mxu3 %v8972_v7  ;;  %v10024_v7 = vld [vmem:[#allocation8 + $0x114] sm:$0xf0] }
 0x321   :  { %6022 = vmatpush.bf16.msrb.mxu0 %v9116_v51  ;;  %6036 = vmatpush.bf16.msrb.mxu1 %v9244_v52  ;;  %v8271_v51 = vld [vmem:[#allocation8 + $0x188] sm:$0xf]  ;;  %v10040_v52 = vld [vmem:[#allocation8 + $0x194] sm:$0xf0] }
 0x322   :  { %v8272_v25 = vor.u32 %v10040_v52, %v8271_v51  ;;  %v9532_v51 = vor.u32 %v10353_v34, %v9529_v63  ;;  %v8384_v52 = vor.u32 %v10068_v56, %v8383_v35  ;;  %v8655_v34 = vld [vmem:[#allocation8 + $0x488] sm:$0xf]  ;;  %v10136_v56 = vld [vmem:[#allocation8 + $0x494] sm:$0xf0] }
 0x323   :  { %6049 = vmatpush.bf16.msrb.mxu2 %v9388_v55  ;;  %6010 = vmatmul.bf16.vlgmr.msra.gmra.mxu3 %v10986_v2  ;;  %v10000_v55 = vld [vmem:[#allocation8 + $0x54] sm:$0xf0] }
 0x324   :  { %6058 = vmatpush.bf16.msrb.mxu3 %v9596_v32  ;;  %v8112_v42 = vor.u32 %v10000_v55, %v8111_v39  ;;  %v8831_v32 = vld [vmem:[#allocation8 + $0x5e8] sm:$0xf]  ;;  %v8688_v39 = vor.u32 %v10144_v8, %v8687_v31 }
 0x325   :  { %6023 = vmatpush.bf16.msrb.mxu0 %v9100_v9  ;;  %6037 = vmatpush.bf16.msrb.mxu1 %v9228_v17  ;;  %v10361_v9 = vld [vmem:[#allocation8 + $0xba4] sm:$0xf]  ;;  %v9561_v17 = vld [vmem:[#allocation8 + $0xbb0] sm:$0xf0] }
 0x326   :  { %v9564_v10 = vor.u32 %v10361_v9, %v9561_v17  ;;  %v8815_v9 = vld [vmem:[#allocation8 + $0x5c8] sm:$0xf]  ;;  %v10176_v17 = vld [vmem:[#allocation8 + $0x5d4] sm:$0xf0] }
 0x327   :  { %6050 = vmatpush.bf16.msrb.mxu2 %v9372_v19  ;;  %v8223_v19 = vld [vmem:[#allocation8 + $0x128] sm:$0xf]  ;;  %v8816_v55 = vor.u32 %v10176_v17, %v8815_v9  ;;  %v10160_v17 = vld [vmem:[#allocation8 + $0x554] sm:$0xf0] }
 0x328   :  { %6024 = vmatmul.bf16.vlgmr.msrb.gmra.mxu0 %v11000_v46  ;;  %6038 = vmatmul.bf16.vlgmr.msrb.gmra.mxu1 %v11003_v40  ;;  %v8224_v57 = vor.u32 %v10028_v29, %v8223_v19  ;;  %v8959_v19 = vld [vmem:[#allocation8 + $0x6e8] sm:$0xf]  ;;  %v10212_v29 = vld [vmem:[#allocation8 + $0x6f4] sm:$0xf0] }
 0x329   :  { %6072 = vmatpush.bf16.msra.mxu0 %v8192_v14  ;;  %6086 = vmatpush.bf16.msra.mxu1 %v8320_v11  ;;  %v8415_v14 = vld [vmem:[#allocation8 + $0x2a8] sm:$0xf]  ;;  %v10076_v11 = vld [vmem:[#allocation8 + $0x2b4] sm:$0xf0] }
 0x32a   :  { %6059 = vmatpush.bf16.msrb.mxu3 %v9580_v53  ;;  %v8416_v44 = vor.u32 %v10076_v11, %v8415_v14  ;;  %v9516_v53 = vor.u32 %v10349_v15, %v9513_v13  ;;  %v10345_v14 = vld [vmem:[#allocation8 + $0xb24] sm:$0xf]  ;;  %v9497_v11 = vld [vmem:[#allocation8 + $0xb30] sm:$0xf0]  ;;  %v8767_v15 = vld [vmem:[#allocation8 + $0x568] sm:$0xf] }
 0x32b   :  { %6051 = vmatpush.bf16.msrb.mxu2 %v9356_v54  ;;  %v8703_v54 = vld [vmem:[#allocation8 + $0x4e8] sm:$0xf]  ;;  %v10164_v13 = vld [vmem:[#allocation8 + $0x574] sm:$0xf0] }
 0x32c   :  { %v8704_v61 = vor.u32 %v10148_v38, %v8703_v54  ;;  %v8943_v54 = vld [vmem:[#allocation8 + $0x6c8] sm:$0xf]  ;;  %v10208_v38 = vld [vmem:[#allocation8 + $0x6d4] sm:$0xf0]  ;;  %v8768_v8 = vor.u32 %v10164_v13, %v8767_v15 }
 0x32d   :  { %6073 = vmatpush.bf16.msra.mxu0 %v8176_v21  ;;  %6087 = vmatpush.bf16.msra.mxu1 %v8304_v27  ;;  %v8399_v21 = vld [vmem:[#allocation8 + $0x288] sm:$0xf]  ;;  %v10072_v27 = vld [vmem:[#allocation8 + $0x294] sm:$0xf0] }
 0x32e   :  { %6052 = vmatmul.bf16.vlgmr.msrb.gmra.mxu2 %v11011_v26  ;;  %6060 = vmatpush.bf16.msrb.mxu3 %v9564_v10  ;;  %v8400_v0 = vor.u32 %v10072_v27, %v8399_v21  ;;  %v8799_v10 = vld [vmem:[#allocation8 + $0x5a8] sm:$0xf]  ;;  %v10341_v21 = vld [vmem:[#allocation8 + $0xb04] sm:$0xf]  ;;  %v9481_v27 = vld [vmem:[#allocation8 + $0xb10] sm:$0xf0] }
 0x32f   :  { %6100 = vmatpush.bf16.msra.mxu2 %v8448_v16  ;;  %v10180_v16 = vld [vmem:[#allocation8 + $0x5f4] sm:$0xf0]  ;;  %v9484_v63 = vor.u32 %v10341_v21, %v9481_v27  ;;  %v8751_v9 = vld [vmem:[#allocation8 + $0x548] sm:$0xf] }
 0x330   :  { %v8832_v60 = vor.u32 %v10180_v16, %v8831_v32  ;;  %v8639_v32 = vld [vmem:[#allocation8 + $0x468] sm:$0xf]  ;;  %v10132_v16 = vld [vmem:[#allocation8 + $0x474] sm:$0xf0] }
 0x331   :  { %6074 = vmatpush.bf16.msra.mxu0 %v8160_v37  ;;  %6088 = vmatpush.bf16.msra.mxu1 %v8288_v41  ;;  %v8079_v37 = vld [vmem:[#allocation8 + $0x8] sm:$0xf]  ;;  %v9992_v41 = vld [vmem:[#allocation8 + $0x14] sm:$0xf0]  ;;  %v8640_v31 = vor.u32 %v10132_v16, %v8639_v32 }
 0x332   :  { %6061 = vmatpush.bf16.msrb.mxu3 %v9548_v20  ;;  %v8672_v20 = vor.u32 %v10140_v18, %v8671_v24  ;;  %v8752_v18 = vor.u32 %v10160_v17, %v8751_v9  ;;  %v9199_v15 = vld [vmem:[#allocation8 + $0x8c8] sm:$0xf]  ;;  %v10272_v13 = vld [vmem:[#allocation8 + $0x8d4] sm:$0xf0] }
 0x333   :  { %6101 = vmatpush.bf16.msra.mxu2 %v8432_v4  ;;  %v8368_v4 = vor.u32 %v10064_v62, %v8367_v6  ;;  %v8944_v62 = vor.u32 %v10208_v38, %v8943_v54  ;;  %v8879_v54 = vld [vmem:[#allocation8 + $0x648] sm:$0xf]  ;;  %v10192_v38 = vld [vmem:[#allocation8 + $0x654] sm:$0xf0] }
 0x334   :  { %v9183_v9 = vld [vmem:[#allocation8 + $0x8a8] sm:$0xf]  ;;  %v10268_v17 = vld [vmem:[#allocation8 + $0x8b4] sm:$0xf0] }
 0x335   :  { %6075 = vmatpush.bf16.msra.mxu0 %v8144_v5  ;;  %6089 = vmatpush.bf16.msra.mxu1 %v8272_v25  ;;  %v8080_v5 = vor.u32 %v9992_v41, %v8079_v37  ;;  %v8208_v25 = vor.u32 %v10024_v7, %v8207_v50  ;;  %v8576_v37 = vor.u32 %v10116_v59, %v8575_v45  ;;  %v8559_v50 = vld [vmem:[#allocation8 + $0x3c8] sm:$0xf]  ;;  %v10112_v7 = vld [vmem:[#allocation8 + $0x3d4] sm:$0xf0] }
 0x336   :  { %6062 = vmatpush.bf16.msrb.mxu3 %v9532_v51  ;;  %v8960_v41 = vor.u32 %v10212_v29, %v8959_v19  ;;  %v8656_v51 = vor.u32 %v10136_v56, %v8655_v34  ;;  %v8560_v6 = vor.u32 %v10112_v7, %v8559_v50  ;;  %v8895_v45 = vld [vmem:[#allocation8 + $0x668] sm:$0xf]  ;;  %v10196_v59 = vld [vmem:[#allocation8 + $0x674] sm:$0xf0] }
 0x337   :  { %6102 = vmatpush.bf16.msra.mxu2 %v8416_v44  ;;  %v9500_v44 = vor.u32 %v10345_v14, %v9497_v11  ;;  %v8719_v34 = vld [vmem:[#allocation8 + $0x508] sm:$0xf]  ;;  %v10276_v56 = vld [vmem:[#allocation8 + $0x8f4] sm:$0xf0] }
 0x338   :  { %v8495_v50 = vld [vmem:[#allocation8 + $0x348] sm:$0xf]  ;;  %v10096_v7 = vld [vmem:[#allocation8 + $0x354] sm:$0xf0] }
 0x339   :  { %6076 = vmatpush.bf16.msra.mxu0 %v8128_v30  ;;  %6090 = vmatpush.bf16.msra.mxu1 %v8256_v22  ;;  %v8351_v30 = vld [vmem:[#allocation8 + $0x228] sm:$0xf]  ;;  %v10060_v22 = vld [vmem:[#allocation8 + $0x234] sm:$0xf0] }
 0x33a   :  { %6063 = vmatpush.bf16.msrb.mxu3 %v9516_v53  ;;  %v8352_v47 = vor.u32 %v10060_v22, %v8351_v30  ;;  %v8623_v53 = vld [vmem:[#allocation8 + $0x448] sm:$0xf]  ;;  %v10104_v22 = vld [vmem:[#allocation8 + $0x394] sm:$0xf0] }
 0x33b   :  { %6103 = vmatpush.bf16.msra.mxu2 %v8400_v0  ;;  %v8800_v0 = vor.u32 %v10172_v33, %v8799_v10  ;;  %v8527_v30 = vld [vmem:[#allocation8 + $0x388] sm:$0xf]  ;;  %v10156_v33 = vld [vmem:[#allocation8 + $0x534] sm:$0xf0] }
 0x33c   :  { %v8607_v10 = vld [vmem:[#allocation8 + $0x428] sm:$0xf]  ;;  %v8528_v21 = vor.u32 %v10104_v22, %v8527_v30  ;;  %v10300_v22 = vld [vmem:[#allocation8 + $0x9b4] sm:$0xf0] }
 0x33d   :  { %6077 = vmatpush.bf16.msra.mxu0 %v8112_v42  ;;  %6091 = vmatpush.bf16.msra.mxu1 %v8240_v3  ;;  %v8335_v42 = vld [vmem:[#allocation8 + $0x208] sm:$0xf]  ;;  %v10056_v3 = vld [vmem:[#allocation8 + $0x214] sm:$0xf0] }
 0x33e   :  { %6064 = vmatpush.bf16.msrb.mxu3 %v9500_v44  ;;  %v8336_v35 = vor.u32 %v10056_v3, %v8335_v42  ;;  %v10124_v44 = vld [vmem:[#allocation8 + $0x434] sm:$0xf0]  ;;  %v8511_v42 = vld [vmem:[#allocation8 + $0x368] sm:$0xf] }
 0x33f   :  { %6104 = vmatpush.bf16.msra.mxu2 %v8384_v52  ;;  %v10100_v3 = vld [vmem:[#allocation8 + $0x374] sm:$0xf0]  ;;  %v8608_v19 = vor.u32 %v10124_v44, %v8607_v10  ;;  %v9087_v10 = vld [vmem:[#allocation8 + $0x7e8] sm:$0xf] }
 0x340   :  { %v10244_v44 = vld [vmem:[#allocation8 + $0x7f4] sm:$0xf0] }
 0x341   :  { %6078 = vmatpush.bf16.msra.mxu0 %v8096_v36  ;;  %6092 = vmatpush.bf16.msra.mxu1 %v8224_v57  ;;  %v8783_v36 = vld [vmem:[#allocation8 + $0x588] sm:$0xf]  ;;  %v10168_v57 = vld [vmem:[#allocation8 + $0x594] sm:$0xf0] }
 0x342   :  { %v8784_v52 = vor.u32 %v10168_v57, %v8783_v36  ;;  %6065 = vmatpush.bf16.msrb.mxu3 %v9484_v63  ;;  %v10152_v63 = vld [vmem:[#allocation8 + $0x514] sm:$0xf0]  ;;  %v8512_v36 = vor.u32 %v10100_v3, %v8511_v42  ;;  %v8896_v57 = vor.u32 %v10196_v59, %v8895_v45  ;;  %v9167_v42 = vld [vmem:[#allocation8 + $0x888] sm:$0xf] }
 0x343   :  { %6105 = vmatpush.bf16.msra.mxu2 %v8368_v4  ;;  %v10128_v4 = vld [vmem:[#allocation8 + $0x454] sm:$0xf0] }
 0x344   :  { %v8624_v24 = vor.u32 %v10128_v4, %v8623_v53  ;;  %v9200_v53 = vor.u32 %v10272_v13, %v9199_v15  ;;  %v10264_v59 = vld [vmem:[#allocation8 + $0x894] sm:$0xf0]  ;;  %v9439_v13 = vld [vmem:[#allocation8 + $0xaa8] sm:$0xf] }
 0x345   :  { %6079 = vmatpush.bf16.msra.mxu0 %v8080_v5  ;;  %6093 = vmatpush.bf16.msra.mxu1 %v8208_v25  ;;  %v8543_v5 = vld [vmem:[#allocation8 + $0x3a8] sm:$0xf]  ;;  %v10108_v25 = vld [vmem:[#allocation8 + $0x3b4] sm:$0xf0] }
 0x346   :  { %6114 = vmatpush.bf16.msra.mxu3 %v8576_v37  ;;  %v8544_v14 = vor.u32 %v10108_v25, %v8543_v5  ;;  %v9343_v37 = vld [vmem:[#allocation8 + $0x9e8] sm:$0xf]  ;;  %v10304_v25 = vld [vmem:[#allocation8 + $0x9d4] sm:$0xf0] }
 0x347   :  { %6106 = vmatpush.bf16.msra.mxu2 %v8352_v47  ;;  %6066 = vmatmul.bf16.vlgmr.msrb.gmra.mxu3 %v11020_v49  ;;  %v8735_v47 = vld [vmem:[#allocation8 + $0x528] sm:$0xf]  ;;  %v10236_v15 = vld [vmem:[#allocation8 + $0x7b4] sm:$0xf0] }
 0x348   :  { %6080 = vmatmul.bf16.vlgmr.msra.gmra.mxu0 %v10894_v23  ;;  %6094 = vmatmul.bf16.vlgmr.msra.gmra.mxu1 %v10896_v12  ;;  %v8736_v29 = vor.u32 %v10156_v33, %v8735_v47  ;;  %v9327_v5 = vld [vmem:[#allocation8 + $0x9c8] sm:$0xf]  ;;  %v10340_v33 = vld [vmem:[#allocation8 + $0xaf4] sm:$0xf0] }
 0x349   :  { %6128 = vmatpush.bf16.msrb.mxu0 %v8704_v61  ;;  %6142 = vmatpush.bf16.msrb.mxu1 %v8832_v60  ;;  %v8927_v61 = vld [vmem:[#allocation8 + $0x6a8] sm:$0xf]  ;;  %v10204_v60 = vld [vmem:[#allocation8 + $0x6b4] sm:$0xf0]  ;;  %v9328_v4 = vor.u32 %v10304_v25, %v9327_v5 }
 0x34a   :  { %6115 = vmatpush.bf16.msra.mxu3 %v8560_v6  ;;  %v8928_v11 = vor.u32 %v10204_v60, %v8927_v61  ;;  %v8496_v6 = vor.u32 %v10096_v7, %v8495_v50  ;;  %v8479_v61 = vld [vmem:[#allocation8 + $0x328] sm:$0xf]  ;;  %v10092_v60 = vld [vmem:[#allocation8 + $0x334] sm:$0xf0]  ;;  %v11037_v50 = vpop.f32.mrf.mxu1 }
 0x34b   :  { %6107 = vmatpush.bf16.msra.mxu2 %v8336_v35  ;;  %v9215_v35 = vld [vmem:[#allocation8 + $0x8e8] sm:$0xf]  ;;  %v10260_v7 = vld [vmem:[#allocation8 + $0x874] sm:$0xf0] }
 0x34c   :  { %v9216_v32 = vor.u32 %v10276_v56, %v9215_v35  ;;  %v9471_v47 = vld [vmem:[#allocation8 + $0xae8] sm:$0xf]  ;;  %v10240_v35 = vld [vmem:[#allocation8 + $0x7d4] sm:$0xf0] }
 0x34d   :  { %6129 = vmatpush.bf16.msrb.mxu0 %v8688_v39  ;;  %6143 = vmatpush.bf16.msrb.mxu1 %v8816_v55  ;;  %v8911_v39 = vld [vmem:[#allocation8 + $0x688] sm:$0xf]  ;;  %v10200_v55 = vld [vmem:[#allocation8 + $0x694] sm:$0xf0] }
 0x34e   :  { %6108 = vmatmul.bf16.vlgmr.msra.gmra.mxu2 %v10914_v58  ;;  %6116 = vmatpush.bf16.msra.mxu3 %v8544_v14  ;;  %v8912_v27 = vor.u32 %v10200_v55, %v8911_v39  ;;  %v9311_v14 = vld [vmem:[#allocation8 + $0x9a8] sm:$0xf]  ;;  %v10088_v55 = vld [vmem:[#allocation8 + $0x314] sm:$0xf0] }
 0x34f   :  { %6156 = vmatpush.bf16.msrb.mxu2 %v8960_v41  ;;  %v10308_v41 = vld [vmem:[#allocation8 + $0x9f4] sm:$0xf0]  ;;  %v8463_v39 = vld [vmem:[#allocation8 + $0x308] sm:$0xf] }
 0x350   :  { %v9344_v16 = vor.u32 %v10308_v41, %v9343_v37  ;;  %v8464_v3 = vor.u32 %v10088_v55, %v8463_v39  ;;  %v9455_v56 = vld [vmem:[#allocation8 + $0xac8] sm:$0xf] }
 0x351   :  { %6130 = vmatpush.bf16.msrb.mxu0 %v8672_v20  ;;  %6144 = vmatpush.bf16.msrb.mxu1 %v8800_v0  ;;  %v8591_v20 = vld [vmem:[#allocation8 + $0x408] sm:$0xf]  ;;  %v10120_v0 = vld [vmem:[#allocation8 + $0x414] sm:$0xf0] }
 0x352   :  { %6117 = vmatpush.bf16.msra.mxu3 %v8528_v21  ;;  %v9184_v21 = vor.u32 %v10268_v17, %v9183_v9  ;;  %v9151_v41 = vld [vmem:[#allocation8 + $0x868] sm:$0xf]  ;;  %v10232_v17 = vld [vmem:[#allocation8 + $0x794] sm:$0xf0] }
 0x353   :  { %6157 = vmatpush.bf16.msrb.mxu2 %v8944_v62  ;;  %v8880_v62 = vor.u32 %v10192_v38, %v8879_v54  ;;  %v9279_v54 = vld [vmem:[#allocation8 + $0x968] sm:$0xf]  ;;  %v10292_v38 = vld [vmem:[#allocation8 + $0x974] sm:$0xf0] }
 0x354   :  { %v9280_v5 = vor.u32 %v10292_v38, %v9279_v54  ;;  %v9135_v25 = vld [vmem:[#allocation8 + $0x848] sm:$0xf]  ;;  %v8321_v54 = vld [vmem:[#allocation8 + $0x1f8] sm:$0xf0] }
 0x355   :  { %6131 = vmatpush.bf16.msrb.mxu0 %v8656_v51  ;;  %6145 = vmatpush.bf16.msrb.mxu1 %v8784_v52  ;;  %v8592_v51 = vor.u32 %v10120_v0, %v8591_v20  ;;  %v8720_v52 = vor.u32 %v10152_v63, %v8719_v34  ;;  %v9088_v20 = vor.u32 %v10244_v44, %v9087_v10  ;;  %v9071_v34 = vld [vmem:[#allocation8 + $0x7c8] sm:$0xf]  ;;  %v11035_v63 = vpop.f32.mrf.mxu0  ;;  %v10284_v44 = vld [vmem:[#allocation8 + $0x934] sm:$0xf0] }
 0x356   :  { %6118 = vmatpush.bf16.msra.mxu3 %v8512_v36  ;;  %v9472_v0 = vor.u32 %v10340_v33, %v9471_v47  ;;  %v10336_v36 = vld [vmem:[#allocation8 + $0xad4] sm:$0xf0]  ;;  %v9039_v9 = vld [vmem:[#allocation8 + $0x788] sm:$0xf] }
 0x357   :  { %6158 = vmatpush.bf16.msrb.mxu2 %v8928_v11  ;;  %v8480_v11 = vor.u32 %v10092_v60, %v8479_v61  ;;  %v10256_v61 = vld [vmem:[#allocation8 + $0x854] sm:$0xf0]  ;;  %v9263_v60 = vld [vmem:[#allocation8 + $0x948] sm:$0xf]  ;;  %v9040_v33 = vor.u32 %v10232_v17, %v9039_v9  ;;  %v8305_v9 = vld [vmem:[#allocation8 + $0x1d8] sm:$0xf0] }
 0x358   :  { %v9119_v39 = vld [vmem:[#allocation8 + $0x828] sm:$0xf] }
 0x359   :  { %6132 = vmatpush.bf16.msrb.mxu0 %v8640_v31  ;;  %6146 = vmatpush.bf16.msrb.mxu1 %v8768_v8  ;;  %v8863_v31 = vld [vmem:[#allocation8 + $0x628] sm:$0xf]  ;;  %v10188_v8 = vld [vmem:[#allocation8 + $0x634] sm:$0xf0] }
 0x35a   :  { %6119 = vmatpush.bf16.msra.mxu3 %v8496_v6  ;;  %v8864_v30 = vor.u32 %v10188_v8, %v8863_v31  ;;  %v10332_v6 = vld [vmem:[#allocation8 + $0xab4] sm:$0xf0]  ;;  %v11043_v8 = vld [vmem:[#allocation10] sm:$0xf]  ;;  %v9247_v10 = vld [vmem:[#allocation8 + $0x928] sm:$0xf] }
 0x35b   :  { %6159 = vmatpush.bf16.msrb.mxu2 %v8912_v27  ;;  %v9312_v27 = vor.u32 %v10300_v22, %v9311_v14  ;;  %v10288_v31 = vld [vmem:[#allocation8 + $0x954] sm:$0xf0]  ;;  %v9423_v14 = vld [vmem:[#allocation8 + $0xa88] sm:$0xf]  ;;  %v3808_v47 = vperm.slane %v11043_v8, 0 }
 0x35c   :  { %v9264_v22 = vor.u32 %v10288_v31, %v9263_v60  ;;  %v9007_v38 = vld [vmem:[#allocation8 + $0x748] sm:$0xf]  ;;  %v8177_v60 = vld [vmem:[#allocation8 + $0xd8] sm:$0xf0] }
 0x35d   :  { %6133 = vmatpush.bf16.msrb.mxu0 %v8624_v24  ;;  %6147 = vmatpush.bf16.msrb.mxu1 %v8752_v18  ;;  %v8847_v24 = vld [vmem:[#allocation8 + $0x608] sm:$0xf]  ;;  %v10184_v18 = vld [vmem:[#allocation8 + $0x614] sm:$0xf0]  ;;  %v11045_v55 = vpop.f32.mrf.mxu0 }
 0x35e   :  { %6120 = vmatpush.bf16.msra.mxu3 %v8480_v11  ;;  %v8848_v45 = vor.u32 %v10184_v18, %v8847_v24  ;;  %v10328_v11 = vld [vmem:[#allocation8 + $0xa94] sm:$0xf0]  ;;  %v11047_v24 = vpop.f32.mrf.mxu3  ;;  %v8991_v17 = vld [vmem:[#allocation8 + $0x728] sm:$0xf] }
 0x35f   :  { %6160 = vmatpush.bf16.msrb.mxu2 %v8896_v57  ;;  %v9168_v57 = vor.u32 %v10264_v59, %v9167_v42  ;;  %v10252_v18 = vld [vmem:[#allocation8 + $0x834] sm:$0xf0]  ;;  %v11050_v42 = vpop.f32.mrf.mxu1 }
 0x360   :  { %v10324_v59 = vld [vmem:[#allocation8 + $0xa74] sm:$0xf0] }
 0x361   :  { %6134 = vmatpush.bf16.msrb.mxu0 %v8608_v19  ;;  %6148 = vmatpush.bf16.msrb.mxu1 %v8736_v29  ;;  %v9295_v19 = vld [vmem:[#allocation8 + $0x988] sm:$0xf]  ;;  %v10296_v29 = vld [vmem:[#allocation8 + $0x994] sm:$0xf0] }
 0x362   :  { %v9296_v37 = vor.u32 %v10296_v29, %v9295_v19  ;;  %6121 = vmatpush.bf16.msra.mxu3 %v8464_v3  ;;  %v10228_v3 = vld [vmem:[#allocation8 + $0x774] sm:$0xf0]  ;;  %v9120_v19 = vor.u32 %v10252_v18, %v9119_v39  ;;  %v9248_v29 = vor.u32 %v10284_v44, %v9247_v10 }
 0x363   :  { %6161 = vmatpush.bf16.msrb.mxu2 %v8880_v62  ;;  %v9152_v62 = vor.u32 %v10260_v7, %v9151_v41  ;;  %v10050_v7 = vld [vmem:[#allocation8 + $0x1ec] sm:$0xf] }
 0x365   :  { %6135 = vmatpush.bf16.msrb.mxu0 %v8592_v51  ;;  %6149 = vmatpush.bf16.msrb.mxu1 %v8720_v52  ;;  %v9072_v51 = vor.u32 %v10240_v35, %v9071_v34  ;;  %v9456_v52 = vor.u32 %v10336_v36, %v9455_v56  ;;  %v9231_v34 = vld [vmem:[#allocation8 + $0x908] sm:$0xf]  ;;  %v10280_v56 = vld [vmem:[#allocation8 + $0x914] sm:$0xf0]  ;;  %v10018_v36 = vld [vmem:[#allocation8 + $0xec] sm:$0xf] }
 0x366   :  { %6170 = vmatpush.bf16.msrb.mxu3 %v9088_v20  ;;  %v9103_v20 = vld [vmem:[#allocation8 + $0x808] sm:$0xf] }
 0x367   :  { %6162 = vmatpush.bf16.msrb.mxu2 %v8864_v30  ;;  %6122 = vmatmul.bf16.vlgmr.msra.gmra.mxu3 %v10918_v48  ;;  %v9136_v30 = vor.u32 %v10256_v61, %v9135_v25  ;;  %v8324_v25 = vor.u32 %v10050_v7, %v8321_v54  ;;  %v10014_v61 = vld [vmem:[#allocation8 + $0xcc] sm:$0xf] }
 0x368   :  { %6136 = vmatmul.bf16.vlgmr.msrb.gmra.mxu0 %v10966_v43  ;;  %6150 = vmatmul.bf16.vlgmr.msrb.gmra.mxu1 %v10968_v28  ;;  %v8180_v10 = vor.u32 %v10014_v61, %v8177_v60  ;;  %v10006_v7 = vld [vmem:[#allocation8 + $0x8c] sm:$0xf]  ;;  %v10368_v60 = vld [vmem:[#allocation8 + $0xbd4] sm:$0xf0] }
 0x369   :  { %6184 = vmatpush.bf16.msra.mxu0 %v9216_v32  ;;  %6198 = vmatpush.bf16.msra.mxu1 %v9344_v16  ;;  %v9055_v32 = vld [vmem:[#allocation8 + $0x7a8] sm:$0xf]  ;;  %v11039_v16 = vpop.f32.mrf.mxu2 }
 0x36a   :  { %6171 = vmatpush.bf16.msrb.mxu3 %v9072_v51  ;;  %v10224_v51 = vld [vmem:[#allocation8 + $0x754] sm:$0xf0] }
 0x36b   :  { %6163 = vmatpush.bf16.msrb.mxu2 %v8848_v45  ;;  %v9407_v45 = vld [vmem:[#allocation8 + $0xa68] sm:$0xf]  ;;  %v9008_v31 = vor.u32 %v10224_v51, %v9007_v38 }
 0x36c   :  { %v9408_v41 = vor.u32 %v10324_v59, %v9407_v45 }
 0x36d   :  { %6185 = vmatpush.bf16.msra.mxu0 %v9200_v53  ;;  %6199 = vmatpush.bf16.msra.mxu1 %v9328_v4  ;;  %v9056_v53 = vor.u32 %v10236_v15, %v9055_v32  ;;  %v9440_v4 = vor.u32 %v10332_v6, %v9439_v13  ;;  %v10320_v32 = vld [vmem:[#allocation8 + $0xa54] sm:$0xf0]  ;;  %v5746_v15 = vadd.f32 %v11035_v63, %v3808_v47  ;;  %v11061_v63 = vpop.f32.mrf.mxu1 }
 0x36e   :  { %6164 = vmatmul.bf16.vlgmr.msrb.gmra.mxu2 %v10984_v1  ;;  %v9232_v6 = vor.u32 %v10280_v56, %v9231_v34  ;;  %v9599_v34 = vld [vmem:[#allocation8 + $0xbe8] sm:$0xf]  ;;  %v5748_v56 = vadd.f32 %v11045_v55, %v3808_v47 }
 0x36f   :  { %6212 = vmatpush.bf16.msra.mxu2 %v9472_v0  ;;  %6172 = vmatpush.bf16.msrb.mxu3 %v9056_v53  ;;  %v10248_v0 = vld [vmem:[#allocation8 + $0x814] sm:$0xf0]  ;;  %v5760_v39 = vadd.f32 %v11037_v50, %v5746_v15  ;;  %v8273_v15 = vld [vmem:[#allocation8 + $0x198] sm:$0xf0] }
 0x370   :  { %v9104_v13 = vor.u32 %v10248_v0, %v9103_v20  ;;  %v10216_v50 = vld [vmem:[#allocation8 + $0x714] sm:$0xf0]  ;;  %v9359_v20 = vld [vmem:[#allocation8 + $0xa08] sm:$0xf] }
 0x371   :  { %6186 = vmatpush.bf16.msra.mxu0 %v9184_v21  ;;  %6200 = vmatpush.bf16.msra.mxu1 %v9312_v27  ;;  %v9424_v21 = vor.u32 %v10328_v11, %v9423_v14  ;;  %v9023_v27 = vld [vmem:[#allocation8 + $0x768] sm:$0xf]  ;;  %v11052_v35 = vpop.f32.mrf.mxu2  ;;  %v11059_v14 = vpop.f32.mrf.mxu3  ;;  %v10220_v11 = vld [vmem:[#allocation8 + $0x734] sm:$0xf0] }
 0x372   :  { %v8992_v45 = vor.u32 %v10220_v11, %v8991_v17  ;;  %v10312_v0 = vld [vmem:[#allocation8 + $0xa14] sm:$0xf0]  ;;  %v10002_v17 = vld [vmem:[#allocation8 + $0x6c] sm:$0xf] }
 0x373   :  { %6213 = vmatpush.bf16.msra.mxu2 %v9456_v52  ;;  %6173 = vmatpush.bf16.msrb.mxu3 %v9040_v33  ;;  %v9391_v52 = vld [vmem:[#allocation8 + $0xa48] sm:$0xf]  ;;  %v10010_v33 = vld [vmem:[#allocation8 + $0xac] sm:$0xf]  ;;  %v9360_v51 = vor.u32 %v10312_v0, %v9359_v20  ;;  %v8241_v0 = vld [vmem:[#allocation8 + $0x158] sm:$0xf0] }
 0x374   :  { %v9392_v53 = vor.u32 %v10320_v32, %v9391_v52  ;;  %v8145_v52 = vld [vmem:[#allocation8 + $0x98] sm:$0xf0]  ;;  %v10038_v32 = vld [vmem:[#allocation8 + $0x18c] sm:$0xf] }
 0x375   :  { %6187 = vmatpush.bf16.msra.mxu0 %v9168_v57  ;;  %6201 = vmatpush.bf16.msra.mxu1 %v9296_v37  ;;  %v8193_v57 = vld [vmem:[#allocation8 + $0xf8] sm:$0xf0]  ;;  %v9024_v37 = vor.u32 %v10228_v3, %v9023_v27  ;;  %v10042_v27 = vld [vmem:[#allocation8 + $0x1ac] sm:$0xf]  ;;  %v5774_v3 = vadd.f32 %v11039_v16, %v5760_v39 }
 0x376   :  { %v10082_v16 = vld [vmem:[#allocation8 + $0x2ec] sm:$0xf]  ;;  %v8257_v39 = vld [vmem:[#allocation8 + $0x178] sm:$0xf0] }
 0x377   :  { %6214 = vmatpush.bf16.msra.mxu2 %v9440_v4  ;;  %6174 = vmatpush.bf16.msrb.mxu3 %v9024_v37  ;;  %v10046_v4 = vld [vmem:[#allocation8 + $0x1cc] sm:$0xf]  ;;  %v5788_v54 = vadd.f32 %v11047_v24, %v5774_v3  ;;  %v5817_v24 = vpop.f32.mrf.mxu1  ;;  %v8417_v3 = vld [vmem:[#allocation8 + $0x2b8] sm:$0xf0] }
 0x378   :  { %v8308_v44 = vor.u32 %v10046_v4, %v8305_v9  ;;  %v8148_v4 = vor.u32 %v10006_v7, %v8145_v52  ;;  %v8276_v9 = vor.u32 %v10038_v32, %v8273_v15  ;;  %v10030_v20 = vld [vmem:[#allocation8 + $0x14c] sm:$0xf]  ;;  %v8097_v52 = vld [vmem:[#allocation8 + $0x38] sm:$0xf0] }
 0x379   :  { %6188 = vmatpush.bf16.msra.mxu0 %v9152_v62  ;;  %6202 = vmatpush.bf16.msra.mxu1 %v9280_v5  ;;  %v11057_v62 = vpop.f32.mrf.mxu0  ;;  %v8196_v5 = vor.u32 %v10018_v36, %v8193_v57  ;;  %v11064_v18 = vpop.f32.mrf.mxu2  ;;  %v10372_v36 = vld [vmem:[#allocation8 + $0xbf4] sm:$0xf0]  ;;  %v8449_v57 = vld [vmem:[#allocation8 + $0x2f8] sm:$0xf0]  ;;  %v10026_v32 = vld [vmem:[#allocation8 + $0x12c] sm:$0xf] }
 0x37a   :  { %v9600_v55 = vor.u32 %v10372_v36, %v9599_v34  ;;  %v8452_v47 = vor.u32 %v10082_v16, %v8449_v57  ;;  %v5802_v61 = vadd.f32 %v11057_v62, %v5788_v54  ;;  %v9551_v36 = vld [vmem:[#allocation8 + $0xb88] sm:$0xf]  ;;  %v10360_v57 = vld [vmem:[#allocation8 + $0xb94] sm:$0xf0]  ;;  %v8244_v54 = vor.u32 %v10030_v20, %v8241_v0  ;;  %v8225_v15 = vld [vmem:[#allocation8 + $0x138] sm:$0xf0] }
 0x37b   :  { %6215 = vmatpush.bf16.msra.mxu2 %v9424_v21  ;;  %v8161_v21 = vld [vmem:[#allocation8 + $0xb8] sm:$0xf0]  ;;  %6175 = vmatpush.bf16.msrb.mxu3 %v9008_v31  ;;  %v10078_v31 = vld [vmem:[#allocation8 + $0x2cc] sm:$0xf] }
 0x37c   :  { %v8164_v37 = vor.u32 %v10010_v33, %v8161_v21  ;;  %v5816_v33 = vadd.f32 %v11061_v63, %v5802_v61  ;;  %v10364_v21 = vld [vmem:[#allocation8 + $0xbb4] sm:$0xf0] }
 0x37d   :  { %6189 = vmatpush.bf16.msra.mxu0 %v9136_v30  ;;  %6203 = vmatpush.bf16.msra.mxu1 %v9264_v22  ;;  %v9375_v30 = vld [vmem:[#allocation8 + $0xa28] sm:$0xf]  ;;  %v10316_v22 = vld [vmem:[#allocation8 + $0xa34] sm:$0xf0] }
 0x37e   :  { %v9376_v59 = vor.u32 %v10316_v22, %v9375_v30  ;;  %v8129_v30 = vld [vmem:[#allocation8 + $0x78] sm:$0xf0]  ;;  %v10034_v22 = vld [vmem:[#allocation8 + $0x16c] sm:$0xf] }
 0x37f   :  { %6216 = vmatpush.bf16.msra.mxu2 %v9408_v41  ;;  %6176 = vmatpush.bf16.msrb.mxu3 %v8992_v45  ;;  %v8132_v45 = vor.u32 %v10002_v17, %v8129_v30  ;;  %v5871_v7 = vpop.f32.mrf.mxu1  ;;  %v9990_v17 = vld [vmem:[#allocation8 + $0xc] sm:$0xf] }
 0x381   :  { %6190 = vmatpush.bf16.msra.mxu0 %v9120_v19  ;;  %6204 = vmatpush.bf16.msra.mxu1 %v9248_v29  ;;  %v8289_v19 = vld [vmem:[#allocation8 + $0x1b8] sm:$0xf0]  ;;  %v8975_v29 = vld [vmem:[#allocation8 + $0x708] sm:$0xf] }
 0x382   :  { %v8292_v41 = vor.u32 %v10042_v27, %v8289_v19  ;;  %v8976_v38 = vor.u32 %v10216_v50, %v8975_v29  ;;  %v10074_v27 = vld [vmem:[#allocation8 + $0x2ac] sm:$0xf]  ;;  %v5830_v29 = vadd.f32 %v11064_v18, %v5816_v33  ;;  %v8113_v50 = vld [vmem:[#allocation8 + $0x58] sm:$0xf0] }
 0x383   :  { %6217 = vmatpush.bf16.msra.mxu2 %v9392_v53  ;;  %v8433_v53 = vld [vmem:[#allocation8 + $0x2d8] sm:$0xf0]  ;;  %v10178_v33 = vld [vmem:[#allocation8 + $0x5ec] sm:$0xf] }
 0x384   :  { %6177 = vmatpush.bf16.msrb.mxu3 %v8976_v38  ;;  %v8436_v62 = vor.u32 %v10078_v31, %v8433_v53  ;;  %v9994_v38 = vld [vmem:[#allocation8 + $0x2c] sm:$0xf]  ;;  %v8385_v53 = vld [vmem:[#allocation8 + $0x278] sm:$0xf0] }
 0x385   :  { %6191 = vmatpush.bf16.msra.mxu0 %v9104_v13  ;;  %6205 = vmatpush.bf16.msra.mxu1 %v9232_v6  ;;  %v5803_v13 = vpop.f32.mrf.mxu0  ;;  %v5843_v6 = vpop.f32.mrf.mxu3  ;;  %v10066_v31 = vld [vmem:[#allocation8 + $0x26c] sm:$0xf] }
 0x387   :  { %6218 = vmatpush.bf16.msra.mxu2 %v9376_v59  ;;  %v9998_v59 = vld [vmem:[#allocation8 + $0x4c] sm:$0xf]  ;;  %6178 = vmatmul.bf16.vlgmr.msrb.gmra.mxu3 %v10986_v2 }
 0x388   :  { %6192 = vmatmul.bf16.vlgmr.msra.gmra.mxu0 %v11000_v46  ;;  %6206 = vmatmul.bf16.vlgmr.msra.gmra.mxu1 %v11003_v40  ;;  %v8116_v18 = vor.u32 %v9998_v59, %v8113_v50  ;;  %v8369_v59 = vld [vmem:[#allocation8 + $0x258] sm:$0xf0] }
 0x389   :  { %6240 = vmatpush.bf16.msrb.mxu0 %v8196_v5  ;;  %6254 = vmatpush.bf16.msrb.mxu1 %v8324_v25  ;;  %v9583_v5 = vld [vmem:[#allocation8 + $0xbc8] sm:$0xf]  ;;  %v5762_v25 = vadd.f32 %v11050_v42, %v5748_v56  ;;  %v8420_v56 = vor.u32 %v10074_v27, %v8417_v3 }
 0x38a   :  { %6226 = vmatpush.bf16.msra.mxu3 %v9600_v55  ;;  %v9584_v42 = vor.u32 %v10368_v60, %v9583_v5  ;;  %v10356_v60 = vld [vmem:[#allocation8 + $0xb74] sm:$0xf0]  ;;  %v9519_v27 = vld [vmem:[#allocation8 + $0xb48] sm:$0xf] }
 0x38b   :  { %v5776_v11 = vadd.f32 %v11052_v35, %v5762_v25  ;;  %6219 = vmatpush.bf16.msra.mxu2 %v9360_v51  ;;  %v8260_v35 = vor.u32 %v10034_v22, %v8257_v39  ;;  %v5844_v51 = vadd.f32 %v5843_v6, %v5830_v29  ;;  %v8081_v6 = vld [vmem:[#allocation8 + $0x18] sm:$0xf0] }
 0x38c   :  { %v8209_v39 = vld [vmem:[#allocation8 + $0x118] sm:$0xf0] }
 0x38d   :  { %6241 = vmatpush.bf16.msrb.mxu0 %v8180_v10  ;;  %6255 = vmatpush.bf16.msrb.mxu1 %v8308_v44  ;;  %v5831_v10 = vpop.f32.mrf.mxu2  ;;  %v9567_v44 = vld [vmem:[#allocation8 + $0xba8] sm:$0xf]  ;;  %v5790_v19 = vadd.f32 %v11059_v14, %v5776_v11  ;;  %v5857_v63 = vpop.f32.mrf.mxu0  ;;  %v10022_v11 = vld [vmem:[#allocation8 + $0x10c] sm:$0xf] }
 0x38e   :  { %6220 = vmatmul.bf16.vlgmr.msra.gmra.mxu2 %v11011_v26  ;;  %6227 = vmatpush.bf16.msra.mxu3 %v9584_v42  ;;  %v9568_v34 = vor.u32 %v10364_v21, %v9567_v44  ;;  %v5845_v14 = vpop.f32.mrf.mxu3  ;;  %v5858_v61 = vadd.f32 %v5857_v63, %v5844_v51  ;;  %v10146_v42 = vld [vmem:[#allocation8 + $0x4ec] sm:$0xf]  ;;  %v8833_v21 = vld [vmem:[#allocation8 + $0x5f8] sm:$0xf0]  ;;  %v8212_v50 = vor.u32 %v10022_v11, %v8209_v39 }
 0x38f   :  { %6268 = vmatpush.bf16.msrb.mxu2 %v8452_v47  ;;  %v5804_v16 = vadd.f32 %v5803_v13, %v5790_v19  ;;  %v9552_v47 = vor.u32 %v10360_v57, %v9551_v36  ;;  %v9535_v13 = vld [vmem:[#allocation8 + $0xb68] sm:$0xf]  ;;  %v8689_v36 = vld [vmem:[#allocation8 + $0x4d8] sm:$0xf0]  ;;  %v5873_v57 = vpop.f32.mrf.mxu1  ;;  %v10058_v51 = vld [vmem:[#allocation8 + $0x22c] sm:$0xf] }
 0x390   :  { %v5872_v22 = vadd.f32 %v5871_v7, %v5858_v61  ;;  %v9536_v44 = vor.u32 %v10356_v60, %v9535_v13  ;;  %v8817_v7 = vld [vmem:[#allocation8 + $0x5d8] sm:$0xf0]  ;;  %v10170_v13 = vld [vmem:[#allocation8 + $0x5ac] sm:$0xf] }
 0x391   :  { %6242 = vmatpush.bf16.msrb.mxu0 %v8164_v37  ;;  %6256 = vmatpush.bf16.msrb.mxu1 %v8292_v41  ;;  %v10070_v37 = vld [vmem:[#allocation8 + $0x28c] sm:$0xf]  ;;  %v8401_v41 = vld [vmem:[#allocation8 + $0x298] sm:$0xf0]  ;;  %v5818_v25 = vadd.f32 %v5817_v24, %v5804_v16  ;;  %v8388_v24 = vor.u32 %v10066_v31, %v8385_v53  ;;  %v9487_v31 = vld [vmem:[#allocation8 + $0xb08] sm:$0xf] }
 0x392   :  { %6228 = vmatpush.bf16.msra.mxu3 %v9568_v34  ;;  %v8404_v5 = vor.u32 %v10070_v37, %v8401_v41  ;;  %v8836_v34 = vor.u32 %v10178_v33, %v8833_v21  ;;  %v10174_v16 = vld [vmem:[#allocation8 + $0x5cc] sm:$0xf]  ;;  %v8801_v60 = vld [vmem:[#allocation8 + $0x5b8] sm:$0xf0]  ;;  %v10344_v53 = vld [vmem:[#allocation8 + $0xb14] sm:$0xf0] }
 0x393   :  { %6269 = vmatpush.bf16.msrb.mxu2 %v8436_v62  ;;  %v5832_v30 = vadd.f32 %v5831_v10, %v5818_v25  ;;  %v8705_v62 = vld [vmem:[#allocation8 + $0x4f8] sm:$0xf0]  ;;  %v8084_v10 = vor.u32 %v9990_v17, %v8081_v6  ;;  %v10114_v6 = vld [vmem:[#allocation8 + $0x3ec] sm:$0xf]  ;;  %v9488_v33 = vor.u32 %v10344_v53, %v9487_v31 }
 0x394   :  { %v8708_v63 = vor.u32 %v10146_v42, %v8705_v62  ;;  %v8337_v17 = vld [vmem:[#allocation8 + $0x218] sm:$0xf0] }
 0x395   :  { %6243 = vmatpush.bf16.msrb.mxu0 %v8148_v4  ;;  %6257 = vmatpush.bf16.msrb.mxu1 %v8276_v9  ;;  %v5885_v55 = vpop.f32.mrf.mxu2  ;;  %v8100_v4 = vor.u32 %v9994_v38, %v8097_v52  ;;  %v8228_v9 = vor.u32 %v10026_v32, %v8225_v15  ;;  %v5859_v19 = vpop.f32.mrf.mxu0  ;;  %v5846_v20 = vadd.f32 %v5845_v14, %v5832_v30  ;;  %v8353_v14 = vld [vmem:[#allocation8 + $0x238] sm:$0xf0] }
 0x396   :  { %6229 = vmatpush.bf16.msra.mxu3 %v9552_v47  ;;  %v5886_v3 = vadd.f32 %v5885_v55, %v5872_v22  ;;  %v5899_v29 = vpop.f32.mrf.mxu3  ;;  %v8820_v55 = vor.u32 %v10174_v16, %v8817_v7  ;;  %v10138_v47 = vld [vmem:[#allocation8 + $0x4ac] sm:$0xf]  ;;  %v8356_v61 = vor.u32 %v10058_v51, %v8353_v14  ;;  %v8577_v30 = vld [vmem:[#allocation8 + $0x3f8] sm:$0xf0] }
 0x397   :  { %6270 = vmatpush.bf16.msrb.mxu2 %v8420_v56  ;;  %v10142_v56 = vld [vmem:[#allocation8 + $0x4cc] sm:$0xf]  ;;  %v5860_v38 = vadd.f32 %v5859_v19, %v5846_v20  ;;  %v8961_v39 = vld [vmem:[#allocation8 + $0x6f8] sm:$0xf0]  ;;  %v11091_v14 = vpop.f32.mrf.mxu1 }
 0x398   :  { %v11081_v0 = vadd.f32 %v5899_v29, %v5886_v3  ;;  %v8692_v15 = vor.u32 %v10142_v56, %v8689_v36  ;;  %v10210_v22 = vld [vmem:[#allocation8 + $0x6ec] sm:$0xf]  ;;  %v8657_v21 = vld [vmem:[#allocation8 + $0x498] sm:$0xf0]  ;;  %v8580_v3 = vor.u32 %v10114_v6, %v8577_v30  ;;  %v3809_v6 = vperm.slane %v11043_v8, 1 }
 0x399   :  { %6244 = vmatpush.bf16.msrb.mxu0 %v8132_v45  ;;  %6258 = vmatpush.bf16.msrb.mxu1 %v8260_v35  ;;  %v10352_v45 = vld [vmem:[#allocation8 + $0xb54] sm:$0xf0]  ;;  %v10062_v35 = vld [vmem:[#allocation8 + $0x24c] sm:$0xf]  ;;  %v5874_v32 = vadd.f32 %v5873_v57, %v5860_v38  ;;  %v8945_v29 = vld [vmem:[#allocation8 + $0x6d8] sm:$0xf0] }
 0x39a   :  { %6230 = vmatpush.bf16.msra.mxu3 %v9536_v44  ;;  %v9520_v37 = vor.u32 %v10352_v45, %v9519_v27  ;;  %v8372_v41 = vor.u32 %v10062_v35, %v8369_v59  ;;  %6408 = vst [vmem:[#allocation11] sm:$0xff] %v11081_v0  ;;  %v8804_v44 = vor.u32 %v10170_v13, %v8801_v60  ;;  %v8785_v27 = vld [vmem:[#allocation8 + $0x598] sm:$0xf0]  ;;  %v10110_v35 = vld [vmem:[#allocation8 + $0x3cc] sm:$0xf] }
 0x39b   :  { %6271 = vmatpush.bf16.msrb.mxu2 %v8404_v5  ;;  %v8673_v5 = vld [vmem:[#allocation8 + $0x4b8] sm:$0xf0]  ;;  %v8964_v45 = vor.u32 %v10210_v22, %v8961_v39  ;;  %v10206_v19 = vld [vmem:[#allocation8 + $0x6cc] sm:$0xf] }
 0x39c   :  { %v8676_v62 = vor.u32 %v10138_v47, %v8673_v5  ;;  %v8561_v59 = vld [vmem:[#allocation8 + $0x3d8] sm:$0xf0]  ;;  %v10130_v20 = vld [vmem:[#allocation8 + $0x46c] sm:$0xf]  ;;  %v8948_v57 = vor.u32 %v10206_v19, %v8945_v29 }
 0x39d   :  { %6245 = vmatpush.bf16.msrb.mxu0 %v8116_v18  ;;  %6259 = vmatpush.bf16.msrb.mxu1 %v8244_v54  ;;  %v9503_v18 = vld [vmem:[#allocation8 + $0xb28] sm:$0xf]  ;;  %v10348_v54 = vld [vmem:[#allocation8 + $0xb34] sm:$0xf0]  ;;  %v5887_v52 = vpop.f32.mrf.mxu2  ;;  %v10162_v56 = vld [vmem:[#allocation8 + $0x56c] sm:$0xf]  ;;  %v8564_v16 = vor.u32 %v10110_v35, %v8561_v59 }
 0x39e   :  { %6231 = vmatpush.bf16.msra.mxu3 %v9520_v37  ;;  %v9504_v25 = vor.u32 %v10348_v54, %v9503_v18  ;;  %v5901_v11 = vpop.f32.mrf.mxu3  ;;  %v8769_v36 = vld [vmem:[#allocation8 + $0x578] sm:$0xf0]  ;;  %v10106_v37 = vld [vmem:[#allocation8 + $0x3ac] sm:$0xf] }
 0x39f   :  { %6272 = vmatpush.bf16.msrb.mxu2 %v8388_v24  ;;  %v10134_v24 = vld [vmem:[#allocation8 + $0x48c] sm:$0xf]  ;;  %v8929_v18 = vld [vmem:[#allocation8 + $0x6b8] sm:$0xf0]  ;;  %v8772_v38 = vor.u32 %v10162_v56, %v8769_v36 }
 0x3a0   :  { %v10202_v7 = vld [vmem:[#allocation8 + $0x6ac] sm:$0xf]  ;;  %v8913_v60 = vld [vmem:[#allocation8 + $0x698] sm:$0xf0] }
 0x3a1   :  { %6246 = vmatpush.bf16.msrb.mxu0 %v8100_v4  ;;  %6260 = vmatpush.bf16.msrb.mxu1 %v8228_v9  ;;  %v5888_v4 = vadd.f32 %v5887_v52, %v5874_v32  ;;  %v10054_v9 = vld [vmem:[#allocation8 + $0x20c] sm:$0xf]  ;;  %v8625_v52 = vld [vmem:[#allocation8 + $0x458] sm:$0xf0]  ;;  %v8932_v47 = vor.u32 %v10202_v7, %v8929_v18 }
 0x3a2   :  { %6232 = vmatpush.bf16.msra.mxu3 %v9504_v25  ;;  %v10126_v51 = vld [vmem:[#allocation8 + $0x44c] sm:$0xf]  ;;  %v8529_v25 = vld [vmem:[#allocation8 + $0x398] sm:$0xf0] }
 0x3a3   :  { %6273 = vmatpush.bf16.msrb.mxu2 %v8372_v41  ;;  %v11086_v42 = vadd.f32 %v5901_v11, %v5888_v4  ;;  %v8545_v41 = vld [vmem:[#allocation8 + $0x3b8] sm:$0xf0]  ;;  %v10158_v32 = vld [vmem:[#allocation8 + $0x54c] sm:$0xf]  ;;  %v8628_v31 = vor.u32 %v10126_v51, %v8625_v52 }
 0x3a4   :  { %v10102_v5 = vld [vmem:[#allocation8 + $0x38c] sm:$0xf]  ;;  %v9217_v8 = vld [vmem:[#allocation8 + $0x8f8] sm:$0xf0] }
 0x3a5   :  { %6247 = vmatpush.bf16.msrb.mxu0 %v8084_v10  ;;  %6261 = vmatpush.bf16.msrb.mxu1 %v8212_v50  ;;  %6412 = vst [vmem:[#allocation11 + $0x20] sm:$0xff] %v11086_v42  ;;  %v8660_v10 = vor.u32 %v10134_v24, %v8657_v21  ;;  %v11095_v13 = vpop.f32.mrf.mxu2  ;;  %v10122_v4 = vld [vmem:[#allocation8 + $0x42c] sm:$0xf]  ;;  %v8532_v11 = vor.u32 %v10102_v5, %v8529_v25  ;;  %v8497_v56 = vld [vmem:[#allocation8 + $0x358] sm:$0xf0] }
 0x3a6   :  { %6233 = vmatpush.bf16.msra.mxu3 %v9488_v33  ;;  %v10098_v22 = vld [vmem:[#allocation8 + $0x36c] sm:$0xf]  ;;  %v8897_v33 = vld [vmem:[#allocation8 + $0x678] sm:$0xf0] }
 0x3a7   :  { %6274 = vmatpush.bf16.msrb.mxu2 %v8356_v61  ;;  %v10198_v61 = vld [vmem:[#allocation8 + $0x68c] sm:$0xf]  ;;  %v8481_v5 = vld [vmem:[#allocation8 + $0x338] sm:$0xf0] }
 0x3a8   :  { %6248 = vmatmul.bf16.vlgmr.msrb.gmra.mxu0 %v10894_v23  ;;  %6262 = vmatmul.bf16.vlgmr.msrb.gmra.mxu1 %v10896_v12  ;;  %v8340_v23 = vor.u32 %v10054_v9, %v8337_v17  ;;  %v10166_v12 = vld [vmem:[#allocation8 + $0x58c] sm:$0xf]  ;;  %v8609_v9 = vld [vmem:[#allocation8 + $0x438] sm:$0xf0]  ;;  %v8916_v30 = vor.u32 %v10198_v61, %v8913_v60 }
 0x3a9   :  { %6296 = vmatpush.bf16.msra.mxu0 %v8708_v63  ;;  %6310 = vmatpush.bf16.msra.mxu1 %v8836_v34  ;;  %v8788_v50 = vor.u32 %v10166_v12, %v8785_v27  ;;  %v11089_v63 = vpop.f32.mrf.mxu0  ;;  %v8641_v34 = vld [vmem:[#allocation8 + $0x478] sm:$0xf0]  ;;  %v10194_v24 = vld [vmem:[#allocation8 + $0x66c] sm:$0xf] }
 0x3aa   :  { %6282 = vmatpush.bf16.msrb.mxu3 %v8580_v3  ;;  %v8644_v54 = vor.u32 %v10130_v20, %v8641_v34  ;;  %v8737_v17 = vld [vmem:[#allocation8 + $0x538] sm:$0xf0]  ;;  %v10118_v12 = vld [vmem:[#allocation8 + $0x40c] sm:$0xf]  ;;  %v5914_v59 = vadd.f32 %v11089_v63, %v3809_v6  ;;  %v8900_v29 = vor.u32 %v10194_v24, %v8897_v33  ;;  %v5929_v34 = vpop.f32.mrf.mxu1 }
 0x3ab   :  { %6275 = vmatpush.bf16.msrb.mxu2 %v8340_v23  ;;  %6234 = vmatmul.bf16.vlgmr.msra.gmra.mxu3 %v11020_v49  ;;  %v8612_v23 = vor.u32 %v10122_v4, %v8609_v9  ;;  %v8593_v27 = vld [vmem:[#allocation8 + $0x418] sm:$0xf0]  ;;  %v10150_v3 = vld [vmem:[#allocation8 + $0x50c] sm:$0xf] }
 0x3ac   :  { %v10274_v35 = vld [vmem:[#allocation8 + $0x8ec] sm:$0xf]  ;;  %v8865_v61 = vld [vmem:[#allocation8 + $0x638] sm:$0xf0] }
 0x3ad   :  { %6297 = vmatpush.bf16.msra.mxu0 %v8692_v15  ;;  %6311 = vmatpush.bf16.msra.mxu1 %v8820_v55  ;;  %v8753_v15 = vld [vmem:[#allocation8 + $0x558] sm:$0xf0]  ;;  %v8548_v55 = vor.u32 %v10106_v37, %v8545_v41  ;;  %v10094_v20 = vld [vmem:[#allocation8 + $0x34c] sm:$0xf]  ;;  %v11099_v41 = vpop.f32.mrf.mxu2  ;;  %v9220_v7 = vor.u32 %v10274_v35, %v9217_v8 }
 0x3ae   :  { %6276 = vmatmul.bf16.vlgmr.msrb.gmra.mxu2 %v10914_v58  ;;  %6283 = vmatpush.bf16.msrb.mxu3 %v8564_v16  ;;  %v8756_v53 = vor.u32 %v10158_v32, %v8753_v15  ;;  %v10154_v58 = vld [vmem:[#allocation8 + $0x52c] sm:$0xf]  ;;  %v8881_v16 = vld [vmem:[#allocation8 + $0x658] sm:$0xf0]  ;;  %v8500_v51 = vor.u32 %v10094_v20, %v8497_v56 }
 0x3af   :  { %6324 = vmatpush.bf16.msra.mxu2 %v8964_v45  ;;  %v8740_v21 = vor.u32 %v10154_v58, %v8737_v17  ;;  %v8721_v45 = vld [vmem:[#allocation8 + $0x518] sm:$0xf0]  ;;  %v10190_v36 = vld [vmem:[#allocation8 + $0x64c] sm:$0xf] }
 0x3b0   :  { %v8724_v37 = vor.u32 %v10150_v3, %v8721_v45  ;;  %v10270_v63 = vld [vmem:[#allocation8 + $0x8cc] sm:$0xf]  ;;  %v8884_v52 = vor.u32 %v10190_v36, %v8881_v16  ;;  %v9329_v15 = vld [vmem:[#allocation8 + $0x9d8] sm:$0xf0] }
 0x3b1   :  { %6298 = vmatpush.bf16.msra.mxu0 %v8676_v62  ;;  %6312 = vmatpush.bf16.msra.mxu1 %v8804_v44  ;;  %v5915_v39 = vpop.f32.mrf.mxu0  ;;  %v5955_v62 = vpop.f32.mrf.mxu3  ;;  %v8513_v44 = vld [vmem:[#allocation8 + $0x378] sm:$0xf0]  ;;  %v10302_v32 = vld [vmem:[#allocation8 + $0x9cc] sm:$0xf] }
 0x3b2   :  { %6284 = vmatpush.bf16.msrb.mxu3 %v8548_v55  ;;  %v8516_v19 = vor.u32 %v10098_v22, %v8513_v44  ;;  %v10090_v55 = vld [vmem:[#allocation8 + $0x32c] sm:$0xf]  ;;  %v9332_v4 = vor.u32 %v10302_v32, %v9329_v15  ;;  %v9185_v58 = vld [vmem:[#allocation8 + $0x8b8] sm:$0xf0] }
 0x3b3   :  { %6325 = vmatpush.bf16.msra.mxu2 %v8948_v57  ;;  %v8596_v57 = vor.u32 %v10118_v12, %v8593_v27  ;;  %v10186_v25 = vld [vmem:[#allocation8 + $0x62c] sm:$0xf]  ;;  %v9313_v44 = vld [vmem:[#allocation8 + $0x9b8] sm:$0xf0] }
 0x3b4   :  { %v10266_v9 = vld [vmem:[#allocation8 + $0x8ac] sm:$0xf]  ;;  %v8868_v22 = vor.u32 %v10186_v25, %v8865_v61  ;;  %v8465_v33 = vld [vmem:[#allocation8 + $0x318] sm:$0xf0] }
 0x3b5   :  { %6299 = vmatpush.bf16.msra.mxu0 %v8660_v10  ;;  %6313 = vmatpush.bf16.msra.mxu1 %v8788_v50  ;;  %v10306_v10 = vld [vmem:[#allocation8 + $0x9ec] sm:$0xf]  ;;  %v9345_v50 = vld [vmem:[#allocation8 + $0x9f8] sm:$0xf0] }
 0x3b6   :  { %6285 = vmatpush.bf16.msrb.mxu3 %v8532_v11  ;;  %v9348_v18 = vor.u32 %v10306_v10, %v9345_v50  ;;  %v10298_v17 = vld [vmem:[#allocation8 + $0x9ac] sm:$0xf]  ;;  %v9473_v27 = vld [vmem:[#allocation8 + $0xaf8] sm:$0xf0]  ;;  %v5997_v10 = vpop.f32.mrf.mxu2 }
 0x3b7   :  { %6326 = vmatpush.bf16.msra.mxu2 %v8932_v47  ;;  %v10086_v24 = vld [vmem:[#allocation8 + $0x30c] sm:$0xf]  ;;  %v9316_v45 = vor.u32 %v10298_v17, %v9313_v44  ;;  %v9281_v32 = vld [vmem:[#allocation8 + $0x978] sm:$0xf0] }
 0x3b8   :  { %v10338_v12 = vld [vmem:[#allocation8 + $0xaec] sm:$0xf]  ;;  %v9441_v61 = vld [vmem:[#allocation8 + $0xab8] sm:$0xf0] }
 0x3b9   :  { %6300 = vmatpush.bf16.msra.mxu0 %v8644_v54  ;;  %6314 = vmatpush.bf16.msra.mxu1 %v8772_v38  ;;  %v9201_v54 = vld [vmem:[#allocation8 + $0x8d8] sm:$0xf0]  ;;  %v5928_v38 = vadd.f32 %v11091_v14, %v5914_v59  ;;  %v5969_v47 = vpop.f32.mrf.mxu0  ;;  %v10262_v35 = vld [vmem:[#allocation8 + $0x88c] sm:$0xf]  ;;  %v8468_v59 = vor.u32 %v10086_v24, %v8465_v33  ;;  %v9476_v20 = vor.u32 %v10338_v12, %v9473_v27 }
 0x3ba   :  { %6286 = vmatpush.bf16.msrb.mxu3 %v8516_v19  ;;  %v9204_v14 = vor.u32 %v10270_v63, %v9201_v54  ;;  %v10238_v56 = vld [vmem:[#allocation8 + $0x7cc] sm:$0xf]  ;;  %v9041_v33 = vld [vmem:[#allocation8 + $0x798] sm:$0xf0] }
 0x3bb   :  { %6327 = vmatpush.bf16.msra.mxu2 %v8916_v30  ;;  %v5942_v60 = vadd.f32 %v11095_v13, %v5928_v38  ;;  %v8484_v30 = vor.u32 %v10090_v55, %v8481_v5  ;;  %v5983_v13 = vpop.f32.mrf.mxu1  ;;  %v10334_v16 = vld [vmem:[#allocation8 + $0xacc] sm:$0xf]  ;;  %v9057_v5 = vld [vmem:[#allocation8 + $0x7b8] sm:$0xf0] }
 0x3bc   :  { %v10258_v63 = vld [vmem:[#allocation8 + $0x86c] sm:$0xf] }
 0x3bd   :  { %6301 = vmatpush.bf16.msra.mxu0 %v8628_v31  ;;  %6315 = vmatpush.bf16.msra.mxu1 %v8756_v53  ;;  %v5916_v31 = vadd.f32 %v5915_v39, %v3809_v6  ;;  %v5957_v53 = vpop.f32.mrf.mxu3  ;;  %v5956_v11 = vadd.f32 %v5955_v62, %v5942_v60  ;;  %v10182_v6 = vld [vmem:[#allocation8 + $0x60c] sm:$0xf]  ;;  %v8849_v39 = vld [vmem:[#allocation8 + $0x618] sm:$0xf0]  ;;  %v9188_v62 = vor.u32 %v10266_v9, %v9185_v58 }
 0x3be   :  { %6287 = vmatpush.bf16.msrb.mxu3 %v8500_v51  ;;  %v8852_v19 = vor.u32 %v10182_v6, %v8849_v39  ;;  %v9153_v51 = vld [vmem:[#allocation8 + $0x878] sm:$0xf0]  ;;  %v10330_v25 = vld [vmem:[#allocation8 + $0xaac] sm:$0xf]  ;;  %v5999_v39 = vpop.f32.mrf.mxu2 }
 0x3bf   :  { %6328 = vmatpush.bf16.msra.mxu2 %v8900_v29  ;;  %v5930_v3 = vadd.f32 %v5929_v34, %v5916_v31  ;;  %v5970_v8 = vadd.f32 %v5969_v47, %v5956_v11  ;;  %v10294_v29 = vld [vmem:[#allocation8 + $0x98c] sm:$0xf]  ;;  %v9073_v34 = vld [vmem:[#allocation8 + $0x7d8] sm:$0xf0]  ;;  %v9156_v31 = vor.u32 %v10258_v63, %v9153_v51 }
 0x3c0   :  { %v10234_v47 = vld [vmem:[#allocation8 + $0x7ac] sm:$0xf]  ;;  %v9137_v58 = vld [vmem:[#allocation8 + $0x858] sm:$0xf0] }
 0x3c1   :  { %6302 = vmatpush.bf16.msra.mxu0 %v8612_v23  ;;  %6316 = vmatpush.bf16.msra.mxu1 %v8740_v21  ;;  %v10242_v23 = vld [vmem:[#allocation8 + $0x7ec] sm:$0xf]  ;;  %v9089_v21 = vld [vmem:[#allocation8 + $0x7f8] sm:$0xf0]  ;;  %v5944_v36 = vadd.f32 %v11099_v41, %v5930_v3  ;;  %v5984_v38 = vadd.f32 %v5983_v13, %v5970_v8  ;;  %v9076_v41 = vor.u32 %v10238_v56, %v9073_v34 }
 0x3c2   :  { %6288 = vmatpush.bf16.msrb.mxu3 %v8484_v30  ;;  %v9092_v50 = vor.u32 %v10242_v23, %v9089_v21  ;;  %v10286_v17 = vld [vmem:[#allocation8 + $0x94c] sm:$0xf]  ;;  %v9265_v11 = vld [vmem:[#allocation8 + $0x958] sm:$0xf0]  ;;  %v9060_v30 = vor.u32 %v10234_v47, %v9057_v5 }
 0x3c3   :  { %6329 = vmatpush.bf16.msra.mxu2 %v8884_v52  ;;  %v5958_v54 = vadd.f32 %v5957_v53, %v5944_v36  ;;  %v10290_v52 = vld [vmem:[#allocation8 + $0x96c] sm:$0xf]  ;;  %v5985_v60 = vpop.f32.mrf.mxu1  ;;  %v5998_v9 = vadd.f32 %v5997_v10, %v5984_v38  ;;  %v9425_v6 = vld [vmem:[#allocation8 + $0xa98] sm:$0xf0] }
 0x3c4   :  { %v9284_v53 = vor.u32 %v10290_v52, %v9281_v32  ;;  %v10230_v44 = vld [vmem:[#allocation8 + $0x78c] sm:$0xf]  ;;  %v9409_v10 = vld [vmem:[#allocation8 + $0xa78] sm:$0xf0] }
 0x3c5   :  { %6303 = vmatpush.bf16.msra.mxu0 %v8596_v57  ;;  %6317 = vmatpush.bf16.msra.mxu1 %v8724_v37  ;;  %v9457_v57 = vld [vmem:[#allocation8 + $0xad8] sm:$0xf0]  ;;  %v5971_v37 = vpop.f32.mrf.mxu0  ;;  %v6011_v15 = vpop.f32.mrf.mxu3  ;;  %v10326_v13 = vld [vmem:[#allocation8 + $0xa8c] sm:$0xf]  ;;  %v9044_v8 = vor.u32 %v10230_v44, %v9041_v33 }
 0x3c6   :  { %6289 = vmatpush.bf16.msrb.mxu3 %v8468_v59  ;;  %v9460_v55 = vor.u32 %v10334_v16, %v9457_v57  ;;  %v6012_v24 = vadd.f32 %v6011_v15, %v5998_v9  ;;  %v10250_v12 = vld [vmem:[#allocation8 + $0x82c] sm:$0xf]  ;;  %v9428_v59 = vor.u32 %v10326_v13, %v9425_v6  ;;  %v9105_v57 = vld [vmem:[#allocation8 + $0x818] sm:$0xf0] }
 0x3c7   :  { %6330 = vmatpush.bf16.msra.mxu2 %v8868_v22  ;;  %v9444_v22 = vor.u32 %v10330_v25, %v9441_v61  ;;  %v9009_v52 = vld [vmem:[#allocation8 + $0x758] sm:$0xf0]  ;;  %v10318_v32 = vld [vmem:[#allocation8 + $0xa4c] sm:$0xf]  ;;  %v10393_v25 = vld [vmem:[%s11167_s3 + $0x20] sm:$0xff] }
 0x3c8   :  { %6304 = vmatmul.bf16.vlgmr.msra.gmra.mxu0 %v10966_v43  ;;  %6318 = vmatmul.bf16.vlgmr.msra.gmra.mxu1 %v10968_v28  ;;  %v9169_v43 = vld [vmem:[#allocation8 + $0x898] sm:$0xf0]  ;;  %v6420_v61 = vsub.f32 %v11086_v42, %v10393_v25  ;;  %v10214_v6 = vld [vmem:[#allocation8 + $0x70c] sm:$0xf] }
 0x3c9   :  { %6352 = vmatpush.bf16.msrb.mxu0 %v9220_v7  ;;  %6366 = vmatpush.bf16.msrb.mxu1 %v9348_v18  ;;  %v9297_v28 = vld [vmem:[#allocation8 + $0x998] sm:$0xf0]  ;;  %v9172_v7 = vor.u32 %v10262_v35, %v9169_v43 }
 0x3ca   :  { %v9300_v18 = vor.u32 %v10294_v29, %v9297_v28  ;;  %6338 = vmatpush.bf16.msra.mxu3 %v9092_v50  ;;  %v9249_v35 = vld [vmem:[#allocation8 + $0x938] sm:$0xf0]  ;;  %v10322_v28 = vld [vmem:[#allocation8 + $0xa6c] sm:$0xf]  ;;  %v6428_v44 = vmul.f32 %v6420_v61, %v6420_v61 }
 0x3cb   :  { %6331 = vmatpush.bf16.msra.mxu2 %v8852_v19  ;;  %6290 = vmatmul.bf16.vlgmr.msrb.gmra.mxu3 %v10918_v48  ;;  %v9268_v48 = vor.u32 %v10286_v17, %v9265_v11  ;;  %v10226_v19 = vld [vmem:[#allocation8 + $0x76c] sm:$0xf]  ;;  %v9025_v29 = vld [vmem:[#allocation8 + $0x778] sm:$0xf0]  ;;  %v6039_v50 = vpop.f32.mrf.mxu1  ;;  %v9412_v63 = vor.u32 %v10322_v28, %v9409_v10 }
 0x3cc   :  { %v9393_v15 = vld [vmem:[#allocation8 + $0xa58] sm:$0xf0]  ;;  %v10314_v17 = vld [vmem:[#allocation8 + $0xa2c] sm:$0xf] }
 0x3cd   :  { %6353 = vmatpush.bf16.msrb.mxu0 %v9204_v14  ;;  %6367 = vmatpush.bf16.msrb.mxu1 %v9332_v4  ;;  %v10254_v14 = vld [vmem:[#allocation8 + $0x84c] sm:$0xf]  ;;  %v5972_v4 = vadd.f32 %v5971_v37, %v5958_v54  ;;  %v6025_v23 = vpop.f32.mrf.mxu0  ;;  %v9377_v11 = vld [vmem:[#allocation8 + $0xa38] sm:$0xf0] }
 0x3ce   :  { %6332 = vmatmul.bf16.vlgmr.msra.gmra.mxu2 %v10984_v1  ;;  %6339 = vmatpush.bf16.msra.mxu3 %v9076_v41  ;;  %v9140_v21 = vor.u32 %v10254_v14, %v9137_v58  ;;  %v10392_v1 = vld [vmem:[%s11167_s3] sm:$0xff]  ;;  %v6026_v43 = vadd.f32 %v6025_v23, %v6012_v24  ;;  %v10278_v37 = vld [vmem:[#allocation8 + $0x90c] sm:$0xf]  ;;  %v6053_v41 = vpop.f32.mrf.mxu2  ;;  %v8993_v58 = vld [vmem:[#allocation8 + $0x738] sm:$0xf0]  ;;  %v9380_v13 = vor.u32 %v10314_v17, %v9377_v11 }
 0x3cf   :  { %6380 = vmatpush.bf16.msrb.mxu2 %v9476_v20  ;;  %v6416_v27 = vsub.f32 %v11081_v0, %v10392_v1  ;;  %v5986_v3 = vadd.f32 %v5985_v60, %v5972_v4  ;;  %v6013_v20 = vpop.f32.mrf.mxu3  ;;  %v10246_v0 = vld [vmem:[#allocation8 + $0x80c] sm:$0xf]  ;;  %v9361_v1 = vld [vmem:[#allocation8 + $0xa18] sm:$0xf0] }
 0x3d0   :  { %v10222_v54 = vld [vmem:[#allocation8 + $0x74c] sm:$0xf]  ;;  %v6040_v51 = vadd.f32 %v6039_v50, %v6026_v43  ;;  %v9585_v50 = vld [vmem:[#allocation8 + $0xbd8] sm:$0xf0] }
 0x3d1   :  { %6354 = vmatpush.bf16.msrb.mxu0 %v9188_v62  ;;  %6368 = vmatpush.bf16.msrb.mxu1 %v9316_v45  ;;  %v9121_v62 = vld [vmem:[#allocation8 + $0x838] sm:$0xf0]  ;;  %v10282_v45 = vld [vmem:[#allocation8 + $0x92c] sm:$0xf]  ;;  %v6424_v34 = vmul.f32 %v6416_v27, %v6416_v27  ;;  %v6000_v16 = vadd.f32 %v5999_v39, %v5986_v3 }
 0x3d2   :  { %6340 = vmatpush.bf16.msra.mxu3 %v9060_v30  ;;  %v9124_v56 = vor.u32 %v10250_v12, %v9121_v62  ;;  %v9252_v36 = vor.u32 %v10282_v45, %v9249_v35  ;;  %v10218_v14 = vld [vmem:[#allocation8 + $0x72c] sm:$0xf]  ;;  %v6054_v9 = vadd.f32 %v6053_v41, %v6040_v51  ;;  %v8977_v39 = vld [vmem:[#allocation8 + $0x718] sm:$0xf0]  ;;  %v6456_v45 = vrot.slane %v6428_v44, 4 }
 0x3d3   :  { %6381 = vmatpush.bf16.msrb.mxu2 %v9460_v55  ;;  %v6014_v38 = vadd.f32 %v6013_v20, %v6000_v16  ;;  %v9108_v55 = vor.u32 %v10246_v0, %v9105_v57  ;;  %v6432_v5 = vrot.slane %v6424_v34, 4  ;;  %v6041_v33 = vpop.f32.mrf.mxu1  ;;  %v8996_v42 = vor.u32 %v10218_v14, %v8993_v58  ;;  %v10394_v23 = vld [vmem:[%s11167_s3 + $0x8] sm:$0xff]  ;;  %v9601_v3 = vld [vmem:[#allocation8 + $0xbf8] sm:$0xf0] }
 0x3d4   :  { %v10310_v12 = vld [vmem:[#allocation8 + $0xa0c] sm:$0xf]  ;;  %v6457_v20 = vadd.f32 %v6456_v45, %v6428_v44  ;;  %v9553_v41 = vld [vmem:[#allocation8 + $0xb98] sm:$0xf0] }
 0x3d5   :  { %6355 = vmatpush.bf16.msrb.mxu0 %v9172_v7  ;;  %6369 = vmatpush.bf16.msrb.mxu1 %v9300_v18  ;;  %v9233_v7 = vld [vmem:[#allocation8 + $0x918] sm:$0xf0]  ;;  %v9028_v18 = vor.u32 %v10226_v19, %v9025_v29  ;;  %v6027_v60 = vpop.f32.mrf.mxu0  ;;  %v10370_v27 = vld [vmem:[#allocation8 + $0xbec] sm:$0xf]  ;;  %v9364_v19 = vor.u32 %v10310_v12, %v9361_v1  ;;  %v11131_v12 = vld [vmem:[#allocation10] sm:$0xf] }
 0x3d6   :  { %6341 = vmatpush.bf16.msra.mxu3 %v9044_v8  ;;  %v9236_v47 = vor.u32 %v10278_v37, %v9233_v7  ;;  %v6028_v4 = vadd.f32 %v6027_v60, %v6014_v38  ;;  %v6055_v8 = vpop.f32.mrf.mxu2  ;;  %v9604_v28 = vor.u32 %v10370_v27, %v9601_v3  ;;  %v10362_v37 = vld [vmem:[#allocation8 + $0xbac] sm:$0xf]  ;;  %v9569_v7 = vld [vmem:[#allocation8 + $0xbb8] sm:$0xf0]  ;;  %v3810_v1 = vperm.slane %v11131_v12, 2 }
 0x3d7   :  { %6382 = vmatpush.bf16.msrb.mxu2 %v9444_v22  ;;  %v6067_v30 = vpop.f32.mrf.mxu3  ;;  %v6433_v22 = vadd.f32 %v6432_v5, %v6424_v34  ;;  %v10395_v34 = vld [vmem:[%s11167_s3 + $0x28] sm:$0xff]  ;;  %v9537_v14 = vld [vmem:[#allocation8 + $0xb78] sm:$0xf0] }
 0x3d8   :  { %v6068_v24 = vadd.f32 %v6067_v30, %v6054_v9  ;;  %v10350_v58 = vld [vmem:[#allocation8 + $0xb4c] sm:$0xf]  ;;  %v9521_v17 = vld [vmem:[#allocation8 + $0xb58] sm:$0xf0] }
 0x3d9   :  { %6356 = vmatpush.bf16.msrb.mxu0 %v9156_v31  ;;  %6370 = vmatpush.bf16.msrb.mxu1 %v9284_v53  ;;  %v9012_v31 = vor.u32 %v10222_v54, %v9009_v52  ;;  %v9396_v53 = vor.u32 %v10318_v32, %v9393_v15  ;;  %v6434_v62 = vrot.slane %v6433_v22, 2  ;;  %v9572_v32 = vor.u32 %v10362_v37, %v9569_v7  ;;  %v10358_v15 = vld [vmem:[#allocation8 + $0xb8c] sm:$0xf] }
 0x3da   :  { %6342 = vmatpush.bf16.msra.mxu3 %v9028_v18  ;;  %6409 = vst [vmem:[#allocation11 + $0x8] sm:$0xff] %v6068_v24  ;;  %v9524_v44 = vor.u32 %v10350_v58, %v9521_v17 }
 0x3db   :  { %6383 = vmatpush.bf16.msrb.mxu2 %v9428_v59  ;;  %v8980_v59 = vor.u32 %v10214_v6, %v8977_v39  ;;  %v9489_v6 = vld [vmem:[#allocation8 + $0xb18] sm:$0xf0] }
 0x3dd   :  { %6357 = vmatpush.bf16.msrb.mxu0 %v9140_v21  ;;  %6371 = vmatpush.bf16.msrb.mxu1 %v9268_v48  ;;  %v6417_v21 = vsub.f32 %v6068_v24, %v10394_v23  ;;  %v6042_v48 = vadd.f32 %v6041_v33, %v6028_v4  ;;  %v10346_v24 = vld [vmem:[#allocation8 + $0xb2c] sm:$0xf]  ;;  %v9505_v33 = vld [vmem:[#allocation8 + $0xb38] sm:$0xf0]  ;;  %v6081_v23 = vpop.f32.mrf.mxu0 }
 0x3de   :  { %6343 = vmatpush.bf16.msra.mxu3 %v9012_v31  ;;  %v9556_v31 = vor.u32 %v10358_v15, %v9553_v41 }
 0x3df   :  { %6384 = vmatpush.bf16.msrb.mxu2 %v9412_v63  ;;  %v6425_v35 = vmul.f32 %v6417_v21, %v6417_v21  ;;  %v6056_v29 = vadd.f32 %v6055_v8, %v6042_v48  ;;  %v6069_v10 = vpop.f32.mrf.mxu3  ;;  %v6458_v63 = vrot.slane %v6457_v20, 2  ;;  %v6095_v21 = vpop.f32.mrf.mxu1 }
 0x3e0   :  { %v6109_v48 = vpop.f32.mrf.mxu2 }
 0x3e1   :  { %6358 = vmatpush.bf16.msrb.mxu0 %v9124_v56  ;;  %6372 = vmatpush.bf16.msrb.mxu1 %v9252_v36  ;;  %v6438_v43 = vrot.slane %v6425_v35, 4  ;;  %v6070_v36 = vadd.f32 %v6069_v10, %v6056_v29 }
 0x3e2   :  { %6344 = vmatpush.bf16.msra.mxu3 %v8996_v42  ;;  %v9508_v42 = vor.u32 %v10346_v24, %v9505_v33  ;;  %v10398_v24 = vld [vmem:[%s11167_s3 + $0x30] sm:$0xff] }
 0x3e3   :  { %6385 = vmatpush.bf16.msrb.mxu2 %v9396_v53  ;;  %v6439_v56 = vadd.f32 %v6438_v43, %v6425_v35  ;;  %6413 = vst [vmem:[#allocation11 + $0x28] sm:$0xff] %v6070_v36  ;;  %v6421_v16 = vsub.f32 %v6070_v36, %v10395_v34  ;;  %v10354_v53 = vld [vmem:[#allocation8 + $0xb6c] sm:$0xf] }
 0x3e4   :  { %v9540_v9 = vor.u32 %v10354_v53, %v9537_v14  ;;  %v10397_v14 = vld [vmem:[%s11167_s3 + $0x10] sm:$0xff] }
 0x3e5   :  { %6359 = vmatpush.bf16.msrb.mxu0 %v9108_v55  ;;  %6373 = vmatpush.bf16.msrb.mxu1 %v9236_v47  ;;  %v6440_v0 = vrot.slane %v6439_v56, 2  ;;  %v6429_v38 = vmul.f32 %v6421_v16, %v6421_v16  ;;  %v6459_v47 = vadd.f32 %v6458_v63, %v6457_v20  ;;  %v6083_v27 = vpop.f32.mrf.mxu0 }
 0x3e6   :  { %6345 = vmatpush.bf16.msra.mxu3 %v8980_v59  ;;  %v6084_v43 = vadd.f32 %v6083_v27, %v3810_v1 }
 0x3e7   :  { %6386 = vmatpush.bf16.msrb.mxu2 %v9380_v13  ;;  %v6441_v54 = vadd.f32 %v6440_v0, %v6439_v56  ;;  %v6462_v52 = vrot.slane %v6429_v38, 4  ;;  %v10342_v13 = vld [vmem:[#allocation8 + $0xb0c] sm:$0xf]  ;;  %v6097_v45 = vpop.f32.mrf.mxu1 }
 0x3e8   :  { %6360 = vmatmul.bf16.vlgmr.msrb.gmra.mxu0 %v11000_v46  ;;  %6374 = vmatmul.bf16.vlgmr.msrb.gmra.mxu1 %v11003_v40  ;;  %v10366_v46 = vld [vmem:[#allocation8 + $0xbcc] sm:$0xf]  ;;  %v6435_v40 = vadd.f32 %v6434_v62, %v6433_v22  ;;  %v9492_v39 = vor.u32 %v10342_v13, %v9489_v6  ;;  %v6082_v62 = vadd.f32 %v6081_v23, %v3810_v1  ;;  %v6111_v8 = vpop.f32.mrf.mxu2 }
 0x3e9   :  { %v9588_v57 = vor.u32 %v10366_v46, %v9585_v50  ;;  %6346 = vmatmul.bf16.vlgmr.msra.gmra.mxu3 %v10986_v2  ;;  %v6442_v51 = vrot.slane %v6441_v54, 1  ;;  %v6463_v25 = vadd.f32 %v6462_v52, %v6429_v38  ;;  %v6460_v2 = vrot.slane %v6459_v47, 1 }
 0x3ea   :  { %6394 = vmatpush.bf16.msrb.mxu3 %v9604_v28  ;;  %v6436_v18 = vrot.slane %v6435_v40, 1  ;;  %v6123_v3 = vpop.f32.mrf.mxu3  ;;  %v6096_v35 = vadd.f32 %v6095_v21, %v6082_v62  ;;  %v6098_v46 = vadd.f32 %v6097_v45, %v6084_v43 }
 0x3eb   :  { %6387 = vmatpush.bf16.msrb.mxu2 %v9364_v19  ;;  %v6443_v5 = vadd.f32 %v6442_v51, %v6441_v54  ;;  %v6464_v60 = vrot.slane %v6463_v25, 2  ;;  %v6461_v11 = vadd.f32 %v6460_v2, %v6459_v47 }
 0x3ec   :  { %v6437_v55 = vadd.f32 %v6436_v18, %v6435_v40  ;;  %v6110_v19 = vadd.f32 %v6109_v48, %v6096_v35  ;;  %v6112_v40 = vadd.f32 %v6111_v8, %v6098_v46 }
 0x3ed   :  { %v6465_v4 = vadd.f32 %v6464_v60, %v6463_v25  ;;  %v6137_v59 = vpop.f32.mrf.mxu0 }
 0x3ee   :  { %6388 = vmatmul.bf16.vlgmr.msrb.gmra.mxu2 %v11011_v26  ;;  %6395 = vmatpush.bf16.msrb.mxu3 %v9588_v57  ;;  %v11126_v61 = vadd.f32 %v6443_v5, %v6437_v55  ;;  %v6124_v29 = vadd.f32 %v6123_v3, %v6110_v19  ;;  %v3811_v19 = vperm.slane %v11131_v12, 3 }
 0x3ef   :  { %v6466_v26 = vrot.slane %v6465_v4, 1  ;;  %v6151_v28 = vpop.f32.mrf.mxu1 }
 0x3f1   :  { %v6467_v30 = vadd.f32 %v6466_v26, %v6465_v4  ;;  %v6165_v50 = vpop.f32.mrf.mxu2 }
 0x3f2   :  { %6396 = vmatpush.bf16.msrb.mxu3 %v9572_v32  ;;  %v6125_v10 = vpop.f32.mrf.mxu3 }
 0x3f3   :  { %v11128_v22 = vadd.f32 %v6467_v30, %v6461_v11  ;;  %v6126_v36 = vadd.f32 %v6125_v10, %v6112_v40 }
 0x3f5   :  { %v6139_v20 = vpop.f32.mrf.mxu0 }
 0x3f6   :  { %6397 = vmatpush.bf16.msrb.mxu3 %v9556_v31  ;;  %v6140_v57 = vadd.f32 %v6139_v20, %v6126_v36 }
 0x3f7   :  { %v6153_v34 = vpop.f32.mrf.mxu1 }
 0x3f8   :  { %v6154_v63 = vadd.f32 %v6153_v34, %v6140_v57 }
 0x3f9   :  { %v6167_v7 = vpop.f32.mrf.mxu2 }
 0x3fa   :  { %6398 = vmatpush.bf16.msrb.mxu3 %v9540_v9  ;;  %v6168_v52 = vadd.f32 %v6167_v7, %v6154_v63 }
 0x3fe   :  { %6399 = vmatpush.bf16.msrb.mxu3 %v9524_v44 }
 0x402   :  { %6400 = vmatpush.bf16.msrb.mxu3 %v9508_v42 }
 0x405   :  { %v6193_v18 = vpop.f32.mrf.mxu0  ;;  %v6207_v38 = vpop.f32.mrf.mxu1 }
 0x406   :  { %6401 = vmatpush.bf16.msrb.mxu3 %v9492_v39 }
 0x409   :  { %6402 = vmatmul.bf16.vlgmr.msrb.gmra.mxu3 %v11020_v49  ;;  %v6138_v49 = vadd.f32 %v6137_v59, %v6124_v29 }
 0x40a   :  { %v6179_v0 = vpop.f32.mrf.mxu3 }
 0x40b   :  { %v6152_v56 = vadd.f32 %v6151_v28, %v6138_v49 }
 0x40d   :  { %v6166_v16 = vadd.f32 %v6165_v50, %v6152_v56  ;;  %v6195_v55 = vpop.f32.mrf.mxu0  ;;  %v6209_v31 = vpop.f32.mrf.mxu1 }
 0x40f   :  { %v6180_v37 = vadd.f32 %v6179_v0, %v6166_v16 }
 0x411   :  { %v6194_v54 = vadd.f32 %v6193_v18, %v6180_v37  ;;  %v6221_v41 = vpop.f32.mrf.mxu2 }
 0x412   :  { %v6181_v51 = vpop.f32.mrf.mxu3 }
 0x413   :  { %v6208_v32 = vadd.f32 %v6207_v38, %v6194_v54  ;;  %v6182_v15 = vadd.f32 %v6181_v51, %v6168_v52 }
 0x415   :  { %v6222_v47 = vadd.f32 %v6221_v41, %v6208_v32  ;;  %v6196_v5 = vadd.f32 %v6195_v55, %v6182_v15 }
 0x417   :  { %v6210_v53 = vadd.f32 %v6209_v31, %v6196_v5 }
 0x419   :  { %v6223_v26 = vpop.f32.mrf.mxu2 }
 0x41a   :  { %v6224_v9 = vadd.f32 %v6223_v26, %v6210_v53 }
 0x425   :  { %v6249_v35 = vpop.f32.mrf.mxu0  ;;  %v6263_v8 = vpop.f32.mrf.mxu1 }
 0x426   :  { %v6250_v28 = vadd.f32 %v6249_v35, %v3811_v19 }
 0x428   :  { %v6264_v46 = vadd.f32 %v6263_v8, %v6250_v28 }
 0x42d   :  { %v6251_v43 = vpop.f32.mrf.mxu0  ;;  %v6265_v10 = vpop.f32.mrf.mxu1 }
 0x42e   :  { %v6235_v25 = vpop.f32.mrf.mxu3  ;;  %v6252_v40 = vadd.f32 %v6251_v43, %v3811_v19 }
 0x42f   :  { %v6236_v60 = vadd.f32 %v6235_v25, %v6222_v47 }
 0x430   :  { %v6266_v0 = vadd.f32 %v6265_v10, %v6252_v40 }
 0x431   :  { %6410 = vst [vmem:[#allocation11 + $0x10] sm:$0xff] %v6236_v60  ;;  %v6418_v2 = vsub.f32 %v6236_v60, %v10397_v14  ;;  %v6277_v59 = vpop.f32.mrf.mxu2 }
 0x432   :  { %v6278_v50 = vadd.f32 %v6277_v59, %v6264_v46 }
 0x433   :  { %v6426_v4 = vmul.f32 %v6418_v2, %v6418_v2 }
 0x435   :  { %v6444_v58 = vrot.slane %v6426_v4, 4 }
 0x436   :  { %v6237_v17 = vpop.f32.mrf.mxu3 }
 0x437   :  { %v6445_v11 = vadd.f32 %v6444_v58, %v6426_v4  ;;  %v6238_v30 = vadd.f32 %v6237_v17, %v6224_v9  ;;  %v10399_v58 = vld [vmem:[%s11167_s3 + $0x18] sm:$0xff] }
 0x439   :  { %v6446_v44 = vrot.slane %v6445_v11, 2  ;;  %6414 = vst [vmem:[#allocation11 + $0x30] sm:$0xff] %v6238_v30  ;;  %v6422_v33 = vsub.f32 %v6238_v30, %v10398_v24  ;;  %v6279_v49 = vpop.f32.mrf.mxu2 }
 0x43a   :  { %v6280_v16 = vadd.f32 %v6279_v49, %v6266_v0 }
 0x43b   :  { %v6447_v42 = vadd.f32 %v6446_v44, %v6445_v11  ;;  %v6430_v13 = vmul.f32 %v6422_v33, %v6422_v33 }
 0x43d   :  { %v6448_v6 = vrot.slane %v6447_v42, 1  ;;  %v6468_v39 = vrot.slane %v6430_v13, 4 }
 0x43f   :  { %v6449_v23 = vadd.f32 %v6448_v6, %v6447_v42  ;;  %v6469_v21 = vadd.f32 %v6468_v39, %v6430_v13  ;;  %v10400_v39 = vld [vmem:[%s11167_s3 + $0x38] sm:$0xff] }
 0x441   :  { %v11141_v48 = vadd.f32 %v11126_v61, %v6449_v23  ;;  %v6470_v1 = vrot.slane %v6469_v21, 2 }
 0x443   :  { %v6471_v27 = vadd.f32 %v6470_v1, %v6469_v21 }
 0x445   :  { %v6472_v3 = vrot.slane %v6471_v27, 1  ;;  %v6305_v61 = vpop.f32.mrf.mxu0  ;;  %v6319_v56 = vpop.f32.mrf.mxu1 }
 0x447   :  { %v6473_v62 = vadd.f32 %v6472_v3, %v6471_v27 }
 0x449   :  { %v11144_v45 = vadd.f32 %v11128_v22, %v6473_v62 }
 0x44d   :  { %v6307_v57 = vpop.f32.mrf.mxu0  ;;  %v6321_v18 = vpop.f32.mrf.mxu1 }
 0x44e   :  { %v6291_v29 = vpop.f32.mrf.mxu3 }
 0x44f   :  { %v6292_v20 = vadd.f32 %v6291_v29, %v6278_v50 }
 0x451   :  { %v6306_v22 = vadd.f32 %v6305_v61, %v6292_v20  ;;  %v6333_v34 = vpop.f32.mrf.mxu2 }
 0x453   :  { %v6320_v37 = vadd.f32 %v6319_v56, %v6306_v22 }
 0x455   :  { %v6334_v63 = vadd.f32 %v6333_v34, %v6320_v37 }
 0x456   :  { %v6293_v36 = vpop.f32.mrf.mxu3 }
 0x457   :  { %v6294_v7 = vadd.f32 %v6293_v36, %v6280_v16 }
 0x459   :  { %v6308_v54 = vadd.f32 %v6307_v57, %v6294_v7  ;;  %v6335_v51 = vpop.f32.mrf.mxu2 }
 0x45b   :  { %v6322_v32 = vadd.f32 %v6321_v18, %v6308_v54 }
 0x45d   :  { %v6336_v47 = vadd.f32 %v6335_v51, %v6322_v32 }
 0x465   :  { %v6361_v52 = vpop.f32.mrf.mxu0  ;;  %v6375_v41 = vpop.f32.mrf.mxu1 }
 0x46c   :  { %v6347_v12 = vpop.f32.mrf.mxu3 }
 0x46d   :  { %v6348_v38 = vadd.f32 %v6347_v12, %v6334_v63  ;;  %v6363_v31 = vpop.f32.mrf.mxu0  ;;  %v6377_v26 = vpop.f32.mrf.mxu1 }
 0x46f   :  { %v6362_v15 = vadd.f32 %v6361_v52, %v6348_v38 }
 0x471   :  { %v6376_v5 = vadd.f32 %v6375_v41, %v6362_v15  ;;  %v6389_v60 = vpop.f32.mrf.mxu2 }
 0x473   :  { %v6390_v53 = vadd.f32 %v6389_v60, %v6376_v5 }
 0x474   :  { %v6349_v55 = vpop.f32.mrf.mxu3 }
 0x475   :  { %v6350_v25 = vadd.f32 %v6349_v55, %v6336_v47 }
 0x477   :  { %v6364_v14 = vadd.f32 %v6363_v31, %v6350_v25 }
 0x479   :  { %v6378_v9 = vadd.f32 %v6377_v26, %v6364_v14  ;;  %v6391_v30 = vpop.f32.mrf.mxu2 }
 0x47b   :  { %v6392_v44 = vadd.f32 %v6391_v30, %v6378_v9 }
 0x48c   :  { %v6403_v2 = vpop.f32.mrf.mxu3 }
 0x48d   :  { %v6404_v4 = vadd.f32 %v6403_v2, %v6390_v53 }
 0x48f   :  { %6411 = vst [vmem:[#allocation11 + $0x18] sm:$0xff] %v6404_v4  ;;  %v6419_v17 = vsub.f32 %v6404_v4, %v10399_v58 }
 0x491   :  { %v6427_v11 = vmul.f32 %v6419_v17, %v6419_v17 }
 0x493   :  { %v6450_v24 = vrot.slane %v6427_v11, 4 }
 0x494   :  { %v6405_v33 = vpop.f32.mrf.mxu3 }
 0x495   :  { %v6451_v42 = vadd.f32 %v6450_v24, %v6427_v11  ;;  %v6406_v13 = vadd.f32 %v6405_v33, %v6392_v44 }
 0x497   :  { %v6452_v6 = vrot.slane %v6451_v42, 2  ;;  %6415 = vst [vmem:[#allocation11 + $0x38] sm:$0xff] %v6406_v13  ;;  %v6423_v23 = vsub.f32 %v6406_v13, %v10400_v39 }
 0x498   :  { %6504 = dma.vmem_to_hbm [thread:$0]  %s6497_s27, 1024, %s6499_s14, [#allocation4], %s10554_s29, %s10554_s29, %s10555_s30  }
 0x499   :  { %v6431_v21 = vmul.f32 %v6423_v23, %v6423_v23  ;;  %v6453_v1 = vadd.f32 %v6452_v6, %v6451_v42 }
 0x49b   :  { %v6474_v27 = vrot.slane %v6431_v21, 4  ;;  %v6454_v62 = vrot.slane %v6453_v1, 1 }
 0x49d   :  { %v6475_v3 = vadd.f32 %v6474_v27, %v6431_v21  ;;  %v6455_v59 = vadd.f32 %v6454_v62, %v6453_v1 }
 0x49f   :  { %v6476_v35 = vrot.slane %v6475_v3, 2  ;;  %v6484_v29 = vadd.f32 %v11141_v48, %v6455_v59 }
 0x4a1   :  { %v6477_v8 = vadd.f32 %v6476_v35, %v6475_v3 }
 0x4a3   :  { %v6478_v19 = vrot.slane %v6477_v8, 1 }
 0x4a5   :  { %v6479_v43 = vadd.f32 %v6478_v19, %v6477_v8 }
 0x4a7   :  { %v6485_v28 = vadd.f32 %v11144_v45, %v6479_v43 }
 0x4a9   :  { %v6489_v10 = vsel %vm6488_vm1, %v6485_v28, %v6484_v29 }
 0x4aa   :  { %6491 = vst [vmem:[%s11176_s12] sm:$0x3] %v6489_v10 }
 0x4ab   :  { %10551 = dma.done.wait [#allocation4], 1024  }
 0x4ac   :  { %10552 = vsyncadd [#allocation4], 4294966272 }
 0x4ad   :  { %6513 = vsyncpa [#allocation3], 1 }
 0x4ae   :  { %6514 = vsyncpa [#allocation6], 1 }
 0x4af   :  { %6515 = vsyncpa [#allocation9], 1 }
 0x4b0   :  { %6516 = vsyncpa [#allocation4], 1 }

</bundles_post_ra>
